<compile_context>
chip_gen: v5e
topology: v5e:2x2
jax: 0.10.0
libtpu: 0.0.40
codegen_flags: <defaults>
</compile_context>

<pallas_src>
import jax
import jax.numpy as jnp
from jax.experimental import pallas as pl
from jax.experimental.pallas import tpu as pltpu

# Static problem sizes (input chosen so 4*7*7 = 196 matches fc1 exactly).
B = 2                     # batch
H = W = 58                # input spatial (square input assumed: PH/PW derived per-axis below)
K = 3                     # conv kernel
C_OUT = 4                 # conv output channels
OH = H - K + 1            # 56
OW = W - K + 1            # 56
P = 8                     # pool window / stride
PH = OH // P              # 7
PW = OW // P              # 7
FLAT = C_OUT * PH * PW    # 196
HID = 64
N_CLASSES = 4
LANE = 128                # lane-dense padded output width

# Width-pool tree + tap-garbage-free slicing rely on exact pooling geometry.
assert OH % P == 0 and OW % P == 0 and FLAT == 4 * 7 * 7


# ---------------------------------------------------------------------------
# Single fused per-image kernel:
#   conv(1->4, 3x3, valid) + ReLU + maxpool(8,8) + fc1 + ReLU + fc2
# ---------------------------------------------------------------------------
def fused_kernel(wc_ref, bc_ref, x_ref, w1_ref, b1_ref, w2_ref, b2_ref, o_ref):
    # wc_ref : SMEM (36,)      conv weights, flattened [c, kh, kw] row-major
    # bc_ref : SMEM (4,)       conv bias
    # x_ref  : VMEM (1,1,58,58) one image
    # w1_ref : VMEM (28, 448)  fc1 weights, [r=(c,a), j*64+k]
    # b1_ref : VMEM (1, 64)
    # w2_ref : VMEM (64, 128)  fc2 weights zero-padded to 128 lanes
    # b2_ref : VMEM (1, 128)
    # o_ref  : VMEM (1, 1, 128) padded logits row
    xv = x_ref[0, 0]                                           # (58, 58)

    # Conv 3x3 (valid): taps outermost so only 1 tap + 4 accumulators are live.
    acc = [None] * C_OUT
    for di in range(K):
        for dj in range(K):
            t = di * K + dj
            tap = xv[di:di + OH, dj:dj + OW]                   # (56, 56)
            for c in range(C_OUT):
                contrib = wc_ref[c * K * K + t] * tap
                acc[c] = contrib if t == 0 else acc[c] + contrib

    # Bias + ReLU; stack channels along sublanes (rows = c*56 + oh, 8-aligned).
    r = jnp.concatenate(
        [jnp.maximum(acc[c] + bc_ref[c], 0.0) for c in range(C_OUT)],
        axis=0)                                                # (224, 56)

    # Height pool: one sublane-group-aligned reshape + max. Rows become (c, a).
    hp = jnp.max(r.reshape(C_OUT * PH, P, OW), axis=1)         # (28, 56)

    # Width pool: shifted-slice max tree; the max over ow in [8j, 8j+8) lands
    # at lane 8j. No compaction needed — the fc1 contraction below only uses
    # those lanes.
    m = jnp.maximum(hp[:, :-1], hp[:, 1:])                     # (28, 55)
    m = jnp.maximum(m[:, :-2], m[:, 2:])                       # (28, 53)
    m = jnp.maximum(m[:, :-4], m[:, 4:])                       # (28, 49)

    # fc1 without any in-kernel flatten: contract the 28 (c,a) sublanes on the
    # MXU against w1 reshaped to (28, 7*64). The needed entries are
    #   cmat[8j, 64j + k] = sum_r pooled[r, j] * w1[7r + j, k].
    cmat = jax.lax.dot_general(
        m, w1_ref[...],
        dimension_numbers=(((0,), (0,)), ((), ())),
        preferred_element_type=jnp.float32)                    # (49, 448)

    h = b1_ref[...]                                            # (1, 64)
    for j in range(PW):
        h = h + cmat[8 * j:8 * j + 1, HID * j:HID * (j + 1)]
    h = jnp.maximum(h, 0.0)

    # fc2 into a lane-dense padded (1, 128) row; lanes >= 4 stay zero.
    o_ref[0] = (jnp.dot(h, w2_ref[...], preferred_element_type=jnp.float32)
                + b2_ref[...])


# ---------------------------------------------------------------------------
# One-time (pre-jit) weight preparation: pure layout work, never re-run per
# forward call and never inside the kernel.
# ---------------------------------------------------------------------------
def prepare_params(w_conv, b_conv, w1, b1, w2, b2):
    w1b = jnp.asarray(w1).reshape(C_OUT * PH, PW * HID)              # (28, 448)
    w2p = jnp.zeros((HID, LANE), jnp.float32).at[:, :N_CLASSES].set(w2)
    b2p = jnp.zeros((1, LANE), jnp.float32).at[0, :N_CLASSES].set(b2)
    return (jnp.asarray(w_conv).reshape(-1),        # (36,)
            jnp.asarray(b_conv),                    # (4,)
            w1b,
            jnp.asarray(b1).reshape(1, HID),        # (1, 64)
            w2p, b2p)


# ---------------------------------------------------------------------------
# Full forward: single pallas_call, grid=(B,) (one image per step; parallel
# over TensorCores on v7x). No wrapper-side data movement on x.
# ---------------------------------------------------------------------------
@jax.jit
def tumor_cnn_forward(x, wc_flat, b_conv, w1b, b1r, w2p, b2p):
    out = pl.pallas_call(
        fused_kernel,
        out_shape=jax.ShapeDtypeStruct((B, 1, LANE), jnp.float32),
        grid_spec=pltpu.PrefetchScalarGridSpec(
            num_scalar_prefetch=0,
            grid=(B,),
            in_specs=[
                pl.BlockSpec(memory_space=pltpu.MemorySpace.SMEM),       # conv w
                pl.BlockSpec(memory_space=pltpu.MemorySpace.SMEM),       # conv b
                pl.BlockSpec((1, 1, H, W), lambda b: (b, 0, 0, 0)),      # x
                pl.BlockSpec((C_OUT * PH, PW * HID), lambda b: (0, 0)),  # w1b
                pl.BlockSpec((1, HID), lambda b: (0, 0)),                # b1
                pl.BlockSpec((HID, LANE), lambda b: (0, 0)),             # w2p
                pl.BlockSpec((1, LANE), lambda b: (0, 0)),               # b2p
            ],
            out_specs=pl.BlockSpec((1, 1, LANE), lambda b: (b, 0, 0)),
        ),
        compiler_params=pltpu.CompilerParams(
            dimension_semantics=("parallel",)),
    )(wc_flat, b_conv, x, w1b, b1r, w2p, b2p)
    return out[:, 0, :N_CLASSES]


# Pure-JAX reference for validation.
def reference(x, w_conv, b_conv, w1, b1, w2, b2):
    conv = jax.lax.conv_general_dilated(
        x, w_conv, window_strides=(1, 1), padding="VALID",
        dimension_numbers=("NCHW", "OIHW", "NCHW"),
        precision=jax.lax.Precision.HIGHEST)
    conv = jnp.maximum(conv + b_conv.reshape(1, C_OUT, 1, 1), 0.0)
    pooled = jax.lax.reduce_window(
        conv, -jnp.inf, jax.lax.max, (1, 1, P, P), (1, 1, P, P), "VALID")
    flat = pooled.reshape(x.shape[0], -1)
    h = jnp.maximum(
        jnp.dot(flat, w1, precision=jax.lax.Precision.HIGHEST) + b1, 0.0)
    return jnp.dot(h, w2, precision=jax.lax.Precision.HIGHEST) + b2


if __name__ == "__main__":
    key = jax.random.PRNGKey(0)
    kx, kwc, kbc, kw1, kb1, kw2, kb2 = jax.random.split(key, 7)

    # Deterministic synthetic parameters (shapes from TumorCNN.__init__).
    x = jax.random.normal(kx, (B, 1, H, W), jnp.float32)
    w_conv = jax.random.normal(kwc, (C_OUT, 1, K, K), jnp.float32) * 0.1
    b_conv = jax.random.normal(kbc, (C_OUT,), jnp.float32) * 0.1
    # fc weights stored as (in, out) == transpose of the torch (out, in) layout.
    w1 = jax.random.normal(kw1, (FLAT, HID), jnp.float32) * 0.05
    b1 = jax.random.normal(kb1, (HID,), jnp.float32) * 0.05
    w2 = jax.random.normal(kw2, (HID, N_CLASSES), jnp.float32) * 0.05
    b2 = jax.random.normal(kb2, (N_CLASSES,), jnp.float32) * 0.05

    params = prepare_params(w_conv, b_conv, w1, b1, w2, b2)
    out = tumor_cnn_forward(x, *params)
    out = jax.block_until_ready(out)

    ref = reference(x, w_conv, b_conv, w1, b1, w2, b2)
    assert out.shape == (B, N_CLASSES)
    assert jnp.allclose(out, ref, rtol=1e-3, atol=1e-3), (out, ref)

    print("KERNEL_OK")
</pallas_src>

<mosaic_0001>
module attributes {stable_mosaic.version = 11 : i64} {
  func.func @fused_kernel(%arg0: i32, %arg1: memref<36xf32, #tpu.memory_space<smem>>, %arg2: memref<4xf32, #tpu.memory_space<smem>>, %arg3: memref<1x1x58x58xf32, #tpu.memory_space<vmem>>, %arg4: memref<28x448xf32, #tpu.memory_space<vmem>>, %arg5: memref<1x64xf32, #tpu.memory_space<vmem>>, %arg6: memref<64x128xf32, #tpu.memory_space<vmem>>, %arg7: memref<1x128xf32, #tpu.memory_space<vmem>>, %arg8: memref<1x1x128xf32, #tpu.memory_space<vmem>>) attributes {dimension_semantics = [#tpu.dimension_semantics<parallel>], iteration_bounds = array<i64: 2>, scalar_prefetch = 0 : i64, scratch_operands = 0 : i64, tpu.core_type = #tpu.core_type<tc>, window_params = [{transform_indices = @transform_0, window_bounds = array<i64: 36>}, {transform_indices = @transform_1, window_bounds = array<i64: 4>}, {transform_indices = @transform_2, window_bounds = array<i64: 1, 1, 58, 58>}, {pipeline_mode = #tpu.pipeline_mode<synchronous>, transform_indices = @transform_3, window_bounds = array<i64: 28, 448>}, {pipeline_mode = #tpu.pipeline_mode<synchronous>, transform_indices = @transform_4, window_bounds = array<i64: 1, 64>}, {pipeline_mode = #tpu.pipeline_mode<synchronous>, transform_indices = @transform_5, window_bounds = array<i64: 64, 128>}, {pipeline_mode = #tpu.pipeline_mode<synchronous>, transform_indices = @transform_6, window_bounds = array<i64: 1, 128>}, {transform_indices = @transform_7, window_bounds = array<i64: 1, 1, 128>}]} {
    %c0 = arith.constant 0 : index
    %c0_0 = arith.constant 0 : index
    %c0_1 = arith.constant 0 : index
    %c0_2 = arith.constant 0 : index
    %0 = vector.load %arg3[%c0, %c0_0, %c0_1, %c0_2] : memref<1x1x58x58xf32, #tpu.memory_space<vmem>>, vector<1x1x58x58xf32>
    %1 = vector.shape_cast %0 : vector<1x1x58x58xf32> to vector<58x58xf32>
    %2 = vector.extract_strided_slice %1 {offsets = [0, 0], sizes = [56, 56], strides = [1, 1]} : vector<58x58xf32> to vector<56x56xf32>
    %c0_3 = arith.constant 0 : index
    %3 = memref.load %arg1[%c0_3] : memref<36xf32, #tpu.memory_space<smem>>
    %4 = vector.broadcast %3 : f32 to vector<56x56xf32>
    %5 = arith.mulf %4, %2 : vector<56x56xf32>
    %c9 = arith.constant 9 : index
    %6 = memref.load %arg1[%c9] : memref<36xf32, #tpu.memory_space<smem>>
    %7 = vector.broadcast %6 : f32 to vector<56x56xf32>
    %8 = arith.mulf %7, %2 : vector<56x56xf32>
    %c18 = arith.constant 18 : index
    %9 = memref.load %arg1[%c18] : memref<36xf32, #tpu.memory_space<smem>>
    %10 = vector.broadcast %9 : f32 to vector<56x56xf32>
    %11 = arith.mulf %10, %2 : vector<56x56xf32>
    %c27 = arith.constant 27 : index
    %12 = memref.load %arg1[%c27] : memref<36xf32, #tpu.memory_space<smem>>
    %13 = vector.broadcast %12 : f32 to vector<56x56xf32>
    %14 = arith.mulf %13, %2 : vector<56x56xf32>
    %15 = vector.extract_strided_slice %1 {offsets = [0, 1], sizes = [56, 56], strides = [1, 1]} : vector<58x58xf32> to vector<56x56xf32>
    %c1 = arith.constant 1 : index
    %16 = memref.load %arg1[%c1] : memref<36xf32, #tpu.memory_space<smem>>
    %17 = vector.broadcast %16 : f32 to vector<56x56xf32>
    %18 = arith.mulf %17, %15 : vector<56x56xf32>
    %19 = arith.addf %5, %18 : vector<56x56xf32>
    %c10 = arith.constant 10 : index
    %20 = memref.load %arg1[%c10] : memref<36xf32, #tpu.memory_space<smem>>
    %21 = vector.broadcast %20 : f32 to vector<56x56xf32>
    %22 = arith.mulf %21, %15 : vector<56x56xf32>
    %23 = arith.addf %8, %22 : vector<56x56xf32>
    %c19 = arith.constant 19 : index
    %24 = memref.load %arg1[%c19] : memref<36xf32, #tpu.memory_space<smem>>
    %25 = vector.broadcast %24 : f32 to vector<56x56xf32>
    %26 = arith.mulf %25, %15 : vector<56x56xf32>
    %27 = arith.addf %11, %26 : vector<56x56xf32>
    %c28 = arith.constant 28 : index
    %28 = memref.load %arg1[%c28] : memref<36xf32, #tpu.memory_space<smem>>
    %29 = vector.broadcast %28 : f32 to vector<56x56xf32>
    %30 = arith.mulf %29, %15 : vector<56x56xf32>
    %31 = arith.addf %14, %30 : vector<56x56xf32>
    %32 = vector.extract_strided_slice %1 {offsets = [0, 2], sizes = [56, 56], strides = [1, 1]} : vector<58x58xf32> to vector<56x56xf32>
    %c2 = arith.constant 2 : index
    %33 = memref.load %arg1[%c2] : memref<36xf32, #tpu.memory_space<smem>>
    %34 = vector.broadcast %33 : f32 to vector<56x56xf32>
    %35 = arith.mulf %34, %32 : vector<56x56xf32>
    %36 = arith.addf %19, %35 : vector<56x56xf32>
    %c11 = arith.constant 11 : index
    %37 = memref.load %arg1[%c11] : memref<36xf32, #tpu.memory_space<smem>>
    %38 = vector.broadcast %37 : f32 to vector<56x56xf32>
    %39 = arith.mulf %38, %32 : vector<56x56xf32>
    %40 = arith.addf %23, %39 : vector<56x56xf32>
    %c20 = arith.constant 20 : index
    %41 = memref.load %arg1[%c20] : memref<36xf32, #tpu.memory_space<smem>>
    %42 = vector.broadcast %41 : f32 to vector<56x56xf32>
    %43 = arith.mulf %42, %32 : vector<56x56xf32>
    %44 = arith.addf %27, %43 : vector<56x56xf32>
    %c29 = arith.constant 29 : index
    %45 = memref.load %arg1[%c29] : memref<36xf32, #tpu.memory_space<smem>>
    %46 = vector.broadcast %45 : f32 to vector<56x56xf32>
    %47 = arith.mulf %46, %32 : vector<56x56xf32>
    %48 = arith.addf %31, %47 : vector<56x56xf32>
    %49 = vector.extract_strided_slice %1 {offsets = [1, 0], sizes = [56, 56], strides = [1, 1]} : vector<58x58xf32> to vector<56x56xf32>
    %c3 = arith.constant 3 : index
    %50 = memref.load %arg1[%c3] : memref<36xf32, #tpu.memory_space<smem>>
    %51 = vector.broadcast %50 : f32 to vector<56x56xf32>
    %52 = arith.mulf %51, %49 : vector<56x56xf32>
    %53 = arith.addf %36, %52 : vector<56x56xf32>
    %c12 = arith.constant 12 : index
    %54 = memref.load %arg1[%c12] : memref<36xf32, #tpu.memory_space<smem>>
    %55 = vector.broadcast %54 : f32 to vector<56x56xf32>
    %56 = arith.mulf %55, %49 : vector<56x56xf32>
    %57 = arith.addf %40, %56 : vector<56x56xf32>
    %c21 = arith.constant 21 : index
    %58 = memref.load %arg1[%c21] : memref<36xf32, #tpu.memory_space<smem>>
    %59 = vector.broadcast %58 : f32 to vector<56x56xf32>
    %60 = arith.mulf %59, %49 : vector<56x56xf32>
    %61 = arith.addf %44, %60 : vector<56x56xf32>
    %c30 = arith.constant 30 : index
    %62 = memref.load %arg1[%c30] : memref<36xf32, #tpu.memory_space<smem>>
    %63 = vector.broadcast %62 : f32 to vector<56x56xf32>
    %64 = arith.mulf %63, %49 : vector<56x56xf32>
    %65 = arith.addf %48, %64 : vector<56x56xf32>
    %66 = vector.extract_strided_slice %1 {offsets = [1, 1], sizes = [56, 56], strides = [1, 1]} : vector<58x58xf32> to vector<56x56xf32>
    %c4 = arith.constant 4 : index
    %67 = memref.load %arg1[%c4] : memref<36xf32, #tpu.memory_space<smem>>
    %68 = vector.broadcast %67 : f32 to vector<56x56xf32>
    %69 = arith.mulf %68, %66 : vector<56x56xf32>
    %70 = arith.addf %53, %69 : vector<56x56xf32>
    %c13 = arith.constant 13 : index
    %71 = memref.load %arg1[%c13] : memref<36xf32, #tpu.memory_space<smem>>
    %72 = vector.broadcast %71 : f32 to vector<56x56xf32>
    %73 = arith.mulf %72, %66 : vector<56x56xf32>
    %74 = arith.addf %57, %73 : vector<56x56xf32>
    %c22 = arith.constant 22 : index
    %75 = memref.load %arg1[%c22] : memref<36xf32, #tpu.memory_space<smem>>
    %76 = vector.broadcast %75 : f32 to vector<56x56xf32>
    %77 = arith.mulf %76, %66 : vector<56x56xf32>
    %78 = arith.addf %61, %77 : vector<56x56xf32>
    %c31 = arith.constant 31 : index
    %79 = memref.load %arg1[%c31] : memref<36xf32, #tpu.memory_space<smem>>
    %80 = vector.broadcast %79 : f32 to vector<56x56xf32>
    %81 = arith.mulf %80, %66 : vector<56x56xf32>
    %82 = arith.addf %65, %81 : vector<56x56xf32>
    %83 = vector.extract_strided_slice %1 {offsets = [1, 2], sizes = [56, 56], strides = [1, 1]} : vector<58x58xf32> to vector<56x56xf32>
    %c5 = arith.constant 5 : index
    %84 = memref.load %arg1[%c5] : memref<36xf32, #tpu.memory_space<smem>>
    %85 = vector.broadcast %84 : f32 to vector<56x56xf32>
    %86 = arith.mulf %85, %83 : vector<56x56xf32>
    %87 = arith.addf %70, %86 : vector<56x56xf32>
    %c14 = arith.constant 14 : index
    %88 = memref.load %arg1[%c14] : memref<36xf32, #tpu.memory_space<smem>>
    %89 = vector.broadcast %88 : f32 to vector<56x56xf32>
    %90 = arith.mulf %89, %83 : vector<56x56xf32>
    %91 = arith.addf %74, %90 : vector<56x56xf32>
    %c23 = arith.constant 23 : index
    %92 = memref.load %arg1[%c23] : memref<36xf32, #tpu.memory_space<smem>>
    %93 = vector.broadcast %92 : f32 to vector<56x56xf32>
    %94 = arith.mulf %93, %83 : vector<56x56xf32>
    %95 = arith.addf %78, %94 : vector<56x56xf32>
    %c32 = arith.constant 32 : index
    %96 = memref.load %arg1[%c32] : memref<36xf32, #tpu.memory_space<smem>>
    %97 = vector.broadcast %96 : f32 to vector<56x56xf32>
    %98 = arith.mulf %97, %83 : vector<56x56xf32>
    %99 = arith.addf %82, %98 : vector<56x56xf32>
    %100 = vector.extract_strided_slice %1 {offsets = [2, 0], sizes = [56, 56], strides = [1, 1]} : vector<58x58xf32> to vector<56x56xf32>
    %c6 = arith.constant 6 : index
    %101 = memref.load %arg1[%c6] : memref<36xf32, #tpu.memory_space<smem>>
    %102 = vector.broadcast %101 : f32 to vector<56x56xf32>
    %103 = arith.mulf %102, %100 : vector<56x56xf32>
    %104 = arith.addf %87, %103 : vector<56x56xf32>
    %c15 = arith.constant 15 : index
    %105 = memref.load %arg1[%c15] : memref<36xf32, #tpu.memory_space<smem>>
    %106 = vector.broadcast %105 : f32 to vector<56x56xf32>
    %107 = arith.mulf %106, %100 : vector<56x56xf32>
    %108 = arith.addf %91, %107 : vector<56x56xf32>
    %c24 = arith.constant 24 : index
    %109 = memref.load %arg1[%c24] : memref<36xf32, #tpu.memory_space<smem>>
    %110 = vector.broadcast %109 : f32 to vector<56x56xf32>
    %111 = arith.mulf %110, %100 : vector<56x56xf32>
    %112 = arith.addf %95, %111 : vector<56x56xf32>
    %c33 = arith.constant 33 : index
    %113 = memref.load %arg1[%c33] : memref<36xf32, #tpu.memory_space<smem>>
    %114 = vector.broadcast %113 : f32 to vector<56x56xf32>
    %115 = arith.mulf %114, %100 : vector<56x56xf32>
    %116 = arith.addf %99, %115 : vector<56x56xf32>
    %117 = vector.extract_strided_slice %1 {offsets = [2, 1], sizes = [56, 56], strides = [1, 1]} : vector<58x58xf32> to vector<56x56xf32>
    %c7 = arith.constant 7 : index
    %118 = memref.load %arg1[%c7] : memref<36xf32, #tpu.memory_space<smem>>
    %119 = vector.broadcast %118 : f32 to vector<56x56xf32>
    %120 = arith.mulf %119, %117 : vector<56x56xf32>
    %121 = arith.addf %104, %120 : vector<56x56xf32>
    %c16 = arith.constant 16 : index
    %122 = memref.load %arg1[%c16] : memref<36xf32, #tpu.memory_space<smem>>
    %123 = vector.broadcast %122 : f32 to vector<56x56xf32>
    %124 = arith.mulf %123, %117 : vector<56x56xf32>
    %125 = arith.addf %108, %124 : vector<56x56xf32>
    %c25 = arith.constant 25 : index
    %126 = memref.load %arg1[%c25] : memref<36xf32, #tpu.memory_space<smem>>
    %127 = vector.broadcast %126 : f32 to vector<56x56xf32>
    %128 = arith.mulf %127, %117 : vector<56x56xf32>
    %129 = arith.addf %112, %128 : vector<56x56xf32>
    %c34 = arith.constant 34 : index
    %130 = memref.load %arg1[%c34] : memref<36xf32, #tpu.memory_space<smem>>
    %131 = vector.broadcast %130 : f32 to vector<56x56xf32>
    %132 = arith.mulf %131, %117 : vector<56x56xf32>
    %133 = arith.addf %116, %132 : vector<56x56xf32>
    %134 = vector.extract_strided_slice %1 {offsets = [2, 2], sizes = [56, 56], strides = [1, 1]} : vector<58x58xf32> to vector<56x56xf32>
    %c8 = arith.constant 8 : index
    %135 = memref.load %arg1[%c8] : memref<36xf32, #tpu.memory_space<smem>>
    %136 = vector.broadcast %135 : f32 to vector<56x56xf32>
    %137 = arith.mulf %136, %134 : vector<56x56xf32>
    %138 = arith.addf %121, %137 : vector<56x56xf32>
    %c17 = arith.constant 17 : index
    %139 = memref.load %arg1[%c17] : memref<36xf32, #tpu.memory_space<smem>>
    %140 = vector.broadcast %139 : f32 to vector<56x56xf32>
    %141 = arith.mulf %140, %134 : vector<56x56xf32>
    %142 = arith.addf %125, %141 : vector<56x56xf32>
    %c26 = arith.constant 26 : index
    %143 = memref.load %arg1[%c26] : memref<36xf32, #tpu.memory_space<smem>>
    %144 = vector.broadcast %143 : f32 to vector<56x56xf32>
    %145 = arith.mulf %144, %134 : vector<56x56xf32>
    %146 = arith.addf %129, %145 : vector<56x56xf32>
    %c35 = arith.constant 35 : index
    %147 = memref.load %arg1[%c35] : memref<36xf32, #tpu.memory_space<smem>>
    %148 = vector.broadcast %147 : f32 to vector<56x56xf32>
    %149 = arith.mulf %148, %134 : vector<56x56xf32>
    %150 = arith.addf %133, %149 : vector<56x56xf32>
    %c0_4 = arith.constant 0 : index
    %151 = memref.load %arg2[%c0_4] : memref<4xf32, #tpu.memory_space<smem>>
    %152 = vector.broadcast %151 : f32 to vector<56x56xf32>
    %153 = arith.addf %138, %152 : vector<56x56xf32>
    %cst = arith.constant 0.000000e+00 : f32
    %154 = vector.broadcast %cst : f32 to vector<56x56xf32>
    %155 = arith.maximumf %153, %154 : vector<56x56xf32>
    %c1_5 = arith.constant 1 : index
    %156 = memref.load %arg2[%c1_5] : memref<4xf32, #tpu.memory_space<smem>>
    %157 = vector.broadcast %156 : f32 to vector<56x56xf32>
    %158 = arith.addf %142, %157 : vector<56x56xf32>
    %cst_6 = arith.constant 0.000000e+00 : f32
    %159 = vector.broadcast %cst_6 : f32 to vector<56x56xf32>
    %160 = arith.maximumf %158, %159 : vector<56x56xf32>
    %c2_7 = arith.constant 2 : index
    %161 = memref.load %arg2[%c2_7] : memref<4xf32, #tpu.memory_space<smem>>
    %162 = vector.broadcast %161 : f32 to vector<56x56xf32>
    %163 = arith.addf %146, %162 : vector<56x56xf32>
    %cst_8 = arith.constant 0.000000e+00 : f32
    %164 = vector.broadcast %cst_8 : f32 to vector<56x56xf32>
    %165 = arith.maximumf %163, %164 : vector<56x56xf32>
    %c3_9 = arith.constant 3 : index
    %166 = memref.load %arg2[%c3_9] : memref<4xf32, #tpu.memory_space<smem>>
    %167 = vector.broadcast %166 : f32 to vector<56x56xf32>
    %168 = arith.addf %150, %167 : vector<56x56xf32>
    %cst_10 = arith.constant 0.000000e+00 : f32
    %169 = vector.broadcast %cst_10 : f32 to vector<56x56xf32>
    %170 = arith.maximumf %168, %169 : vector<56x56xf32>
    %171 = tpu.concatenate %155, %160, %165, %170 in 0 : vector<56x56xf32>, vector<56x56xf32>, vector<56x56xf32>, vector<56x56xf32> -> vector<224x56xf32>
    %172 = vector.shape_cast %171 : vector<224x56xf32> to vector<28x8x56xf32>
    %cst_11 = arith.constant dense<0xFF800000> : vector<28x56xf32>
    %173 = vector.multi_reduction <maximumf>, %172, %cst_11 [1] : vector<28x8x56xf32> to vector<28x56xf32>
    %174 = vector.extract_strided_slice %173 {offsets = [0, 0], sizes = [28, 55], strides = [1, 1]} : vector<28x56xf32> to vector<28x55xf32>
    %175 = vector.extract_strided_slice %173 {offsets = [0, 1], sizes = [28, 55], strides = [1, 1]} : vector<28x56xf32> to vector<28x55xf32>
    %176 = arith.maximumf %174, %175 : vector<28x55xf32>
    %177 = vector.extract_strided_slice %176 {offsets = [0, 0], sizes = [28, 53], strides = [1, 1]} : vector<28x55xf32> to vector<28x53xf32>
    %178 = vector.extract_strided_slice %176 {offsets = [0, 2], sizes = [28, 53], strides = [1, 1]} : vector<28x55xf32> to vector<28x53xf32>
    %179 = arith.maximumf %177, %178 : vector<28x53xf32>
    %180 = vector.extract_strided_slice %179 {offsets = [0, 0], sizes = [28, 49], strides = [1, 1]} : vector<28x53xf32> to vector<28x49xf32>
    %181 = vector.extract_strided_slice %179 {offsets = [0, 4], sizes = [28, 49], strides = [1, 1]} : vector<28x53xf32> to vector<28x49xf32>
    %182 = arith.maximumf %180, %181 : vector<28x49xf32>
    %c0_12 = arith.constant 0 : index
    %c0_13 = arith.constant 0 : index
    %183 = vector.load %arg4[%c0_12, %c0_13] : memref<28x448xf32, #tpu.memory_space<vmem>>, vector<28x448xf32>
    %cst_14 = arith.constant dense<0.000000e+00> : vector<49x448xf32>
    %184 = tpu.matmul %182, %183, %cst_14 {dimension_numbers = #tpu.dot_dimension_numbers<[0], [0], [1], [1], [0, 1, 1, 1], [], []>} : vector<28x49xf32>, vector<28x448xf32>, vector<49x448xf32> -> vector<49x448xf32>
    %c0_15 = arith.constant 0 : index
    %c0_16 = arith.constant 0 : index
    %185 = vector.load %arg5[%c0_15, %c0_16] : memref<1x64xf32, #tpu.memory_space<vmem>>, vector<1x64xf32>
    %186 = vector.extract_strided_slice %184 {offsets = [0, 0], sizes = [1, 64], strides = [1, 1]} : vector<49x448xf32> to vector<1x64xf32>
    %187 = arith.addf %185, %186 : vector<1x64xf32>
    %188 = vector.extract_strided_slice %184 {offsets = [8, 64], sizes = [1, 64], strides = [1, 1]} : vector<49x448xf32> to vector<1x64xf32>
    %189 = arith.addf %187, %188 : vector<1x64xf32>
    %190 = vector.extract_strided_slice %184 {offsets = [16, 128], sizes = [1, 64], strides = [1, 1]} : vector<49x448xf32> to vector<1x64xf32>
    %191 = arith.addf %189, %190 : vector<1x64xf32>
    %192 = vector.extract_strided_slice %184 {offsets = [24, 192], sizes = [1, 64], strides = [1, 1]} : vector<49x448xf32> to vector<1x64xf32>
    %193 = arith.addf %191, %192 : vector<1x64xf32>
    %194 = vector.extract_strided_slice %184 {offsets = [32, 256], sizes = [1, 64], strides = [1, 1]} : vector<49x448xf32> to vector<1x64xf32>
    %195 = arith.addf %193, %194 : vector<1x64xf32>
    %196 = vector.extract_strided_slice %184 {offsets = [40, 320], sizes = [1, 64], strides = [1, 1]} : vector<49x448xf32> to vector<1x64xf32>
    %197 = arith.addf %195, %196 : vector<1x64xf32>
    %198 = vector.extract_strided_slice %184 {offsets = [48, 384], sizes = [1, 64], strides = [1, 1]} : vector<49x448xf32> to vector<1x64xf32>
    %199 = arith.addf %197, %198 : vector<1x64xf32>
    %cst_17 = arith.constant 0.000000e+00 : f32
    %200 = vector.broadcast %cst_17 : f32 to vector<1x64xf32>
    %201 = arith.maximumf %199, %200 : vector<1x64xf32>
    %c0_18 = arith.constant 0 : index
    %c0_19 = arith.constant 0 : index
    %202 = vector.load %arg6[%c0_18, %c0_19] : memref<64x128xf32, #tpu.memory_space<vmem>>, vector<64x128xf32>
    %cst_20 = arith.constant dense<0.000000e+00> : vector<1x128xf32>
    %203 = tpu.matmul %201, %202, %cst_20 {dimension_numbers = #tpu.dot_dimension_numbers<[1], [0], [0], [1], [0, 0, 1, 1], [], []>} : vector<1x64xf32>, vector<64x128xf32>, vector<1x128xf32> -> vector<1x128xf32>
    %c0_21 = arith.constant 0 : index
    %c0_22 = arith.constant 0 : index
    %204 = vector.load %arg7[%c0_21, %c0_22] : memref<1x128xf32, #tpu.memory_space<vmem>>, vector<1x128xf32>
    %205 = arith.addf %203, %204 : vector<1x128xf32>
    %c0_23 = arith.constant 0 : index
    %c0_24 = arith.constant 0 : index
    %c0_25 = arith.constant 0 : index
    %206 = vector.load %arg8[%c0_23, %c0_24, %c0_25] : memref<1x1x128xf32, #tpu.memory_space<vmem>>, vector<1x1x128xf32>
    %207 = vector.shape_cast %206 : vector<1x1x128xf32> to vector<1x128xf32>
    %208 = vector.shape_cast %205 : vector<1x128xf32> to vector<1x1x128xf32>
    tpu.vector_store %arg8[%c0_23, %c0_24, %c0_25], %208 {strides = array<i32>} : memref<1x1x128xf32, #tpu.memory_space<vmem>>, vector<1x1x128xf32>,
    return
  }
  func.func @transform_0(%arg0: i32) -> i32 {
    %c0_i32 = arith.constant 0 : i32
    %c0_i32_0 = arith.constant 0 : i32
    return %c0_i32 : i32
  }
  func.func @transform_1(%arg0: i32) -> i32 {
    %c0_i32 = arith.constant 0 : i32
    %c0_i32_0 = arith.constant 0 : i32
    return %c0_i32 : i32
  }
  func.func @transform_2(%arg0: i32) -> (i32, i32, i32, i32) {
    %c0_i32 = arith.constant 0 : i32
    %c0_i32_0 = arith.constant 0 : i32
    %c0_i32_1 = arith.constant 0 : i32
    %c0_i32_2 = arith.constant 0 : i32
    return %arg0, %c0_i32, %c0_i32_0, %c0_i32_1 : i32, i32, i32, i32
  }
  func.func @transform_3(%arg0: i32) -> (i32, i32) {
    %c0_i32 = arith.constant 0 : i32
    %c0_i32_0 = arith.constant 0 : i32
    %c0_i32_1 = arith.constant 0 : i32
    return %c0_i32, %c0_i32_0 : i32, i32
  }
  func.func @transform_4(%arg0: i32) -> (i32, i32) {
    %c0_i32 = arith.constant 0 : i32
    %c0_i32_0 = arith.constant 0 : i32
    %c0_i32_1 = arith.constant 0 : i32
    return %c0_i32, %c0_i32_0 : i32, i32
  }
  func.func @transform_5(%arg0: i32) -> (i32, i32) {
    %c0_i32 = arith.constant 0 : i32
    %c0_i32_0 = arith.constant 0 : i32
    %c0_i32_1 = arith.constant 0 : i32
    return %c0_i32, %c0_i32_0 : i32, i32
  }
  func.func @transform_6(%arg0: i32) -> (i32, i32) {
    %c0_i32 = arith.constant 0 : i32
    %c0_i32_0 = arith.constant 0 : i32
    %c0_i32_1 = arith.constant 0 : i32
    return %c0_i32, %c0_i32_0 : i32, i32
  }
  func.func @transform_7(%arg0: i32) -> (i32, i32, i32) {
    %c0_i32 = arith.constant 0 : i32
    %c0_i32_0 = arith.constant 0 : i32
    %c0_i32_1 = arith.constant 0 : i32
    return %arg0, %c0_i32, %c0_i32_0 : i32, i32, i32
  }
}

</mosaic_0001>

<bundles_post_ra>
// kernel: tumor_cnn_forward.1
= control target key start
LH: loop header
LB: loop body
LE: loop exit
PB: predicated region body
PF: predicated region fallthrough
CT: control target
= control target key end

     0   :  { %12 = vsyncpa [#allocation4], 0  ;;  %s6206_s0 = inlined_call_operand.vmem [shape: f32[36], index: 0, kind: input, shape index: {}]   ;;  %s6207_s1 = inlined_call_operand.vmem [shape: f32[4], index: 1, kind: input, shape index: {}]   ;;  %s6208_s2 = inlined_call_operand.vmem [shape: f32[2,1,58,58], index: 2, kind: input, shape index: {}]   ;;  %s6209_s3 = inlined_call_operand.vmem [shape: f32[28,448], index: 3, kind: input, shape index: {}]   ;;  %s6210_s4 = inlined_call_operand.vmem [shape: f32[1,64], index: 4, kind: input, shape index: {}]   ;;  %s6211_s5 = inlined_call_operand.vmem [shape: f32[64,128], index: 5, kind: input, shape index: {}]   ;;  %s6212_s6 = inlined_call_operand.vmem [shape: f32[1,128], index: 6, kind: input, shape index: {}]   ;;  %s6213_s7 = inlined_call_operand.hbm [shape: f32[2,1,128], index: 7, kind: output, shape index: {}]  }
   0x1   :  { %13 = vsyncpa [#allocation6], 0 }
   0x2   :  { %14 = vsyncpa [#allocation3], 0 }
   0x3   :  { %16 = vsyncpa [#allocation3 + $0x1], 0  ;;  %s3493_s24 = smov 0   ;;  %s3495_s25 = smov 0  }
   0x4   :  { %s3497_s26 = smov 0   ;;  %s3499_s27 = smov 0  }
   0x5 LB: > { %s3514_s28 = sadd.s32 4294967295, %s3445_s27   ;;  %s3180_s29 = sadd.s32 4294967294, %s3445_s27   ;;  %s3445_s27 = sphi %s3499_s27, %s6611_s27   ;;  %s3441_s26 = sphi %s3497_s26, %s6610_s26   ;;  %s3437_s25 = sphi %s3495_s25, %s6609_s25   ;;  %s3433_s24 = sphi %s3493_s24, %s6608_s24  }
   0x6   : > { %s3518_s30 = sadd.s32 1, %s3445_s27   ;;  %s181_s8 = sadd.s32 1, %s3441_s26 }
   0x7   : > { %s178_s9 = ssub.s32 %s3445_s27, %s3518_s30  ;;  %p191_p0 = scmp.ne.s32.totalorder %s3441_s26, %s3437_s25 }
   0x8   : > { %p179_p1 = scmp.eq.s32.totalorder %s178_s9, 0  ;;  %p192_p2 = scmp.eq.s32.totalorder %s3514_s28, 1 }
   0x9   : > { %p197_p3 = scmp.ne.s32.totalorder %s3437_s25, %s3433_s24  ;;  %p198_p4 = scmp.eq.s32.totalorder %s3180_s29, 1 }
   0xa   : > { %s3529_s10 = scalar_select %p179_p1, %s3441_s26, %s181_s8  }
   0xb   : > { %p3531_p5 = por %p192_p2, %p191_p0  ;;  %p3535_p6 = por %p198_p4, %p197_p3 }
   0xc   : > { %p3181_p7 = scmp.ge.s32.totalorder %s3445_s27, 1  ;;  %p205_p8 = scmp.lt.s32.totalorder %s3445_s27, 3 }
   0xd   : > { %p3285_p9 = scmp.eq.s32.totalorder %s3514_s28, 0  ;;  %s217_s15 = sshll.u32 %s6206_s0, 4  ;;  %s218_s15 = int_to_ptr.vmem [resolvable:$true] %s217_s15 }
   0xe   : > { %p206_p10 = pnand %p3181_p7, %p205_p8  ;;  %s227_s18 = sshll.u32 %s6207_s1, 4  ;;  %s228_s18 = int_to_ptr.vmem [resolvable:$true] %s227_s18 }
   0xf   : > { %s3447_s19 = smov [#allocation2]   ;;  %s3448_s20 = smov [#allocation5]  }
  0x10   : > { %p3274_p11 = pneg %p206_p10 }
  0x11   : > { %260 = sbr.rel (%p206_p10) target bundleno = 1515 (0x5eb), region = 48 }
  0x12   : > { %p3275_p12 = pnand %p3285_p9, %p3274_p11 }
  0x14   : > { %3277 = dma.vmem_to_smem (!%p3275_p12), %s218_s15, 16, %s3447_s19, [#allocation4]  }
  0x15   : > { %3280 = dma.vmem_to_smem (!%p3275_p12), %s228_s18, 16, %s3448_s20, [#allocation6]  }
  0x16   : > { %3420 = dma.done.wait (%p3285_p9), [#allocation4], 16  }
  0x17   : > { %3422 = vsyncadd (%p3285_p9), [#allocation4], 4294967280 }
  0x18   : > { %3424 = dma.done.wait (%p3285_p9), [#allocation6], 16  }
  0x19   : > { %3426 = vsyncadd (%p3285_p9), [#allocation6], 4294967280 }
  0x1a   : > { %272 = sfence }
  0x1b   : > { %p298_p13 = scmp.lt.s32.totalorder %s3514_s28, 1  ;;  %s3193_s21 = sld [smem:[#allocation2 + $0x1]]  ;;  %vm717_vm0 = vcmask 1046528   ;;  %vm1394_vm1 = vcmask 1045504   ;;  %vm2117_vm2 = vcmask 457728   ;;  %vm2779_vm3 = vcmask 1041409  }
  0x1c   : > { %s3449_s13 = smov 127   ;;  %s3194_s14 = sld [smem:[#allocation2 + $0xa]]  ;;  %vm2782_vm4 = vcmask 1042434   ;;  %vm2785_vm5 = vcmask 1043459   ;;  %vm2788_vm6 = vcmask 1044484   ;;  %vm2791_vm7 = vcmask 1045509  }
  0x1d   : > { %s299_s22 = scalar_select %p298_p13, %s3514_s28, 1  ;;  %vm2794_vm8 = vcmask 1046534   ;;  %vm2797_vm9 = vcmask 1047559   ;;  %vm2891_vm10 = vcmask 1043456   ;;  %vm2869_vm11 = vcmask 228352  }
  0x1e   : > { %s3195_s15 = sld [smem:[#allocation2 + $0x13]]  ;;  %s3450_s18 = smov 126   ;;  %vm3065_vm12 = vcmask 523264  }
  0x1f   : > { %s3263_s23 = sshll.u32 %s299_s22, 6  ;;  %s3196_s16 = sld [smem:[#allocation2 + $0x1c]] }
  0x20   : > { %s3563_s9 = scalar_lea.vmem %s6208_s2, %s3263_s23  ;;  %s3197_s17 = sld [smem:[#allocation2 + $0x2]] }
  0x21   : > { %v3566_v0 = vld [vmem:[%s3563_s9 + $0x20] sm:$0xff]  ;;  %v348_v1 = vstv %s3193_s21  ;;  %v3569_v2 = vld [vmem:[%s3563_s9 + $0x10] sm:$0xff]  ;;  %v3581_v7 = vld [vmem:[%s3563_s9 + $0x28] sm:$0xff]  ;;  %s3198_s19 = sld [smem:[#allocation2 + $0xb]] }
  0x22   : > { %v3572_v3 = vld [vmem:[%s3563_s9] sm:$0xff]  ;;  %v353_v4 = vmul.f32 %v348_v1, %v3566_v0  ;;  %v351_v5 = vmul.f32 %v348_v1, %v3569_v2  ;;  %v3584_v8 = vld [vmem:[%s3563_s9 + $0x18] sm:$0xff]  ;;  %v3587_v9 = vld [vmem:[%s3563_s9 + $0x8] sm:$0xff]  ;;  %v354_v10 = vmul.f32 %v348_v1, %v3581_v7  ;;  %v392_v13 = vstv %s3194_s14  ;;  %s3199_s20 = sld [smem:[#allocation2 + $0x14]] }
  0x23   : > { %v349_v6 = vmul.f32 %v348_v1, %v3572_v3  ;;  %v352_v11 = vmul.f32 %v348_v1, %v3584_v8  ;;  %v350_v12 = vmul.f32 %v348_v1, %v3587_v9  ;;  %v3596_v14 = vld [vmem:[%s3563_s9 + $0x30] sm:$0xff]  ;;  %v394_v15 = vmul.f32 %v392_v13, %v3587_v9  ;;  %s3200_s21 = sld [smem:[#allocation2 + $0x1d]] }
  0x24   : > { %371 = vrot.lane.b32.xlu2 %v353_v4, %s3449_s13  ;;  %367 = vrot.lane.b32.xlu1 %v351_v5, %s3449_s13  ;;  %v393_v16 = vmul.f32 %v392_v13, %v3572_v3  ;;  %v355_v17 = vmul.f32 %v348_v1, %v3596_v14  ;;  %v397_v18 = vmul.f32 %v392_v13, %v3566_v0  ;;  %v436_v21 = vstv %s3195_s15  ;;  %s3205_s22 = sld [smem:[#allocation2 + $0x4]] }
  0x25   : > { %363 = vrot.lane.b32.xlu0 %v349_v6, %s3449_s13  ;;  %v396_v19 = vmul.f32 %v392_v13, %v3584_v8  ;;  %v395_v20 = vmul.f32 %v392_v13, %v3569_v2  ;;  %v437_v22 = vmul.f32 %v436_v21, %v3572_v3  ;;  %v399_v23 = vmul.f32 %v392_v13, %v3596_v14  ;;  %s3206_s23 = sld [smem:[#allocation2 + $0xd]] }
  0x26   : > { %v398_v24 = vmul.f32 %v392_v13, %v3581_v7  ;;  %v440_v25 = vmul.f32 %v436_v21, %v3584_v8  ;;  %v439_v26 = vmul.f32 %v436_v21, %v3569_v2  ;;  %v438_v27 = vmul.f32 %v436_v21, %v3587_v9  ;;  %s3207_s29 = sld [smem:[#allocation2 + $0x16]] }
  0x27   : > { %v443_v28 = vmul.f32 %v436_v21, %v3596_v14  ;;  %v442_v29 = vmul.f32 %v436_v21, %v3581_v7  ;;  %v441_v30 = vmul.f32 %v436_v21, %v3566_v0  ;;  %v480_v31 = vstv %s3196_s16  ;;  %s3208_s8 = sld [smem:[#allocation2 + $0x1f]] }
  0x28   : > { %v483_v32 = vmul.f32 %v480_v31, %v3569_v2  ;;  %v482_v33 = vmul.f32 %v480_v31, %v3587_v9  ;;  %v481_v34 = vmul.f32 %v480_v31, %v3572_v3  ;;  %v486_v35 = vmul.f32 %v480_v31, %v3581_v7  ;;  %s3209_s14 = sld [smem:[#allocation2 + $0x5]] }
  0x29   : > { %v485_v36 = vmul.f32 %v480_v31, %v3566_v0  ;;  %v484_v37 = vmul.f32 %v480_v31, %v3584_v8  ;;  %v524_v38 = vstv %s3197_s17  ;;  %v487_v41 = vmul.f32 %v480_v31, %v3596_v14  ;;  %s3210_s15 = sld [smem:[#allocation2 + $0xe]] }
  0x2a   : > { %v526_v39 = vmul.f32 %v524_v38, %v3587_v9  ;;  %v525_v40 = vmul.f32 %v524_v38, %v3572_v3  ;;  %v529_v42 = vmul.f32 %v524_v38, %v3566_v0  ;;  %v528_v43 = vmul.f32 %v524_v38, %v3584_v8  ;;  %s3217_s16 = sld [smem:[#allocation2 + $0x7]] }
  0x2b   : > { %v527_v44 = vmul.f32 %v524_v38, %v3569_v2  ;;  %v568_v45 = vstv %s3198_s19  ;;  %v531_v47 = vmul.f32 %v524_v38, %v3596_v14  ;;  %v530_v48 = vmul.f32 %v524_v38, %v3581_v7  ;;  %s3211_s17 = sld [smem:[#allocation2 + $0x17]] }
  0x2c   : > { %373 = vrot.lane.b32.xlu2 %v354_v10, %s3449_s13  ;;  %369 = vrot.lane.b32.xlu1 %v352_v11, %s3449_s13  ;;  %v569_v46 = vmul.f32 %v568_v45, %v3572_v3  ;;  %v572_v50 = vmul.f32 %v568_v45, %v3584_v8  ;;  %v571_v51 = vmul.f32 %v568_v45, %v3569_v2  ;;  %v612_v57 = vstv %s3199_s20  ;;  %s3221_s19 = sld [smem:[#allocation2 + $0x8]] }
  0x2d   : > { %365 = vrot.lane.b32.xlu0 %v350_v12, %s3449_s13  ;;  %v570_v52 = vmul.f32 %v568_v45, %v3587_v9  ;;  %v575_v54 = vmul.f32 %v568_v45, %v3596_v14  ;;  %v574_v55 = vmul.f32 %v568_v45, %v3581_v7  ;;  %v573_v56 = vmul.f32 %v568_v45, %v3566_v0  ;;  %s3218_s20 = sld [smem:[#allocation2 + $0x10]] }
  0x2e   : > { %v615_v59 = vmul.f32 %v612_v57, %v3569_v2  ;;  %v614_v60 = vmul.f32 %v612_v57, %v3587_v9  ;;  %v613_v61 = vmul.f32 %v612_v57, %v3572_v3  ;;  %v618_v4 = vmul.f32 %v612_v57, %v3581_v7 }
  0x2f   : > { %v617_v5 = vmul.f32 %v612_v57, %v3566_v0  ;;  %v616_v6 = vmul.f32 %v612_v57, %v3584_v8  ;;  %v656_v10 = vstv %s3200_s21  ;;  %s3212_s21 = sld [smem:[#allocation2 + $0x20]] }
  0x34   : > { %409 = vrot.lane.b32.xlu2 %v394_v15, %s3449_s13  ;;  %407 = vrot.lane.b32.xlu1 %v393_v16, %s3449_s13  ;;  %v658_v15 = vmul.f32 %v656_v10, %v3587_v9  ;;  %v657_v16 = vmul.f32 %v656_v10, %v3572_v3 }
  0x35   : > { %375 = vrot.lane.b32.xlu0 %v355_v17, %s3449_s13  ;;  %v619_v17 = vmul.f32 %v612_v57, %v3596_v14 }
  0x3c   : > { %415 = vrot.lane.b32.xlu2 %v397_v18, %s3449_s13  ;;  %413 = vrot.lane.b32.xlu1 %v396_v19, %s3449_s13 }
  0x3d   : > { %411 = vrot.lane.b32.xlu0 %v395_v20, %s3449_s13  ;;  %v889_v20 = vstv %s3205_s22  ;;  %s3222_s22 = sld [smem:[#allocation2 + $0x11]] }
  0x44   : > { %451 = vrot.lane.b32.xlu2 %v437_v22, %s3449_s13  ;;  %419 = vrot.lane.b32.xlu1 %v399_v23, %s3449_s13  ;;  %v661_v22 = vmul.f32 %v656_v10, %v3566_v0  ;;  %v660_v23 = vmul.f32 %v656_v10, %v3584_v8 }
  0x45   : > { %417 = vrot.lane.b32.xlu0 %v398_v24, %s3449_s13  ;;  %v659_v24 = vmul.f32 %v656_v10, %v3569_v2 }
  0x4c   : > { %457 = vrot.lane.b32.xlu2 %v440_v25, %s3449_s13  ;;  %455 = vrot.lane.b32.xlu1 %v439_v26, %s3449_s13  ;;  %v890_v25 = vmul.f32 %v889_v20, %v3572_v3  ;;  %v891_v26 = vmul.f32 %v889_v20, %v3587_v9 }
  0x4d   : > { %453 = vrot.lane.b32.xlu0 %v438_v27, %s3449_s13 }
  0x4e   : > { %v906_v27 = vrot.slane %v890_v25, 1 }
  0x54   : > { %463 = vrot.lane.b32.xlu2 %v443_v28, %s3449_s13  ;;  %461 = vrot.lane.b32.xlu1 %v442_v29, %s3449_s13  ;;  %v907_v28 = vrot.slane %v891_v26, 1 }
  0x55   : > { %459 = vrot.lane.b32.xlu0 %v441_v30, %s3449_s13 }
  0x5c   : > { %499 = vrot.lane.b32.xlu2 %v483_v32, %s3449_s13  ;;  %497 = vrot.lane.b32.xlu1 %v482_v33, %s3449_s13  ;;  %v663_v32 = vmul.f32 %v656_v10, %v3596_v14  ;;  %v893_v33 = vmul.f32 %v889_v20, %v3584_v8 }
  0x5d   : > { %495 = vrot.lane.b32.xlu0 %v481_v34, %s3449_s13  ;;  %v894_v34 = vmul.f32 %v889_v20, %v3566_v0 }
  0x5e   : > { %v911_v38 = vrot.slane %v893_v33, 1 }
  0x64   : > { %505 = vrot.lane.b32.xlu2 %v486_v35, %s3449_s13  ;;  %503 = vrot.lane.b32.xlu1 %v485_v36, %s3449_s13  ;;  %v908_v35 = vsel %vm717_vm0, %v906_v27, %v907_v28  ;;  %v662_v36 = vmul.f32 %v656_v10, %v3581_v7 }
  0x65   : > { %501 = vrot.lane.b32.xlu0 %v484_v37, %s3449_s13  ;;  %v892_v37 = vmul.f32 %v889_v20, %v3569_v2 }
  0x6c   : > { %541 = vrot.lane.b32.xlu2 %v526_v39, %s3450_s18  ;;  %539 = vrot.lane.b32.xlu1 %v525_v40, %s3450_s18  ;;  %v913_v39 = vrot.slane %v894_v34, 1  ;;  %v909_v40 = vrot.slane %v892_v37, 1 }
  0x6d   : > { %507 = vrot.lane.b32.xlu0 %v487_v41, %s3449_s13 }
  0x6e   : > { %v914_v45 = vsel %vm717_vm0, %v911_v38, %v913_v39 }
  0x74   : > { %547 = vrot.lane.b32.xlu2 %v529_v42, %s3450_s18  ;;  %545 = vrot.lane.b32.xlu1 %v528_v43, %s3450_s18  ;;  %v3740_v43 = vld [vmem:[%s3563_s9 + $0x38] sm:$0x3] }
  0x75   : > { %543 = vrot.lane.b32.xlu0 %v527_v44, %s3450_s18 }
  0x7c   : > { %583 = vrot.lane.b32.xlu2 %v569_v46, %s3450_s18  ;;  %551 = vrot.lane.b32.xlu1 %v531_v47, %s3450_s18  ;;  %v912_v46 = vsel %vm717_vm0, %v909_v40, %v911_v38  ;;  %v896_v47 = vmul.f32 %v889_v20, %v3596_v14 }
  0x7d   : > { %549 = vrot.lane.b32.xlu0 %v530_v48, %s3450_s18  ;;  %v897_v48 = vmul.f32 %v889_v20, %v3740_v43 }
  0x7e   : > { %v3658_v49 = vpop.permute.xlu2 %371 }
  0x84   : > { %589 = vrot.lane.b32.xlu2 %v572_v50, %s3450_s18  ;;  %587 = vrot.lane.b32.xlu1 %v571_v51, %s3450_s18  ;;  %v895_v50 = vmul.f32 %v889_v20, %v3581_v7  ;;  %v910_v51 = vsel %vm717_vm0, %v907_v28, %v909_v40 }
  0x85   : > { %585 = vrot.lane.b32.xlu0 %v570_v52, %s3450_s18  ;;  %v917_v52 = vrot.slane %v896_v47, 1 }
  0x86   : > { %v3666_v53 = vpop.permute.xlu2 %373 }
  0x8c   : > { %595 = vrot.lane.b32.xlu2 %v575_v54, %s3450_s18  ;;  %593 = vrot.lane.b32.xlu1 %v574_v55, %s3450_s18  ;;  %v919_v54 = vrot.slane %v897_v48, 1  ;;  %v915_v55 = vrot.slane %v895_v50, 1 }
  0x8d   : > { %591 = vrot.lane.b32.xlu0 %v573_v56, %s3450_s18  ;;  %v950_v56 = vstv %s3206_s23  ;;  %s3219_s23 = sld [smem:[#allocation2 + $0x19]] }
  0x8e   : > { %v3674_v58 = vpop.permute.xlu2 %409  ;;  %v952_v10 = vmul.f32 %v950_v56, %v3587_v9  ;;  %v957_v33 = vmul.f32 %v950_v56, %v3596_v14  ;;  %v955_v34 = vmul.f32 %v950_v56, %v3566_v0 }
  0x90   : > { %v978_v37 = vrot.slane %v957_v33, 1  ;;  %v974_v38 = vrot.slane %v955_v34, 1  ;;  %v1072_v34 = vstv %s3208_s8  ;;  %s311_s8 = sld [smem:[#allocation2]] }
  0x94   : > { %631 = vrot.lane.b32.xlu2 %v615_v59, %s3450_s18  ;;  %629 = vrot.lane.b32.xlu1 %v614_v60, %s3450_s18 }
  0x95   : > { %627 = vrot.lane.b32.xlu0 %v613_v61, %s3450_s18  ;;  %v953_v61 = vmul.f32 %v950_v56, %v3569_v2 }
  0x96   : > { %v3682_v62 = vpop.permute.xlu1 %367  ;;  %v3684_v63 = vpop.permute.xlu2 %415 }
  0x97   : > { %v3686_v1 = vpop.permute.xlu0 %363 }
  0x9c   : > { %637 = vrot.lane.b32.xlu2 %v618_v4, %s3450_s18  ;;  %635 = vrot.lane.b32.xlu1 %v617_v5, %s3450_s18  ;;  %v954_v4 = vmul.f32 %v950_v56, %v3584_v8  ;;  %v920_v5 = vsel %vm717_vm0, %v917_v52, %v919_v54 }
  0x9d   : > { %633 = vrot.lane.b32.xlu0 %v616_v6, %s3450_s18  ;;  %v918_v6 = vsel %vm717_vm0, %v915_v55, %v917_v52 }
  0x9e   : > { %v3694_v11 = vpop.permute.xlu1 %369  ;;  %v3696_v12 = vpop.permute.xlu2 %451  ;;  %v972_v20 = vrot.slane %v954_v4, 1 }
  0x9f   : > { %v3698_v13 = vpop.permute.xlu0 %365 }
  0xa0   : > { %v975_v54 = vsel %vm717_vm0, %v972_v20, %v974_v38 }
  0xa4   : > { %673 = vrot.lane.b32.xlu2 %v658_v15, %s3450_s18  ;;  %671 = vrot.lane.b32.xlu1 %v657_v16, %s3450_s18  ;;  %v916_v15 = vsel %vm717_vm0, %v913_v39, %v915_v55  ;;  %v951_v16 = vmul.f32 %v950_v56, %v3572_v3  ;;  %v1011_v39 = vstv %s3207_s29  ;;  %v958_v55 = vmul.f32 %v950_v56, %v3740_v43  ;;  %s3223_s29 = sld [smem:[#allocation2 + $0x1a]] }
  0xa5   : > { %639 = vrot.lane.b32.xlu0 %v619_v17, %s3450_s18  ;;  %v970_v17 = vrot.slane %v953_v61, 1  ;;  %v1013_v47 = vmul.f32 %v1011_v39, %v3587_v9  ;;  %v1014_v48 = vmul.f32 %v1011_v39, %v3569_v2  ;;  %v1012_v52 = vmul.f32 %v1011_v39, %v3572_v3 }
  0xa6   : > { %v3706_v18 = vpop.permute.xlu2 %457  ;;  %v3708_v19 = vpop.permute.xlu1 %407  ;;  %v967_v25 = vrot.slane %v951_v16, 1 }
  0xa7   : > { %v3710_v21 = vpop.permute.xlu0 %375  ;;  %v973_v27 = vsel %vm717_vm0, %v970_v17, %v972_v20  ;;  %v1029_v61 = vrot.slane %v1013_v47, 1  ;;  %v1031_v4 = vrot.slane %v1014_v48, 1  ;;  %v1016_v20 = vmul.f32 %v1011_v39, %v3566_v0 }
  0xa8   : > { %v1073_v47 = vmul.f32 %v1072_v34, %v3572_v3 }
  0xac   : > { %679 = vrot.lane.b32.xlu2 %v661_v22, %s3450_s18  ;;  %677 = vrot.lane.b32.xlu1 %v660_v23, %s3450_s18  ;;  %v968_v22 = vrot.slane %v952_v10, 1 }
  0xad   : > { %675 = vrot.lane.b32.xlu0 %v659_v24, %s3450_s18 }
  0xae   : > { %v3720_v29 = vpop.permute.xlu2 %463  ;;  %v3722_v30 = vpop.permute.xlu1 %413  ;;  %v971_v28 = vsel %vm717_vm0, %v968_v22, %v970_v17  ;;  %v1032_v17 = vsel %vm717_vm0, %v1029_v61, %v1031_v4 }
  0xaf   : > { %v3724_v31 = vpop.permute.xlu0 %411 }
  0xb4   : > { %921 = vrot.lane.b32.xlu2 %v908_v35, %s3449_s13  ;;  %683 = vrot.lane.b32.xlu1 %v663_v32, %s3450_s18  ;;  %v956_v32 = vmul.f32 %v950_v56, %v3581_v7  ;;  %v969_v35 = vsel %vm717_vm0, %v967_v25, %v968_v22  ;;  %v1017_v22 = vmul.f32 %v1011_v39, %v3581_v7 }
  0xb5   : > { %681 = vrot.lane.b32.xlu0 %v662_v36, %s3450_s18  ;;  %v1015_v25 = vmul.f32 %v1011_v39, %v3584_v8 }
  0xb6   : > { %v3735_v41 = vpop.permute.xlu2 %499  ;;  %v3737_v42 = vpop.permute.xlu1 %419  ;;  %v976_v36 = vrot.slane %v956_v32, 1  ;;  %v1037_v32 = vrot.slane %v1017_v22, 1  ;;  %v1076_v22 = vmul.f32 %v1072_v34, %v3584_v8 }
  0xb7   : > { %v3742_v44 = vpop.permute.xlu0 %417  ;;  %v1033_v33 = vrot.slane %v1015_v25, 1  ;;  %v1077_v25 = vmul.f32 %v1072_v34, %v3566_v0 }
  0xb8   : > { %v979_v50 = vsel %vm717_vm0, %v976_v36, %v978_v37 }
  0xbc   : > { %927 = vrot.lane.b32.xlu2 %v914_v45, %s3449_s13  ;;  %925 = vrot.lane.b32.xlu1 %v912_v46, %s3449_s13 }
  0xbd   : > { %923 = vrot.lane.b32.xlu0 %v910_v51, %s3449_s13  ;;  %v977_v51 = vsel %vm717_vm0, %v974_v38, %v976_v36 }
  0xbe   : > { %v3753_v57 = vpop.permute.xlu2 %505  ;;  %v3755_v59 = vpop.permute.xlu1 %455 }
  0xbf   : > { %6259 = vst [vmem:[#allocation11_spill] sm:$0xff] %v3753_v57  ;;  %v3757_v60 = vpop.permute.xlu0 %453 }
  0xc0   : > { %6260 = vst [vmem:[#allocation12_spill] sm:$0xff] %v3757_v60 }
  0xc4   : > { %933 = vrot.lane.b32.xlu2 %v920_v5, %s3449_s13  ;;  %931 = vrot.lane.b32.xlu1 %v918_v6, %s3449_s13  ;;  %v1028_v5 = vrot.slane %v1012_v52, 1  ;;  %v1019_v52 = vmul.f32 %v1011_v39, %v3740_v43 }
  0xc5   : > { %929 = vrot.lane.b32.xlu0 %v916_v15, %s3449_s13  ;;  %v980_v15 = vrot.slane %v958_v55, 1  ;;  %v1089_v55 = vrot.slane %v1073_v47, 1  ;;  %v1096_v47 = vrot.slane %v1077_v25, 1 }
  0xc6   : > { %v3769_v23 = vpop.permute.xlu2 %541  ;;  %v3771_v24 = vpop.permute.xlu1 %461  ;;  %v1030_v56 = vsel %vm717_vm0, %v1028_v5, %v1029_v61 }
  0xc7   : > { %6261 = vst [vmem:[#allocation13_spill] sm:$0xff] %v3769_v23  ;;  %v3773_v26 = vpop.permute.xlu0 %459 }
  0xc8   : > { %6262 = vst [vmem:[#allocation14_spill] sm:$0xff] %v3771_v24 }
  0xc9   : > { %6263 = vst [vmem:[#allocation15_spill] sm:$0xff] %v3773_v26 }
  0xcc   : > { %986 = vrot.lane.b32.xlu2 %v973_v27, %s3449_s13  ;;  %984 = vrot.lane.b32.xlu1 %v971_v28, %s3449_s13  ;;  %v981_v27 = vsel %vm717_vm0, %v978_v37, %v980_v15  ;;  %v1035_v28 = vrot.slane %v1016_v20, 1  ;;  %v1074_v37 = vmul.f32 %v1072_v34, %v3587_v9  ;;  %v1041_v15 = vrot.slane %v1019_v52, 1 }
  0xcd   : > { %982 = vrot.lane.b32.xlu0 %v969_v35, %s3449_s13  ;;  %v1079_v52 = vmul.f32 %v1072_v34, %v3596_v14 }
  0xce   : > { %v3784_v40 = vpop.permute.xlu2 %547  ;;  %v3786_v45 = vpop.permute.xlu1 %497  ;;  %v1038_v48 = vsel %vm717_vm0, %v1035_v28, %v1037_v32  ;;  %v1090_v61 = vrot.slane %v1074_v37, 1 }
  0xcf   : > { %6264 = vst [vmem:[#allocation16_spill] sm:$0xff] %v3784_v40  ;;  %v3788_v46 = vpop.permute.xlu0 %495 }
  0xd0   : > { %6265 = vst [vmem:[#allocation17_spill] sm:$0xff] %v3786_v45 }
  0xd1   : > { %6266 = vst [vmem:[#allocation18_spill] sm:$0xff] %v3788_v46 }
  0xd4   : > { %992 = vrot.lane.b32.xlu2 %v979_v50, %s3449_s13  ;;  %990 = vrot.lane.b32.xlu1 %v977_v51, %s3449_s13  ;;  %v1036_v50 = vsel %vm717_vm0, %v1033_v33, %v1035_v28  ;;  %v1018_v51 = vmul.f32 %v1011_v39, %v3596_v14  ;;  %v1091_v39 = vsel %vm717_vm0, %v1089_v55, %v1090_v61 }
  0xd5   : > { %988 = vrot.lane.b32.xlu0 %v975_v54, %s3449_s13  ;;  %v1034_v54 = vsel %vm717_vm0, %v1031_v4, %v1033_v33  ;;  %v1094_v33 = vrot.slane %v1076_v22, 1 }
  0xd6   : > { %v3800_v6 = vpop.permute.xlu2 %583  ;;  %v3802_v10 = vpop.permute.xlu1 %503  ;;  %v1039_v5 = vrot.slane %v1018_v51, 1 }
  0xd7   : > { %6267 = vst [vmem:[#allocation19_spill] sm:$0xff] %v3800_v6  ;;  %v3804_v16 = vpop.permute.xlu0 %501 }
  0xd8   : > { %6268 = vst [vmem:[#allocation20_spill] sm:$0xff] %v3802_v10  ;;  %v1042_v4 = vsel %vm717_vm0, %v1039_v5, %v1041_v15  ;;  %v1040_v28 = vsel %vm717_vm0, %v1037_v32, %v1039_v5  ;;  %v1080_v32 = vmul.f32 %v1072_v34, %v3740_v43  ;;  %v1078_v5 = vmul.f32 %v1072_v34, %v3581_v7 }
  0xd9   : > { %6269 = vst [vmem:[#allocation21_spill] sm:$0xff] %v3804_v16 }
  0xda   : > { %v1098_v22 = vrot.slane %v1078_v5, 1 }
  0xdc   : > { %1045 = vrot.lane.b32.xlu2 %v1032_v17, %s3449_s13  ;;  %1043 = vrot.lane.b32.xlu1 %v1030_v56, %s3449_s13 }
  0xdd   : > { %994 = vrot.lane.b32.xlu0 %v981_v27, %s3449_s13  ;;  %v1075_v27 = vmul.f32 %v1072_v34, %v3569_v2 }
  0xde   : > { %v3815_v35 = vpop.permute.xlu2 %589  ;;  %v3817_v36 = vpop.permute.xlu1 %539 }
  0xdf   : > { %6270 = vst [vmem:[#allocation22_spill] sm:$0xff] %v3815_v35  ;;  %v3819_v38 = vpop.permute.xlu0 %507  ;;  %v1092_v37 = vrot.slane %v1075_v27, 1 }
  0xe0   : > { %6271 = vst [vmem:[#allocation23_spill] sm:$0xff] %v3817_v36 }
  0xe1   : > { %6272 = vst [vmem:[#allocation24_spill] sm:$0xff] %v3819_v38  ;;  %v1095_v55 = vsel %vm717_vm0, %v1092_v37, %v1094_v33  ;;  %v1093_v15 = vsel %vm717_vm0, %v1090_v61, %v1092_v37 }
  0xe4   : > { %1051 = vrot.lane.b32.xlu2 %v1038_v48, %s3449_s13  ;;  %1049 = vrot.lane.b32.xlu1 %v1036_v50, %s3449_s13 }
  0xe5   : > { %1047 = vrot.lane.b32.xlu0 %v1034_v54, %s3449_s13  ;;  %v1097_v54 = vsel %vm717_vm0, %v1094_v33, %v1096_v47 }
  0xe6   : > { %v3831_v17 = vpop.permute.xlu2 %595  ;;  %v3833_v56 = vpop.permute.xlu1 %545 }
  0xe7   : > { %6273 = vst [vmem:[#allocation25_spill] sm:$0xff] %v3831_v17  ;;  %v3835_v20 = vpop.permute.xlu0 %543 }
  0xe8   : > { %6274 = vst [vmem:[#allocation26_spill] sm:$0xff] %v3833_v56 }
  0xe9   : > { %6275 = vst [vmem:[#allocation27_spill] sm:$0xff] %v3835_v20 }
  0xec   : > { %1104 = vrot.lane.b32.xlu2 %v1091_v39, %s3449_s13  ;;  %1055 = vrot.lane.b32.xlu1 %v1042_v4, %s3449_s13  ;;  %v1100_v39 = vrot.slane %v1079_v52, 1  ;;  %v1102_v4 = vrot.slane %v1080_v32, 1 }
  0xed   : > { %1053 = vrot.lane.b32.xlu0 %v1040_v28, %s3449_s13  ;;  %v3865_v28 = vstv %s3209_s14  ;;  %s3190_s14 = sld [smem:[#allocation2 + $0x9]] }
  0xee   : > { %v3846_v48 = vpop.permute.xlu2 %631  ;;  %v3848_v50 = vpop.permute.xlu1 %551  ;;  %v1103_v34 = vsel %vm717_vm0, %v1100_v39, %v1102_v4  ;;  %v1101_v61 = vsel %vm717_vm0, %v1098_v22, %v1100_v39  ;;  %v1136_v37 = vmul.f32 %v3865_v28, %v3569_v2  ;;  %v1137_v52 = vmul.f32 %v3865_v28, %v3584_v8 }
  0xef   : > { %6276 = vst [vmem:[#allocation28_spill] sm:$0xff] %v3846_v48  ;;  %v3850_v51 = vpop.permute.xlu0 %549  ;;  %v1135_v32 = vmul.f32 %v3865_v28, %v3587_v9  ;;  %v3883_v4 = vstv %s3210_s15  ;;  %s3191_s15 = sld [smem:[#allocation2 + $0x12]] }
  0xf0   : > { %6277 = vst [vmem:[#allocation29_spill] sm:$0xff] %v3848_v50  ;;  %v1153_v5 = vrot.slane %v1136_v37, 1 }
  0xf1   : > { %6278 = vst [vmem:[#allocation30_spill] sm:$0xff] %v3850_v51  ;;  %v1151_v39 = vrot.slane %v1135_v32, 1  ;;  %v1139_v32 = vmul.f32 %v3865_v28, %v3581_v7  ;;  %v3974_v51 = vstv %s3211_s17  ;;  %s4319_s17 = sld [smem:[#allocation2 + $0x3]] }
  0xf3   : > { %v1154_v37 = vsel %vm717_vm0, %v1151_v39, %v1153_v5  ;;  %v1159_v48 = vrot.slane %v1139_v32, 1 }
  0xf4   : > { %1110 = vrot.lane.b32.xlu2 %v1097_v54, %s3449_s13  ;;  %1108 = vrot.lane.b32.xlu1 %v1095_v55, %s3449_s13  ;;  %v1099_v54 = vsel %vm717_vm0, %v1096_v47, %v1098_v22  ;;  %v1134_v55 = vmul.f32 %v3865_v28, %v3572_v3  ;;  %v1197_v22 = vmul.f32 %v3883_v4, %v3569_v2 }
  0xf5   : > { %1106 = vrot.lane.b32.xlu0 %v1093_v15, %s3449_s13  ;;  %v1155_v15 = vrot.slane %v1137_v52, 1  ;;  %v1138_v52 = vmul.f32 %v3865_v28, %v3566_v0  ;;  %v4348_v46 = vstv %s3191_s15  ;;  %s5042_s15 = sld [smem:[#allocation5 + $0x1]] }
  0xf6   : > { %v3861_v25 = vpop.permute.xlu2 %637  ;;  %v3863_v27 = vpop.permute.xlu1 %587  ;;  %v1150_v38 = vrot.slane %v1134_v55, 1  ;;  %v1214_v55 = vrot.slane %v1197_v22, 1 }
  0xf7   : > { %6279 = vst [vmem:[#allocation31_spill] sm:$0xff] %v3861_v25  ;;  %v3867_v33 = vpop.permute.xlu0 %585  ;;  %v1157_v25 = vrot.slane %v1138_v52, 1  ;;  %v1140_v52 = vmul.f32 %v3865_v28, %v3596_v14 }
  0xf8   : > { %6280 = vst [vmem:[#allocation32_spill] sm:$0xff] %v3863_v27 }
  0xf9   : > { %6281 = vst [vmem:[#allocation33_spill] sm:$0xff] %v3867_v33 }
  0xfc   : > { %1116 = vrot.lane.b32.xlu2 %v1103_v34, %s3449_s13  ;;  %1114 = vrot.lane.b32.xlu1 %v1101_v61, %s3449_s13  ;;  %v1198_v34 = vmul.f32 %v3883_v4, %v3584_v8  ;;  %v1156_v61 = vsel %vm717_vm0, %v1153_v5, %v1155_v15 }
  0xfd   : > { %1112 = vrot.lane.b32.xlu0 %v1099_v54, %s3449_s13  ;;  %v1152_v54 = vsel %vm717_vm0, %v1150_v38, %v1151_v39  ;;  %v1160_v39 = vsel %vm717_vm0, %v1157_v25, %v1159_v48 }
  0xfe   : > { %v3885_v16 = vpop.permute.xlu2 %673  ;;  %v3887_v57 = vpop.permute.xlu1 %593 }
  0xff   : > { %6282 = vst [vmem:[#allocation34_spill] sm:$0xff] %v3885_v16  ;;  %v3889_v47 = vpop.permute.xlu0 %591  ;;  %v1216_v16 = vrot.slane %v1198_v34, 1 }
 0x100   : > { %6283 = vst [vmem:[#allocation35_spill] sm:$0xff] %v3887_v57  ;;  %v3909_v57 = vstv %s3217_s16  ;;  %s4314_s16 = sld [smem:[#allocation2 + $0x1b]] }
 0x101   : > { %6284 = vst [vmem:[#allocation36_spill] sm:$0xff] %v3889_v47  ;;  %v1217_v38 = vsel %vm717_vm0, %v1214_v55, %v1216_v16  ;;  %v3917_v22 = vmul.f32 %v3909_v57, %v3587_v9  ;;  %v1569_v34 = vmul.f32 %v3909_v57, %v3569_v2  ;;  %v1161_v47 = vrot.slane %v1140_v52, 1 }
 0x103   : > { %v6214_v32 = vrot.slane %v3917_v22, 2 }
 0x104   : > { %1169 = vrot.lane.b32.xlu2 %v1156_v61, %s3450_s18  ;;  %1167 = vrot.lane.b32.xlu1 %v1154_v37, %s3450_s18  ;;  %v1199_v61 = vmul.f32 %v3883_v4, %v3566_v0  ;;  %v1158_v37 = vsel %vm717_vm0, %v1155_v15, %v1157_v25 }
 0x105   : > { %1165 = vrot.lane.b32.xlu0 %v1152_v54, %s3450_s18  ;;  %v1586_v54 = vrot.slane %v1569_v34, 2  ;;  %v1196_v34 = vmul.f32 %v3883_v4, %v3587_v9 }
 0x106   : > { %v3905_v17 = vpop.permute.xlu2 %679  ;;  %v3907_v5 = vpop.permute.xlu1 %629 }
 0x107   : > { %6285 = vst [vmem:[#allocation37_spill] sm:$0xff] %v3905_v17  ;;  %v3911_v10 = vpop.permute.xlu0 %627  ;;  %v1218_v17 = vrot.slane %v1199_v61, 1  ;;  %v1587_v15 = vsel %vm1394_vm1, %v6214_v32, %v1586_v54  ;;  %v1162_v61 = vsel %vm717_vm0, %v1159_v48, %v1161_v47  ;;  %v1212_v32 = vrot.slane %v1196_v34, 1 }
 0x108   : > { %6286 = vst [vmem:[#allocation38_spill] sm:$0xff] %v3907_v5  ;;  %v1570_v34 = vmul.f32 %v3909_v57, %v3584_v8 }
 0x109   : > { %6287 = vst [vmem:[#allocation39_spill] sm:$0xff] %v3911_v10 }
 0x10c   : > { %1230 = vrot.lane.b32.xlu2 %v1217_v38, %s3450_s18  ;;  %1173 = vrot.lane.b32.xlu1 %v1160_v39, %s3450_s18  ;;  %v1219_v38 = vsel %vm717_vm0, %v1216_v16, %v1218_v17  ;;  %v1200_v39 = vmul.f32 %v3883_v4, %v3581_v7 }
 0x10d   : > { %1171 = vrot.lane.b32.xlu0 %v1158_v37, %s3450_s18  ;;  %v1141_v37 = vmul.f32 %v3865_v28, %v3740_v43  ;;  %v1215_v28 = vsel %vm717_vm0, %v1212_v32, %v1214_v55 }
 0x10e   : > { %v3930_v5 = vpop.permute.xlu2 %921  ;;  %v3932_v10 = vpop.permute.xlu1 %635  ;;  %v1220_v52 = vrot.slane %v1200_v39, 1 }
 0x10f   : > { %6288 = vst [vmem:[#allocation40_spill] sm:$0xff] %v3930_v5  ;;  %v3934_v25 = vpop.permute.xlu0 %633  ;;  %v1163_v33 = vrot.slane %v1141_v37, 1 }
 0x110   : > { %6289 = vst [vmem:[#allocation41_spill] sm:$0xff] %v3932_v10  ;;  %v1221_v48 = vsel %vm717_vm0, %v1218_v17, %v1220_v52 }
 0x111   : > { %6290 = vst [vmem:[#allocation42_spill] sm:$0xff] %v3934_v25  ;;  %v1164_v39 = vsel %vm717_vm0, %v1161_v47, %v1163_v33 }
 0x114   : > { %1600 = vrot.lane.b32.xlu2 %v1587_v15, %s3449_s13  ;;  %1232 = vrot.lane.b32.xlu1 %v1219_v38, %s3450_s18  ;;  %v1201_v15 = vmul.f32 %v3883_v4, %v3596_v14  ;;  %v1195_v38 = vmul.f32 %v3883_v4, %v3572_v3 }
 0x115   : > { %1175 = vrot.lane.b32.xlu0 %v1162_v61, %s3450_s18 }
 0x116   : > { %v3950_v16 = vpop.permute.xlu2 %927  ;;  %v3952_v10 = vpop.permute.xlu1 %671  ;;  %v1222_v17 = vrot.slane %v1201_v15, 1  ;;  %v1211_v61 = vrot.slane %v1195_v38, 1  ;;  %v3985_v38 = vmul.f32 %v3974_v51, %v3584_v8 }
 0x117   : > { %6291 = vst [vmem:[#allocation43_spill] sm:$0xff] %v3950_v16  ;;  %v3954_v25 = vpop.permute.xlu0 %639 }
 0x118   : > { %6292 = vst [vmem:[#allocation44_spill] sm:$0xff] %v3952_v10  ;;  %v1588_v10 = vrot.slane %v1570_v34, 2  ;;  %v1223_v33 = vsel %vm717_vm0, %v1220_v52, %v1222_v17  ;;  %v1213_v47 = vsel %vm717_vm0, %v1211_v61, %v1212_v32 }
 0x119   : > { %6293 = vst [vmem:[#allocation45_spill] sm:$0xff] %v3954_v25 }
 0x11a   : > { %v1589_v15 = vsel %vm1394_vm1, %v1586_v54, %v1588_v10  ;;  %v1277_v54 = vrot.slane %v3985_v38, 1 }
 0x11c   : > { %1234 = vrot.lane.b32.xlu2 %v1221_v48, %s3450_s18  ;;  %1228 = vrot.lane.b32.xlu1 %v1215_v28, %s3450_s18  ;;  %v1571_v48 = vmul.f32 %v3909_v57, %v3566_v0  ;;  %v1567_v28 = vmul.f32 %v3909_v57, %v3572_v3 }
 0x11d   : > { %1177 = vrot.lane.b32.xlu0 %v1164_v39, %s3450_s18  ;;  %v1260_v39 = vmul.f32 %v3974_v51, %v3566_v0 }
 0x11e   : > { %v3968_v55 = vpop.permute.xlu2 %933  ;;  %v3970_v37 = vpop.permute.xlu1 %677  ;;  %v1590_v32 = vrot.slane %v1571_v48, 2  ;;  %v1583_v52 = vrot.slane %v1567_v28, 2  ;;  %v6300_v48 = vrot.slane %v3917_v22, 2 }
 0x11f   : > { %6294 = vst [vmem:[#allocation46_spill] sm:$0xff] %v3968_v55  ;;  %v3972_v25 = vpop.permute.xlu0 %675  ;;  %v3999_v55 = vstv %s3221_s19  ;;  %s4385_s19 = sld [smem:[#allocation2 + $0xc]] }
 0x120   : > { %6295 = vst [vmem:[#allocation47_spill] sm:$0xff] %v3970_v37  ;;  %v1279_v37 = vrot.slane %v1260_v39, 1  ;;  %v1585_v28 = vsel %vm1394_vm1, %v1583_v52, %v6300_v48  ;;  %v4012_v39 = vmul.f32 %v3999_v55, %v3587_v9 }
 0x121   : > { %6296 = vst [vmem:[#allocation48_spill] sm:$0xff] %v3972_v25 }
 0x122   : > { %v1280_v38 = vsel %vm717_vm0, %v1277_v54, %v1279_v37  ;;  %v1828_v48 = vrot.slane %v4012_v39, 2 }
 0x124   : > { %1236 = vrot.lane.b32.xlu2 %v1223_v33, %s3450_s18  ;;  %1226 = vrot.lane.b32.xlu1 %v1213_v47, %s3450_s18  ;;  %v1261_v33 = vmul.f32 %v3974_v51, %v3581_v7  ;;  %v1591_v47 = vsel %vm1394_vm1, %v1588_v10, %v1590_v32 }
 0x125   : > { %1602 = vrot.lane.b32.xlu0 %v1589_v15, %s3449_s13  ;;  %v1202_v15 = vmul.f32 %v3883_v4, %v3740_v43 }
 0x126   : > { %v3992_v34 = vpop.permute.xlu2 %986  ;;  %v3994_v61 = vpop.permute.xlu1 %683  ;;  %v1281_v10 = vrot.slane %v1261_v33, 1  ;;  %v4032_v33 = vmul.f32 %v3999_v55, %v3584_v8 }
 0x127   : > { %6297 = vst [vmem:[#allocation49_spill] sm:$0xff] %v3992_v34  ;;  %v3997_v25 = vpop.permute.xlu0 %681  ;;  %v1224_v22 = vrot.slane %v1202_v15, 1  ;;  %v4024_v34 = vstv %s3218_s20  ;;  %s4476_s20 = sld [smem:[#allocation2 + $0x22]] }
 0x128   : > { %6298 = vst [vmem:[#allocation50_spill] sm:$0xff] %v3994_v61  ;;  %v1282_v35 = vsel %vm717_vm0, %v1279_v37, %v1281_v10  ;;  %v1631_v15 = vmul.f32 %v4024_v34, %v3584_v8 }
 0x129   : > { %6299 = vst [vmem:[#allocation51_spill] sm:$0xff] %v3997_v25  ;;  %v1813_v25 = vmul.f32 %v3999_v55, %v3569_v2 }
 0x12a   : > { %v1649_v39 = vrot.slane %v1631_v15, 2 }
 0x12b   : > { %v1830_v61 = vrot.slane %v1813_v25, 2 }
 0x12c   : > { %1604 = vrot.lane.b32.xlu2 %v1591_v47, %s3449_s13  ;;  %1598 = vrot.lane.b32.xlu1 %v1585_v28, %s3449_s13  ;;  %v1225_v47 = vsel %vm717_vm0, %v1222_v17, %v1224_v22  ;;  %v4036_v28 = vmul.f32 %v4024_v34, %v3569_v2  ;;  %v1832_v17 = vrot.slane %v4032_v33, 2  ;;  %v1258_v33 = vmul.f32 %v3974_v51, %v3569_v2 }
 0x12d   : > { %1293 = vrot.lane.b32.xlu0 %v1280_v38, %s3450_s18  ;;  %v1831_v25 = vsel %vm1394_vm1, %v1828_v48, %v1830_v61  ;;  %v1572_v38 = vmul.f32 %v3909_v57, %v3581_v7 }
 0x12e   : > { %v4019_v52 = vpop.permute.xlu2 %992  ;;  %v4021_v4 = vpop.permute.xlu1 %925  ;;  %v6215_v37 = vrot.slane %v4036_v28, 2  ;;  %v1833_v16 = vsel %vm1394_vm1, %v1830_v61, %v1832_v17 }
 0x12f   : > { %6301 = vst [vmem:[#allocation52_spill] sm:$0xff] %v4019_v52  ;;  %v4026_v27 = vpop.permute.xlu0 %923  ;;  %v1592_v50 = vrot.slane %v1572_v38, 2  ;;  %v1257_v38 = vmul.f32 %v3974_v51, %v3587_v9 }
 0x130   : > { %6302 = vst [vmem:[#allocation53_spill] sm:$0xff] %v4021_v4 }
 0x131   : > { %6303 = vst [vmem:[#allocation54_spill] sm:$0xff] %v4026_v27  ;;  %v1593_v15 = vsel %vm1394_vm1, %v1590_v32, %v1592_v50  ;;  %v1273_v32 = vrot.slane %v1257_v38, 1 }
 0x134   : > { %1295 = vrot.lane.b32.xlu2 %v1282_v35, %s3450_s18  ;;  %1238 = vrot.lane.b32.xlu1 %v1225_v47, %s3450_s18  ;;  %v1650_v35 = vsel %vm1394_vm1, %v6215_v37, %v1649_v39  ;;  %v1262_v47 = vmul.f32 %v3974_v51, %v3596_v14  ;;  %v1275_v37 = vrot.slane %v1258_v33, 1  ;;  %v1573_v33 = vmul.f32 %v3909_v57, %v3596_v14 }
 0x135   : > { %1844 = vrot.lane.b32.xlu0 %v1831_v25, %s3450_s18  ;;  %v1256_v25 = vmul.f32 %v3974_v51, %v3572_v3  ;;  %v1263_v14 = vmul.f32 %v3974_v51, %v3740_v43 }
 0x136   : > { %v4048_v22 = vpop.permute.xlu2 %1045  ;;  %v4050_v52 = vpop.permute.xlu1 %931  ;;  %v1283_v61 = vrot.slane %v1262_v47, 1  ;;  %v1278_v5 = vsel %vm717_vm0, %v1275_v37, %v1277_v54  ;;  %v1594_v38 = vrot.slane %v1573_v33, 2 }
 0x137   : > { %6304 = vst [vmem:[#allocation55_spill] sm:$0xff] %v4048_v22  ;;  %v4052_v6 = vpop.permute.xlu0 %929  ;;  %v1272_v2 = vrot.slane %v1256_v25, 1 }
 0x138   : > { %6305 = vst [vmem:[#allocation56_spill] sm:$0xff] %v4050_v52  ;;  %v1284_v27 = vsel %vm717_vm0, %v1281_v10, %v1283_v61 }
 0x139   : > { %6306 = vst [vmem:[#allocation57_spill] sm:$0xff] %v4052_v6  ;;  %v1274_v47 = vsel %vm717_vm0, %v1272_v2, %v1273_v32 }
 0x13c   : > { %1846 = vrot.lane.b32.xlu2 %v1833_v16, %s3450_s18  ;;  %1663 = vrot.lane.b32.xlu1 %v1650_v35, %s3449_s13  ;;  %v1811_v16 = vmul.f32 %v3999_v55, %v3572_v3  ;;  %v1632_v35 = vmul.f32 %v4024_v34, %v3566_v0 }
 0x13d   : > { %1606 = vrot.lane.b32.xlu0 %v1593_v15, %s3449_s13 }
 0x13e   : > { %v4070_v22 = vpop.permute.xlu2 %1051  ;;  %v4072_v52 = vpop.permute.xlu1 %984  ;;  %v1827_v10 = vrot.slane %v1811_v16, 2  ;;  %v1651_v15 = vrot.slane %v1632_v35, 2  ;;  %v1285_v16 = vrot.slane %v1263_v14, 1 }
 0x13f   : > { %6307 = vst [vmem:[#allocation58_spill] sm:$0xff] %v4070_v22  ;;  %v4074_v6 = vpop.permute.xlu0 %982 }
 0x140   : > { %6308 = vst [vmem:[#allocation59_spill] sm:$0xff] %v4072_v52  ;;  %v1829_v2 = vsel %vm1394_vm1, %v1827_v10, %v1828_v48  ;;  %v1574_v10 = vmul.f32 %v3909_v57, %v3740_v43 }
 0x141   : > { %6309 = vst [vmem:[#allocation60_spill] sm:$0xff] %v4074_v6  ;;  %v1652_v6 = vsel %vm1394_vm1, %v1649_v39, %v1651_v15 }
 0x144   : > { %1297 = vrot.lane.b32.xlu2 %v1284_v27, %s3450_s18  ;;  %1291 = vrot.lane.b32.xlu1 %v1278_v5, %s3450_s18  ;;  %v1595_v27 = vsel %vm1394_vm1, %v1592_v50, %v1594_v38  ;;  %v1815_v5 = vmul.f32 %v3999_v55, %v3566_v0  ;;  %v1286_v50 = vsel %vm717_vm0, %v1283_v61, %v1285_v16 }
 0x145   : > { %1287 = vrot.lane.b32.xlu0 %v1274_v47, %s3450_s18  ;;  %v1276_v0 = vsel %vm717_vm0, %v1273_v32, %v1275_v37  ;;  %v1633_v47 = vmul.f32 %v4024_v34, %v3581_v7  ;;  %v4125_v32 = vstv %s3212_s21  ;;  %s4579_s21 = sld [smem:[#allocation2 + $0x6]] }
 0x146   : > { %v4088_v54 = vpop.permute.xlu2 %1104  ;;  %v4090_v25 = vpop.permute.xlu1 %990  ;;  %v1834_v39 = vrot.slane %v1815_v5, 2  ;;  %v1317_v5 = vmul.f32 %v4125_v32, %v3572_v3  ;;  %v1318_v16 = vmul.f32 %v4125_v32, %v3587_v9 }
 0x147   : > { %6310 = vst [vmem:[#allocation61_spill] sm:$0xff] %v4088_v54  ;;  %v4092_v22 = vpop.permute.xlu0 %988  ;;  %v1653_v37 = vrot.slane %v1633_v47, 2 }
 0x148   : > { %6311 = vst [vmem:[#allocation62_spill] sm:$0xff] %v4090_v25  ;;  %v1835_v33 = vsel %vm1394_vm1, %v1832_v17, %v1834_v39  ;;  %v1596_v17 = vrot.slane %v1574_v10, 2 }
 0x149   : > { %6312 = vst [vmem:[#allocation63_spill] sm:$0xff] %v4092_v22 }
 0x14a   : > { %v1597_v3 = vsel %vm1394_vm1, %v1594_v38, %v1596_v17 }
 0x14c   : > { %1842 = vrot.lane.b32.xlu2 %v1829_v2, %s3450_s18  ;;  %1665 = vrot.lane.b32.xlu1 %v1652_v6, %s3449_s13  ;;  %v4116_v6 = vmul.f32 %v4024_v34, %v3587_v9  ;;  %v1816_v9 = vmul.f32 %v3999_v55, %v3581_v7  ;;  %v4163_v7 = vstv %s3219_s23  ;;  %s4757_s23 = sld [smem:[#allocation2 + $0x23]] }
 0x14d   : > { %1608 = vrot.lane.b32.xlu0 %v1595_v27, %s3449_s13  ;;  %v4131_v27 = vstv %s3222_s22  ;;  %v1696_v24 = vmul.f32 %v4163_v7, %v3740_v43  ;;  %s4592_s22 = sld [smem:[#allocation2 + $0x15]] }
 0x14e   : > { %v4104_v35 = vpop.permute.xlu2 %1110  ;;  %v4106_v48 = vpop.permute.xlu1 %1043  ;;  %v1645_v61 = vrot.slane %v4116_v6, 2  ;;  %v4144_v6 = vld [vmem:[%s3563_s9 + $0x10] sm:$0xff]  ;;  %v1875_v10 = vmul.f32 %v4131_v27, %v3584_v8  ;;  %v1836_v17 = vrot.slane %v1816_v9, 2 }
 0x14f   : > { %6313 = vst [vmem:[#allocation64_spill] sm:$0xff] %v4104_v35  ;;  %v4108_v51 = vpop.permute.xlu0 %994 }
 0x150   : > { %6314 = vst [vmem:[#allocation65_spill] sm:$0xff] %v4106_v48  ;;  %v1893_v8 = vrot.slane %v1875_v10, 2  ;;  %v1837_v54 = vsel %vm1394_vm1, %v1834_v39, %v1836_v17 }
 0x151   : > { %6315 = vst [vmem:[#allocation66_spill] sm:$0xff] %v4108_v51 }
 0x154   : > { %1299 = vrot.lane.b32.xlu2 %v1286_v50, %s3450_s18  ;;  %1289 = vrot.lane.b32.xlu1 %v1276_v0, %s3450_s18  ;;  %v1654_v50 = vsel %vm1394_vm1, %v1651_v15, %v1653_v37  ;;  %v6319_v0 = vrot.slane %v4036_v28, 2  ;;  %v1333_v28 = vrot.slane %v1317_v5, 1  ;;  %v1334_v15 = vrot.slane %v1318_v16, 1  ;;  %v4172_v16 = vld [vmem:[%s3563_s9 + $0x18] sm:$0xff] }
 0x155   : > { %1848 = vrot.lane.b32.xlu0 %v1835_v33, %s3450_s18  ;;  %v4148_v33 = vmul.f32 %v4144_v6, %v4131_v27  ;;  %v4176_v10 = vmul.f32 %v4172_v16, %v4163_v7 }
 0x156   : > { %v4127_v2 = vpop.permute.xlu2 %1116  ;;  %v4129_v14 = vpop.permute.xlu1 %1049  ;;  %v1648_v47 = vsel %vm1394_vm1, %v1645_v61, %v6319_v0 }
 0x157   : > { %6316 = vst [vmem:[#allocation67_spill] sm:$0xff] %v4127_v2  ;;  %v4133_v57 = vpop.permute.xlu0 %1047  ;;  %v6216_v0 = vrot.slane %v4148_v33, 2  ;;  %v4184_v2 = vld [vmem:[%s3563_s9 + $0x30] sm:$0xff]  ;;  %v6217_v48 = vrot.slane %v4176_v10, 2 }
 0x158   : > { %6317 = vst [vmem:[#allocation68_spill] sm:$0xff] %v4129_v14 }
 0x159   : > { %6318 = vst [vmem:[#allocation69_spill] sm:$0xff] %v4133_v57  ;;  %v1894_v5 = vsel %vm1394_vm1, %v6216_v0, %v1893_v8 }
 0x15c   : > { %1667 = vrot.lane.b32.xlu2 %v1654_v50, %s3449_s13  ;;  %1661 = vrot.lane.b32.xlu1 %v1648_v47, %s3449_s13  ;;  %v1335_v47 = vsel %vm717_vm0, %v1333_v28, %v1334_v15  ;;  %v1634_v28 = vmul.f32 %v4184_v2, %v4024_v34 }
 0x15d   : > { %1610 = vrot.lane.b32.xlu0 %v1597_v3, %s3449_s13  ;;  %v4179_v3 = vld [vmem:[%s3563_s9 + $0x20] sm:$0xff] }
 0x15e   : > { %v4159_v35 = vpop.permute.xlu2 %1169  ;;  %v4161_v38 = vpop.permute.xlu1 %1055  ;;  %v1693_v9 = vmul.f32 %v4179_v3, %v4163_v7  ;;  %v1655_v51 = vrot.slane %v1634_v28, 2 }
 0x15f   : > { %6320 = vst [vmem:[#allocation70_spill] sm:$0xff] %v4159_v35  ;;  %v4165_v50 = vpop.permute.xlu0 %1053 }
 0x160   : > { %6321 = vst [vmem:[#allocation71_spill] sm:$0xff] %v4161_v38  ;;  %v1712_v38 = vrot.slane %v1693_v9, 2 }
 0x161   : > { %6322 = vst [vmem:[#allocation72_spill] sm:$0xff] %v4165_v50  ;;  %v4190_v50 = vld [vmem:[%s3563_s9] sm:$0xff] }
 0x162   : > { %v1628_v0 = vmul.f32 %v4190_v50, %v4024_v34  ;;  %v1713_v14 = vsel %vm1394_vm1, %v6217_v48, %v1712_v38 }
 0x164   : > { %1348 = vrot.lane.b32.xlu2 %v1335_v47, %s3450_s18  ;;  %1907 = vrot.lane.b32.xlu1 %v1894_v5, %s3450_s18  ;;  %v1644_v39 = vrot.slane %v1628_v0, 2  ;;  %v1656_v47 = vsel %vm1394_vm1, %v1653_v37, %v1655_v51  ;;  %v1876_v5 = vmul.f32 %v4179_v3, %v4131_v27  ;;  %v1817_v0 = vmul.f32 %v4184_v2, %v3999_v55 }
 0x165   : > { %1850 = vrot.lane.b32.xlu0 %v1837_v54, %s3450_s18  ;;  %v1319_v54 = vmul.f32 %v4144_v6, %v4125_v32 }
 0x166   : > { %v4198_v57 = vpop.permute.xlu2 %1230  ;;  %v4200_v25 = vpop.permute.xlu1 %1108  ;;  %v1646_v9 = vsel %vm1394_vm1, %v1644_v39, %v1645_v61  ;;  %v1895_v37 = vrot.slane %v1876_v5, 2  ;;  %v1635_v5 = vmul.f32 %v4024_v34, %v3740_v43  ;;  %v4249_v34 = vmul.f32 %v4172_v16, %v4125_v32 }
 0x167   : > { %6323 = vst [vmem:[#allocation73_spill] sm:$0xff] %v4198_v57  ;;  %v4202_v52 = vpop.permute.xlu0 %1106  ;;  %v1336_v28 = vrot.slane %v1319_v54, 1  ;;  %v4229_v57 = vld [vmem:[%s3563_s9 + $0x28] sm:$0xff] }
 0x168   : > { %6324 = vst [vmem:[#allocation74_spill] sm:$0xff] %v4200_v25  ;;  %v1838_v25 = vrot.slane %v1817_v0, 2  ;;  %v1896_v39 = vsel %vm1394_vm1, %v1893_v8, %v1895_v37  ;;  %v1657_v0 = vrot.slane %v1635_v5, 2 }
 0x169   : > { %6325 = vst [vmem:[#allocation75_spill] sm:$0xff] %v4202_v52  ;;  %v1337_v61 = vsel %vm717_vm0, %v1334_v15, %v1336_v28 }
 0x16a   : > { %v1839_v54 = vsel %vm1394_vm1, %v1836_v17, %v1838_v25  ;;  %6332 = vst [vmem:[#allocation82_spill] sm:$0xff] %v4249_v34 }
 0x16c   : > { %1726 = vrot.lane.b32.xlu2 %v1713_v14, %s3449_s13  ;;  %1669 = vrot.lane.b32.xlu1 %v1656_v47, %s3449_s13  ;;  %v1818_v14 = vmul.f32 %v3999_v55, %v3740_v43  ;;  %v1694_v47 = vmul.f32 %v4229_v57, %v4163_v7 }
 0x16d   : > { %1659 = vrot.lane.b32.xlu0 %v1646_v9, %s3449_s13 }
 0x16e   : > { %v4218_v48 = vpop.permute.xlu2 %1600  ;;  %v4220_v52 = vpop.permute.xlu1 %1114  ;;  %v1840_v15 = vrot.slane %v1818_v14, 2  ;;  %v1714_v8 = vrot.slane %v1694_v47, 2  ;;  %v4257_v14 = vld [vmem:[%s3563_s9 + $0x8] sm:$0xff] }
 0x16f   : > { %6326 = vst [vmem:[#allocation76_spill] sm:$0xff] %v4218_v48  ;;  %v4222_v22 = vpop.permute.xlu0 %1112  ;;  %v4261_v47 = vmul.f32 %v4257_v14, %v4131_v27  ;;  %v312_v48 = vstv %s311_s8  ;;  %s4868_s8 = sld [smem:[#allocation2 + $0x1e]] }
 0x170   : > { %6327 = vst [vmem:[#allocation77_spill] sm:$0xff] %v4220_v52  ;;  %v1841_v17 = vsel %vm1394_vm1, %v1838_v25, %v1840_v15  ;;  %v6218_v25 = vrot.slane %v4249_v34, 1  ;;  %v313_v56 = vmul.f32 %v4190_v50, %v312_v48  ;;  %v316_v40 = vmul.f32 %v4172_v16, %v312_v48 }
 0x171   : > { %6328 = vst [vmem:[#allocation78_spill] sm:$0xff] %v4222_v22  ;;  %v1715_v22 = vsel %vm1394_vm1, %v1712_v38, %v1714_v8  ;;  %v6355_v23 = vrot.slane %v4261_v47, 2 }
 0x174   : > { %1350 = vrot.lane.b32.xlu2 %v1337_v61, %s3450_s18  ;;  %1909 = vrot.lane.b32.xlu1 %v1896_v39, %s3450_s18  ;;  %v4253_v61 = vmul.f32 %v4229_v57, %v4131_v27  ;;  %v1658_v39 = vsel %vm1394_vm1, %v1655_v51, %v1657_v0  ;;  %v1339_v0 = vsel %vm717_vm0, %v1336_v28, %v6218_v25  ;;  %v6336_v51 = vrot.slane %v4148_v33, 2 }
 0x175   : > { %1852 = vrot.lane.b32.xlu0 %v1839_v54, %s3450_s18  ;;  %v4298_v28 = vmul.f32 %v4257_v14, %v4163_v7 }
 0x176   : > { %v4239_v55 = vpop.permute.xlu2 %1234  ;;  %v4241_v9 = vpop.permute.xlu1 %1167  ;;  %v6219_v38 = vrot.slane %v4253_v61, 2  ;;  %v6353_v36 = vrot.slane %v4253_v61, 2 }
 0x177   : > { %6329 = vst [vmem:[#allocation79_spill] sm:$0xff] %v4239_v55  ;;  %v4243_v52 = vpop.permute.xlu0 %1165 }
 0x178   : > { %6330 = vst [vmem:[#allocation80_spill] sm:$0xff] %v4241_v9  ;;  %v315_v9 = vmul.f32 %v4144_v6, %v312_v48 }
 0x179   : > { %6331 = vst [vmem:[#allocation81_spill] sm:$0xff] %v4243_v52 }
 0x17c   : > { %1854 = vrot.lane.b32.xlu2 %v1841_v17, %s3450_s18  ;;  %1728 = vrot.lane.b32.xlu1 %v1715_v22, %s3449_s13  ;;  %v4277_v22 = vmul.f32 %v4184_v2, %v4163_v7  ;;  %v1898_v17 = vsel %vm1394_vm1, %v1895_v37, %v6219_v38 }
 0x17d   : > { %1671 = vrot.lane.b32.xlu0 %v1658_v39, %s3449_s13  ;;  %v4287_v39 = vmul.f32 %v4144_v6, %v4163_v7 }
 0x17e   : > { %v4268_v54 = vpop.permute.xlu2 %1236  ;;  %v4270_v5 = vpop.permute.xlu1 %1173  ;;  %v6220_v37 = vrot.slane %v4277_v22, 2 }
 0x17f   : > { %6333 = vst [vmem:[#allocation83_spill] sm:$0xff] %v4268_v54  ;;  %v4273_v15 = vpop.permute.xlu0 %1171  ;;  %v6337_v54 = vrot.slane %v4261_v47, 2  ;;  %v6221_v33 = vrot.slane %v4287_v39, 2  ;;  %v4450_v47 = vadd.f32 %v3694_v11, %v316_v40  ;;  %v6361_v40 = vrot.slane %v4298_v28, 2 }
 0x180   : > { %6334 = vst [vmem:[#allocation84_spill] sm:$0xff] %v4270_v5  ;;  %v1689_v5 = vmul.f32 %v4190_v50, %v4163_v7 }
 0x181   : > { %6335 = vst [vmem:[#allocation85_spill] sm:$0xff] %v4273_v15  ;;  %v1892_v55 = vsel %vm1394_vm1, %v6337_v54, %v6336_v51  ;;  %v4310_v15 = vstv %s3223_s29  ;;  %s4813_s29 = sld [smem:[#allocation5]] }
 0x182   : > { %v1705_v51 = vrot.slane %v1689_v5, 2  ;;  %v4328_v38 = vmul.f32 %v4172_v16, %v4310_v15 }
 0x184   : > { %1352 = vrot.lane.b32.xlu2 %v1339_v0, %s3450_s18  ;;  %1911 = vrot.lane.b32.xlu1 %v1898_v17, %s3450_s18  ;;  %v321_v0 = vstv %s3190_s14  ;;  %v6341_v17 = vrot.slane %v4176_v10, 2  ;;  %6342 = vst [vmem:[#allocation89_spill] sm:$0xff] %v4328_v38  ;;  %v6343_v10 = vrot.slane %v4298_v28, 2  ;;  %v4519_v28 = vmul.f32 %v4229_v57, %v4348_v46  ;;  %s4883_s14 = sld [smem:[#allocation2 + $0xf]] }
 0x185   : > { %1905 = vrot.lane.b32.xlu0 %v1892_v55, %s3450_s18  ;;  %v1717_v55 = vsel %vm1394_vm1, %v1714_v8, %v6220_v37  ;;  %v317_v8 = vmul.f32 %v4179_v3, %v312_v48  ;;  %v326_v34 = vmul.f32 %v4179_v3, %v321_v0  ;;  %v325_v43 = vmul.f32 %v4172_v16, %v321_v0 }
 0x186   : > { %v4305_v25 = vpop.permute.xlu2 %1604  ;;  %v4307_v54 = vpop.permute.xlu1 %1232  ;;  %v1711_v5 = vsel %vm1394_vm1, %v6221_v33, %v6341_v17  ;;  %v1707_v37 = vsel %vm1394_vm1, %v1705_v51, %v6343_v10  ;;  %v1872_v17 = vmul.f32 %v4190_v50, %v4131_v27  ;;  %v318_v33 = vmul.f32 %v4229_v57, %v312_v48 }
 0x187   : > { %6338 = vst [vmem:[#allocation86_spill] sm:$0xff] %v4305_v25  ;;  %v4312_v52 = vpop.permute.xlu0 %1175  ;;  %v323_v25 = vmul.f32 %v4257_v14, %v321_v0  ;;  %v4358_v45 = vadd.f32 %v3658_v49, %v317_v8  ;;  %v331_v10 = vmul.f32 %v4190_v50, %v4348_v46  ;;  %v334_v49 = vmul.f32 %v4172_v16, %v4348_v46 }
 0x188   : > { %6339 = vst [vmem:[#allocation87_spill] sm:$0xff] %v4307_v54  ;;  %v4336_v54 = vmul.f32 %v4184_v2, %v4131_v27  ;;  %v4367_v51 = vadd.f32 %v3666_v53, %v318_v33  ;;  %v319_v8 = vmul.f32 %v4184_v2, %v312_v48  ;;  %v4383_v53 = vstv %s4314_s16  ;;  %s5078_s16 = sld [smem:[#allocation2 + $0x18]] }
 0x189   : > { %6340 = vst [vmem:[#allocation88_spill] sm:$0xff] %v4312_v52  ;;  %v4332_v52 = vmul.f32 %v4179_v3, %v4310_v15  ;;  %v4388_v33 = vstv %s4319_s17  ;;  %v4403_v20 = vadd.f32 %v3674_v58, %v323_v25  ;;  %v342_v58 = vmul.f32 %v4144_v6, %v4383_v53  ;;  %s5168_s17 = sld [smem:[#allocation5 + $0x2]] }
 0x18a   : > { %6344 = vst [vmem:[#allocation90_spill] sm:$0xff] %v4358_v45  ;;  %v322_v45 = vmul.f32 %v4190_v50, %v321_v0  ;;  %v4430_v7 = vmul.f32 %v4257_v14, %v4388_v33  ;;  %v4434_v61 = vmul.f32 %v4144_v6, %v4388_v33  ;;  %v4453_v25 = vadd.f32 %v3696_v12, %v331_v10 }
 0x18b   : > { %6347 = vst [vmem:[#allocation93_spill] sm:$0xff] %v4367_v51  ;;  %v4468_v11 = vmul.f32 %v4179_v3, %v4388_v33  ;;  %v4472_v12 = vmul.f32 %v4229_v57, %v4388_v33  ;;  %v4501_v10 = vmul.f32 %v4229_v57, %v4310_v15 }
 0x18c   : > { %1730 = vrot.lane.b32.xlu2 %v1717_v55, %s3449_s13  ;;  %1724 = vrot.lane.b32.xlu1 %v1711_v5, %s3449_s13  ;;  %v314_v55 = vmul.f32 %v4257_v14, %v312_v48  ;;  %6349 = vst [vmem:[#allocation95_spill] sm:$0xff] %v4383_v53  ;;  %v6351_v48 = vrot.slane %v4328_v38, 2  ;;  %v4410_v38 = vmul.f32 %v4179_v3, %v4125_v32 }
 0x18d   : > { %1720 = vrot.lane.b32.xlu0 %v1707_v37, %s3449_s13  ;;  %v1888_v37 = vrot.slane %v1872_v17, 2  ;;  %v4380_v17 = vmul.f32 %v4144_v6, %v321_v0  ;;  %6354 = vst [vmem:[#allocation96_spill] sm:$0xff] %v4403_v20 }
 0x18e   : > { %v4362_v5 = vpop.permute.xlu2 %1295  ;;  %v4364_v4 = vpop.permute.xlu1 %1228  ;;  %6357 = vst [vmem:[#allocation98_spill] sm:$0xff] %v4453_v25 }
 0x18f   : > { %6345 = vst [vmem:[#allocation91_spill] sm:$0xff] %v4362_v5  ;;  %v4374_v35 = vpop.permute.xlu0 %1177  ;;  %v337_v5 = vmul.f32 %v4184_v2, %v4348_v46  ;;  %v1890_v60 = vsel %vm1394_vm1, %v1888_v37, %v6355_v23  ;;  %v4426_v23 = vadd.f32 %v3684_v63, %v326_v34  ;;  %v4446_v63 = vmul.f32 %v4257_v14, %v4348_v46 }
 0x190   : > { %6346 = vst [vmem:[#allocation92_spill] sm:$0xff] %v4364_v4  ;;  %v6350_v4 = vrot.slane %v4332_v52, 2  ;;  %v1718_v34 = vrot.slane %v1696_v24, 2  ;;  %v4489_v37 = vmul.f32 %v4179_v3, %v4348_v46 }
 0x191   : > { %6348 = vst [vmem:[#allocation94_spill] sm:$0xff] %v4374_v35  ;;  %v6352_v35 = vrot.slane %v4336_v54, 2 }
 0x192   : > { %v1957_v51 = vsel %vm1394_vm1, %v6351_v48, %v6350_v4  ;;  %v4414_v4 = vmul.f32 %v4229_v57, %v4125_v32  ;;  %6356 = vst [vmem:[#allocation97_spill] sm:$0xff] %v4426_v23  ;;  %v6359_v48 = vrot.slane %v4277_v22, 2  ;;  %v4507_v23 = vadd.f32 %v3708_v19, %v322_v45 }
 0x193   : > { %v1900_v26 = vsel %vm1394_vm1, %v6353_v36, %v6352_v35  ;;  %v4417_v36 = vadd.f32 %v3682_v62, %v315_v9  ;;  %v4423_v35 = vmul.f32 %v4229_v57, %v321_v0  ;;  %v4439_v62 = vadd.f32 %v3686_v1, %v313_v56 }
 0x194   : > { %1970 = vrot.lane.b32.xlu2 %v1957_v51, %s3450_s18  ;;  %1913 = vrot.lane.b32.xlu1 %v1900_v26, %s3450_s18  ;;  %v4442_v9 = vmul.f32 %v4184_v2, %v321_v0  ;;  %v1342_v0 = vrot.slane %v4414_v4, 1  ;;  %v4462_v51 = vadd.f32 %v3698_v13, %v314_v55  ;;  %v4480_v13 = vstv %s4385_s19  ;;  %s5576_s19 = sld [smem:[#allocation5 + $0x3]] }
 0x195   : > { %1903 = vrot.lane.b32.xlu0 %v1890_v60, %s3450_s18  ;;  %v333_v60 = vmul.f32 %v4144_v6, %v4348_v46  ;;  %v4485_v55 = vmul.f32 %v4184_v2, %v4125_v32  ;;  %v1719_v4 = vsel %vm1394_vm1, %v6359_v48, %v1718_v34  ;;  %v6360_v56 = vrot.slane %v4287_v39, 2  ;;  %v4513_v48 = vld [vmem:[%s3563_s9 + $0x38] sm:$0x3] }
 0x196   : > { %v4455_v26 = vpop.permute.xlu2 %1846  ;;  %v4457_v1 = vpop.permute.xlu1 %1226  ;;  %v6363_v22 = vrot.slane %v4410_v38, 1  ;;  %v1879_v39 = vmul.f32 %v4513_v48, %v4131_v27  ;;  %v4525_v19 = vmul.f32 %v4257_v14, %v4480_v13  ;;  %v4528_v45 = vadd.f32 %v3710_v21, %v319_v8 }
 0x197   : > { %6358 = vst [vmem:[#allocation99_spill] sm:$0xff] %v4457_v1  ;;  %v4474_v24 = vpop.permute.xlu0 %1602  ;;  %v1709_v25 = vsel %vm1394_vm1, %v6361_v40, %v6360_v56  ;;  %v4504_v1 = vadd.f32 %v3706_v18, %v334_v49  ;;  %v6224_v18 = vrot.slane %v4472_v12, 1  ;;  %v6365_v49 = vrot.slane %v4434_v61, 1 }
 0x198   : > { %v1343_v34 = vsel %vm717_vm0, %v6363_v22, %v1342_v0  ;;  %6364 = vst [vmem:[#allocation101_spill] sm:$0xff] %v4525_v19  ;;  %v6366_v40 = vrot.slane %v4430_v7, 1  ;;  %v749_v46 = vmul.f32 %v4190_v50, %v4480_v13  ;;  %v4543_v56 = vadd.f32 %v3720_v29, %v337_v5 }
 0x199   : > { %6362 = vst [vmem:[#allocation100_spill] sm:$0xff] %v4504_v1  ;;  %v4546_v21 = vadd.f32 %v3722_v30, %v325_v43  ;;  %v4550_v8 = vmul.f32 %v4190_v50, %v4383_v53  ;;  %v4560_v29 = vmul.f32 %v4257_v14, %v4383_v53  ;;  %v701_v30 = vmul.f32 %v4190_v50, %v4388_v33 }
 0x19a   : > { %v4535_v27 = vsel %vm717_vm0, %v6366_v40, %v6365_v49  ;;  %6367 = vst [vmem:[#allocation102_spill] sm:$0xff] %v4543_v56  ;;  %v4584_v22 = vstv %s4476_s20  ;;  %v6375_v40 = vrot.slane %v4501_v10, 2  ;;  %v4604_v56 = vmul.f32 %v4144_v6, %v4310_v15 }
 0x19b   : > { %6368 = vst [vmem:[#allocation103_spill] sm:$0xff] %v4546_v21  ;;  %v718_v20 = vrot.slane %v701_v30, 1  ;;  %v4627_v1 = vadd.f32 %v3742_v44, %v4423_v35  ;;  %v4635_v30 = vmul.f32 %v4179_v3, %v4480_v13 }
 0x19c   : > { %1732 = vrot.lane.b32.xlu2 %v1719_v4, %s3449_s13  ;;  %1722 = vrot.lane.b32.xlu1 %v1709_v25, %s3449_s13  ;;  %v4556_v25 = vadd.f32 %v3724_v31, %v4380_v17  ;;  %v1901_v4 = vrot.slane %v1879_v39, 2  ;;  %v6372_v31 = vrot.slane %v4468_v11, 1  ;;  %v704_v39 = vmul.f32 %v4172_v16, %v4388_v33 }
 0x19d   : > { %1356 = vrot.lane.b32.xlu0 %v1343_v34, %s3450_s18  ;;  %v4569_v34 = vadd.f32 %v3735_v41, %v342_v58  ;;  %v4590_v41 = vmul.f32 %v4172_v16, %v4480_v13  ;;  %v765_v58 = vrot.slane %v749_v46, 1  ;;  %v4610_v46 = vmul.f32 %v4257_v14, %v4310_v15  ;;  %6379 = vst [vmem:[#allocation109_spill] sm:$0xff] %v4627_v1 }
 0x19e   : > { %6369 = vst [vmem:[#allocation104_spill] sm:$0xff] %v4556_v25  ;;  %v4564_v5 = vpop.permute.xlu2 %1297  ;;  %v4566_v43 = vpop.permute.xlu1 %1598  ;;  %v4576_v17 = vsel %vm717_vm0, %v6372_v31, %v6224_v18  ;;  %v6374_v31 = vrot.slane %v4485_v55, 1  ;;  %v6396_v1 = vrot.slane %v4604_v56, 2  ;;  %v6403_v25 = vrot.slane %v4635_v30, 1 }
 0x19f   : > { %6370 = vst [vmem:[#allocation105_spill] sm:$0xff] %v4564_v5  ;;  %v4581_v49 = vpop.permute.xlu0 %1293  ;;  %v6376_v5 = vrot.slane %v4332_v52, 2  ;;  %v1750_v52 = vmul.f32 %v4190_v50, %v4584_v22  ;;  %v6404_v21 = vrot.slane %v4590_v41, 1 }
 0x1a0   : > { %6371 = vst [vmem:[#allocation106_spill] sm:$0xff] %v4569_v34  ;;  %v1345_v18 = vsel %vm717_vm0, %v1342_v0, %v6374_v31  ;;  %v6377_v0 = vrot.slane %v4336_v54, 2  ;;  %v4631_v54 = vmul.f32 %v4179_v3, %v4383_v53 }
 0x1a1   : > { %6373 = vst [vmem:[#allocation107_spill] sm:$0xff] %v4581_v49  ;;  %v1959_v34 = vsel %vm1394_vm1, %v6376_v5, %v6375_v40  ;;  %v1933_v49 = vmul.f32 %v4190_v50, %v4310_v15  ;;  %v4619_v5 = vmul.f32 %v4257_v14, %v4584_v22  ;;  %v4623_v40 = vadd.f32 %v3737_v42, %v4442_v9 }
 0x1a2   : > { %v1902_v31 = vsel %vm1394_vm1, %v6377_v0, %v1901_v4  ;;  %6380 = vst [vmem:[#allocation110_spill] sm:$0xff] %v4631_v54  ;;  %v4638_v4 = vadd.f32 %v3755_v59, %v333_v60  ;;  %v4642_v0 = vmul.f32 %v4184_v2, %v4383_v53  ;;  %v723_v42 = vrot.slane %v704_v39, 1  ;;  %v6393_v39 = vld [vmem:[#allocation27_spill] sm:$0xff] }
 0x1a3   : > { %6378 = vst [vmem:[#allocation108_spill] sm:$0xff] %v4623_v40  ;;  %v6384_v9 = vrot.slane %v4525_v19, 1  ;;  %v1949_v60 = vrot.slane %v1933_v49, 2  ;;  %v1766_v35 = vrot.slane %v1750_v52, 2  ;;  %v4669_v49 = vmul.f32 %v4184_v2, %v4480_v13 }
 0x1a4   : > { %6381 = vst [vmem:[#allocation111_spill] sm:$0xff] %v4635_v30  ;;  %1358 = vrot.lane.b32.xlu2 %v1345_v18, %s3450_s18  ;;  %1972 = vrot.lane.b32.xlu1 %v1959_v34, %s3450_s18  ;;  %v4683_v52 = vmul.f32 %v4184_v2, %v4388_v33  ;;  %v708_v54 = vmul.f32 %v4513_v48, %v4388_v33 }
 0x1a5   : > { %6382 = vst [vmem:[#allocation112_spill] sm:$0xff] %v4638_v4  ;;  %v4647_v44 = vsel %vm717_vm0, %v765_v58, %v6384_v9  ;;  %1915 = vrot.lane.b32.xlu0 %v1902_v31, %s3450_s18  ;;  %v6388_v58 = vrot.slane %v4430_v7, 1  ;;  %v6392_v31 = vrot.slane %v4434_v61, 1  ;;  %v6394_v4 = vld [vmem:[#allocation89_spill] sm:$0xff]  ;;  %v1324_v61 = vmul.f32 %v4513_v48, %v4125_v32  ;;  %v6401_v32 = vld [vmem:[#allocation15_spill] sm:$0xff] }
 0x1a6   : > { %6383 = vst [vmem:[#allocation113_spill] sm:$0xff] %v4642_v0  ;;  %v6386_v0 = vld [vmem:[#allocation12_spill] sm:$0xff]  ;;  %v4662_v9 = vpop.permute.xlu2 %1842  ;;  %v4664_v34 = vpop.permute.xlu1 %1238  ;;  %v6395_v40 = vrot.slane %v6394_v4, 2  ;;  %v6398_v4 = vrot.slane %v4619_v5, 2  ;;  %v729_v33 = vrot.slane %v4683_v52, 1  ;;  %v6408_v52 = vld [vmem:[#allocation53_spill] sm:$0xff] }
 0x1a7   : > { %6385 = vst [vmem:[#allocation114_spill] sm:$0xff] %v4647_v44  ;;  %v4657_v53 = vadd.f32 %v6386_v0, %v4446_v63  ;;  %v720_v18 = vsel %vm717_vm0, %v718_v20, %v6388_v58  ;;  %v756_v63 = vmul.f32 %v4513_v48, %v4480_v13  ;;  %v4675_v0 = vstv %s4579_s21  ;;  %v4677_v7 = vpop.permute.xlu0 %1844  ;;  %v6391_v20 = vld [vmem:[#allocation13_spill] sm:$0xff] }
 0x1a8   : > { %6389 = vst [vmem:[#allocation115_spill] sm:$0xff] %v4664_v34  ;;  %v561_v58 = vadd.f32 %v6391_v20, %v4462_v51  ;;  %v724_v59 = vsel %vm717_vm0, %v6392_v31, %v723_v42  ;;  %v562_v34 = vadd.f32 %v6393_v39, %v4417_v36  ;;  %v1955_v44 = vsel %vm1394_vm1, %v6396_v1, %v6395_v40  ;;  %v6399_v40 = vld [vmem:[#allocation14_spill] sm:$0xff] }
 0x1a9   : > { %6387 = vst [vmem:[#allocation12_spill] sm:$0xff] %v4657_v53  ;;  %v4689_v53 = vstv %s4592_s22  ;;  %v6397_v51 = vrot.slane %v4610_v46, 2  ;;  %v4705_v31 = vmul.f32 %v4144_v6, %v4675_v0  ;;  %v4709_v36 = vmul.f32 %v4172_v16, %v4675_v0 }
 0x1aa   : > { %6390 = vst [vmem:[#allocation116_spill] sm:$0xff] %v4669_v49  ;;  %v1768_v39 = vsel %vm1394_vm1, %v1766_v35, %v6398_v4  ;;  %v4716_v1 = vmul.f32 %v4184_v2, %v4310_v15  ;;  %v4733_v35 = vsel %vm717_vm0, %v6404_v21, %v6403_v25  ;;  %v6405_v4 = vrot.slane %v4468_v11, 1  ;;  %v6406_v25 = vld [vmem:[#allocation23_spill] sm:$0xff] }
 0x1ab   : > { %v1951_v20 = vsel %vm1394_vm1, %v1949_v60, %v6397_v51  ;;  %v4720_v60 = vadd.f32 %v6399_v40, %v4519_v28  ;;  %v4724_v51 = vadd.f32 %v6401_v32, %v4489_v37  ;;  %v6228_v28 = vrot.slane %v4669_v49, 1 }
 0x1ac   : > { %v726_v19 = vsel %vm717_vm0, %v723_v42, %v6405_v4  ;;  %v741_v40 = vadd.f32 %v4535_v27, %v561_v58  ;;  %v778_v37 = vrot.slane %v756_v63, 1  ;;  %1968 = vrot.lane.b32.xlu2 %v1955_v44, %s3450_s18  ;;  %1964 = vrot.lane.b32.xlu1 %v1951_v20, %s3450_s18  ;;  %v742_v32 = vadd.f32 %v724_v59, %v562_v34  ;;  %v6410_v4 = vld [vmem:[#allocation16_spill] sm:$0xff] }
 0x1ad   : > { %6400 = vst [vmem:[#allocation13_spill] sm:$0xff] %v4720_v60  ;;  %v4745_v21 = vmul.f32 %v4144_v6, %v4689_v53  ;;  %1781 = vrot.lane.b32.xlu0 %v1768_v39, %s3449_s13  ;;  %v1346_v11 = vrot.slane %v1324_v61, 1  ;;  %v560_v42 = vadd.f32 %v6406_v25, %v4439_v62  ;;  %v1398_v27 = vrot.slane %v4705_v31, 2  ;;  %v6409_v39 = vld [vmem:[#allocation90_spill] sm:$0xff] }
 0x1ae   : > { %6402 = vst [vmem:[#allocation27_spill] sm:$0xff] %v4724_v51  ;;  %v4752_v44 = vpop.permute.xlu2 %1299  ;;  %v4754_v58 = vpop.permute.xlu1 %1663  ;;  %v1960_v59 = vrot.slane %v4716_v1, 2  ;;  %v731_v34 = vrot.slane %v708_v54, 1  ;;  %v944_v20 = vadd.f32 %v6408_v52, %v742_v32  ;;  %v1379_v61 = vmul.f32 %v4257_v14, %v4675_v0  ;;  %v6412_v52 = vld [vmem:[#allocation17_spill] sm:$0xff]  ;;  %v6414_v60 = vld [vmem:[#allocation70_spill] sm:$0xff] }
 0x1af   : > { %6407 = vst [vmem:[#allocation89_spill] sm:$0xff] %v4752_v44  ;;  %v1378_v62 = vmul.f32 %v4190_v50, %v4675_v0  ;;  %v4764_v31 = vpop.permute.xlu0 %1606  ;;  %v564_v25 = vadd.f32 %v6410_v4, %v6409_v39  ;;  %v4771_v1 = vsel %vm717_vm0, %v6228_v28, %v778_v37  ;;  %v4775_v54 = vmul.f32 %v4172_v16, %v4689_v53  ;;  %v6417_v28 = vld [vmem:[#allocation82_spill] sm:$0xff] }
 0x1b0   : > { %6411 = vst [vmem:[#allocation14_spill] sm:$0xff] %v4771_v1  ;;  %v1940_v32 = vmul.f32 %v4513_v48, %v4310_v15  ;;  %v4781_v63 = vadd.f32 %v6412_v52, %v4560_v29  ;;  %v1188_v44 = vadd.f32 %v6414_v60, %v944_v20  ;;  %v6415_v39 = vrot.slane %v4485_v55, 1  ;;  %v6421_v60 = vld [vmem:[#allocation18_spill] sm:$0xff] }
 0x1b1   : > { %v6416_v37 = vrot.slane %v4410_v38, 1  ;;  %v6418_v51 = vrot.slane %v6417_v28, 1  ;;  %v740_v49 = vadd.f32 %v720_v18, %v560_v42  ;;  %v6419_v30 = vrot.slane %v4709_v36, 2  ;;  %v6424_v42 = vld [vmem:[#allocation40_spill] sm:$0xff]  ;;  %v6425_v20 = vld [vmem:[#allocation54_spill] sm:$0xff] }
 0x1b2   : > { %6413 = vst [vmem:[#allocation15_spill] sm:$0xff] %v4781_v63  ;;  %v1347_v4 = vsel %vm717_vm0, %v6415_v39, %v1346_v11  ;;  %v6420_v29 = vrot.slane %v4501_v10, 2  ;;  %v4800_v55 = vmul.f32 %v4144_v6, %v4584_v22  ;;  %v4804_v38 = vadd.f32 %v6421_v60, %v4550_v8  ;;  %v6423_v11 = vld [vmem:[#allocation26_spill] sm:$0xff] }
 0x1b3   : > { %v1341_v1 = vsel %vm717_vm0, %v6418_v51, %v6416_v37  ;;  %v1401_v15 = vsel %vm1394_vm1, %v1398_v27, %v6419_v30  ;;  %v4807_v28 = vsel %vm717_vm0, %v729_v33, %v731_v34  ;;  %v1396_v18 = vrot.slane %v1379_v61, 2 }
 0x1b4   : > { %v1961_v52 = vsel %vm1394_vm1, %v6420_v29, %v1960_v59  ;;  %6422 = vst [vmem:[#allocation23_spill] sm:$0xff] %v4804_v38  ;;  %v1395_v51 = vrot.slane %v1378_v62, 2  ;;  %v563_v30 = vadd.f32 %v6423_v11, %v4450_v47  ;;  %v942_v10 = vadd.f32 %v6424_v42, %v740_v49  ;;  %1360 = vrot.lane.b32.xlu2 %v1347_v4, %s3450_s18  ;;  %v6428_v29 = vld [vmem:[#allocation81_spill] sm:$0xff] }
 0x1b5   : > { %v943_v39 = vadd.f32 %v6425_v20, %v741_v40  ;;  %1354 = vrot.lane.b32.xlu1 %v1341_v1, %s3450_s18  ;;  %v1962_v8 = vrot.slane %v1940_v32, 2  ;;  %v6426_v61 = vrot.slane %v4472_v12, 1  ;;  %v4824_v47 = vadd.f32 %v4576_v17, %v564_v25  ;;  %1974 = vrot.lane.b32.xlu0 %v1961_v52, %s3450_s18  ;;  %v6427_v40 = vld [vmem:[#allocation80_spill] sm:$0xff] }
 0x1b6   : > { %v1419_v49 = vadd.f32 %v1401_v15, %v1188_v44  ;;  %v1186_v4 = vadd.f32 %v6428_v29, %v942_v10  ;;  %v4829_v60 = vpop.permute.xlu2 %1667  ;;  %v4831_v1 = vpop.permute.xlu1 %1291  ;;  %v1769_v32 = vrot.slane %v4800_v55, 2  ;;  %v4835_v12 = vstv %s4757_s23  ;;  %s3452_s23 = smov 64  }
 0x1b7   : > { %v4821_v62 = vsel %vm717_vm0, %v6426_v61, %v729_v33  ;;  %v1187_v37 = vadd.f32 %v6427_v40, %v943_v39  ;;  %6429 = vst [vmem:[#allocation53_spill] sm:$0xff] %v4829_v60  ;;  %v751_v33 = vmul.f32 %v4144_v6, %v4480_v13  ;;  %v1399_v17 = vsel %vm1394_vm1, %v1396_v18, %v1398_v27  ;;  %v4845_v15 = vpop.permute.xlu0 %1287 }
 0x1b8   : > { %6430 = vst [vmem:[#allocation90_spill] sm:$0xff] %v4831_v1  ;;  %v4842_v44 = vmul.f32 %v4179_v3, %v4675_v0  ;;  %v1397_v25 = vsel %vm1394_vm1, %v1395_v51, %v1396_v18  ;;  %v743_v52 = vadd.f32 %v726_v19, %v563_v30  ;;  %v1621_v11 = vadd.f32 %v4474_v24, %v1419_v49  ;;  %v6435_v49 = vld [vmem:[#allocation43_spill] sm:$0xff] }
 0x1b9   : > { %6431 = vst [vmem:[#allocation16_spill] sm:$0xff] %v4845_v15  ;;  %v1963_v55 = vsel %vm1394_vm1, %v1960_v59, %v1962_v8  ;;  %v6432_v42 = vrot.slane %v4604_v56, 2  ;;  %v6433_v10 = vrot.slane %v4610_v46, 2  ;;  %v4856_v27 = vmul.f32 %v4179_v3, %v4584_v22 }
 0x1ba   : > { %v4860_v18 = vmul.f32 %v4229_v57, %v4584_v22  ;;  %v1994_v24 = vmul.f32 %v4190_v50, %v4835_v12  ;;  %v4866_v19 = vmul.f32 %v4257_v14, %v4835_v12  ;;  %v1418_v56 = vadd.f32 %v1399_v17, %v1187_v37 }
 0x1bb   : > { %v1953_v20 = vsel %vm1394_vm1, %v6433_v10, %v6432_v42  ;;  %v1417_v46 = vadd.f32 %v1397_v25, %v1186_v4  ;;  %v6434_v59 = vrot.slane %v4619_v5, 2  ;;  %v4875_v30 = vmul.f32 %v4172_v16, %v4584_v22 }
 0x1bc   : > { %v768_v39 = vrot.slane %v751_v33, 1  ;;  %v4879_v50 = vmul.f32 %v4229_v57, %v4689_v53  ;;  %v6233_v61 = vrot.slane %v4842_v44, 2  ;;  %v945_v40 = vadd.f32 %v6435_v49, %v743_v52  ;;  %1976 = vrot.lane.b32.xlu2 %v1963_v55, %s3450_s18  ;;  %v6436_v52 = vld [vmem:[#allocation19_spill] sm:$0xff] }
 0x1bd   : > { %v1770_v51 = vsel %vm1394_vm1, %v6434_v59, %v1769_v32  ;;  %v4887_v5 = vstv %s4813_s29  ;;  %v1865_v37 = vadd.f32 %v4455_v26, %v1621_v11  ;;  %v1619_v29 = vadd.f32 %v4566_v43, %v1417_v46  ;;  %1966 = vrot.lane.b32.xlu1 %v1953_v20, %s3450_s18  ;;  %v6437_v43 = vld [vmem:[#allocation76_spill] sm:$0xff] }
 0x1be   : > { %1783 = vrot.lane.b32.xlu0 %v1770_v51, %s3449_s13  ;;  %v6231_v4 = vrot.slane %v4856_v27, 2  ;;  %v1775_v33 = vrot.slane %v4860_v18, 2  ;;  %v2010_v17 = vrot.slane %v1994_v24, 2  ;;  %v2011_v25 = vrot.slane %v4866_v19, 2  ;;  %v4906_v55 = vpop.permute.xlu2 %1348  ;;  %v4908_v10 = vpop.permute.xlu1 %1665  ;;  %v6439_v24 = vld [vmem:[#allocation85_spill] sm:$0xff] }
 0x1bf   : > { %v4899_v42 = vadd.f32 %v6436_v52, %v4507_v23  ;;  %v4903_v26 = vmul.f32 %v4184_v2, %v4689_v53  ;;  %v1620_v11 = vadd.f32 %v6437_v43, %v1418_v56  ;;  %6438 = vst [vmem:[#allocation17_spill] sm:$0xff] %v4906_v55  ;;  %v6232_v20 = vrot.slane %v4875_v30, 2  ;;  %v4919_v56 = vpop.permute.xlu0 %1608 }
 0x1c0   : > { %v1189_v19 = vadd.f32 %v6439_v24, %v945_v40  ;;  %v6440_v23 = vrot.slane %v4709_v36, 2  ;;  %v1863_v59 = vadd.f32 %v4662_v9, %v1619_v29  ;;  %v2057_v51 = vadd.f32 %v4887_v5, %v1865_v37  ;;  %v6442_v37 = vld [vmem:[#allocation29_spill] sm:$0xff] }
 0x1c1   : > { %v1864_v49 = vadd.f32 %v4677_v7, %v1620_v11  ;;  %v1996_v52 = vmul.f32 %v4144_v6, %v4835_v12  ;;  %v4927_v40 = vmul.f32 %v4172_v16, %v4835_v12  ;;  %v6441_v36 = vrot.slane %v4590_v41, 1  ;;  %v6443_v24 = vld [vmem:[#allocation101_spill] sm:$0xff] }
 0x1c2   : > { %v1403_v46 = vsel %vm1394_vm1, %v6440_v23, %v6233_v61  ;;  %v1776_v9 = vsel %vm1394_vm1, %v6231_v4, %v1775_v33  ;;  %v2012_v29 = vsel %vm1394_vm1, %v2010_v17, %v2011_v25  ;;  %v4938_v7 = vmul.f32 %v4184_v2, %v4584_v22 }
 0x1c3   : > { %v771_v43 = vsel %vm717_vm0, %v768_v39, %v6441_v36  ;;  %v566_v11 = vadd.f32 %v6442_v37, %v4528_v45  ;;  %v6444_v23 = vrot.slane %v6443_v24, 1  ;;  %v4948_v41 = vstv %s4868_s8 }
 0x1c4   : > { %v1772_v36 = vsel %vm1394_vm1, %v1769_v32, %v6232_v20  ;;  %v4955_v17 = vmul.f32 %v4229_v57, %v4480_v13  ;;  %v1420_v34 = vadd.f32 %v1403_v46, %v1189_v19  ;;  %v2055_v8 = vadd.f32 %v4887_v5, %v1863_v59  ;;  %1789 = vrot.lane.b32.xlu2 %v1776_v9, %s3449_s13  ;;  %v6445_v32 = vld [vmem:[#allocation103_spill] sm:$0xff]  ;;  %v6447_v59 = vld [vmem:[#allocation86_spill] sm:$0xff] }
 0x1c5   : > { %v4945_v18 = vsel %vm717_vm0, %v6444_v23, %v768_v39  ;;  %v4959_v4 = vstv %s4883_s14  ;;  %v2064_v45 = vmax.f32 %v2057_v51, 0.0  ;;  %v2056_v37 = vadd.f32 %v4887_v5, %v1864_v49  ;;  %2025 = vrot.lane.b32.xlu1 %v2012_v29, %s3450_s18  ;;  %v6446_v23 = vld [vmem:[#allocation22_spill] sm:$0xff] }
 0x1c6   : > { %v2013_v39 = vrot.slane %v1996_v52, 2  ;;  %v6234_v24 = vrot.slane %v4927_v40, 2  ;;  %v4967_v20 = vadd.f32 %v6446_v23, %v6445_v32  ;;  %v4971_v13 = vmul.f32 %v4179_v3, %v4689_v53  ;;  %1785 = vrot.lane.b32.xlu0 %v1772_v36, %s3449_s13  ;;  %v4985_v9 = vpop.permute.xlu2 %1726  ;;  %v4987_v29 = vpop.permute.xlu1 %1289  ;;  %v6449_v32 = vld [vmem:[#allocation104_spill] sm:$0xff] }
 0x1c7   : > { %v1777_v19 = vrot.slane %v4938_v7, 2  ;;  %v746_v46 = vadd.f32 %v4807_v28, %v566_v11  ;;  %v1622_v51 = vadd.f32 %v6447_v59, %v1420_v34  ;;  %v4979_v49 = vmul.f32 %v4144_v6, %v4959_v4  ;;  %6448 = vst [vmem:[#allocation70_spill] sm:$0xff] %v4987_v29  ;;  %v6450_v36 = vld [vmem:[#allocation32_spill] sm:$0xff]  ;;  %v1849_v34 = vpop.permute.xlu0 %1848 }
 0x1c8   : > { %v4983_v52 = vmul.f32 %v4172_v16, %v4959_v4  ;;  %v606_v23 = vadd.f32 %v6450_v36, %v6449_v32  ;;  %v2062_v7 = vmax.f32 %v2055_v8, 0.0  ;;  %v4993_v28 = vmul.f32 %v4229_v57, %v4675_v0 }
 0x1c9   : > { %v1385_v6 = vmul.f32 %v4513_v48, %v4675_v0  ;;  %v2132_v11 = vsel %vm2117_vm2, %v2064_v45, -inf  ;;  %v2063_v59 = vmax.f32 %v2056_v37, 0.0  ;;  %v1866_v61 = vadd.f32 %v1849_v34, %v1622_v51  ;;  %v6451_v34 = vld [vmem:[#allocation46_spill] sm:$0xff]  ;;  %v6452_v37 = vld [vmem:[#allocation49_spill] sm:$0xff] }
 0x1ca   : > { %v2016_v55 = vsel %vm1394_vm1, %v2013_v39, %v6234_v24  ;;  %v1778_v29 = vsel %vm1394_vm1, %v1775_v33, %v1777_v19  ;;  %v5004_v8 = vmul.f32 %v4179_v3, %v4835_v12  ;;  %v5008_v32 = vmul.f32 %v4229_v57, %v4835_v12 }
 0x1cb   : > { %v1757_v36 = vmul.f32 %v4513_v48, %v4584_v22  ;;  %v5016_v51 = vmul.f32 %v4184_v2, %v4675_v0  ;;  %v2014_v33 = vsel %vm1394_vm1, %v2011_v25, %v2013_v39  ;;  %v948_v24 = vadd.f32 %v6451_v34, %v746_v46  ;;  %v6453_v46 = vld [vmem:[#allocation57_spill] sm:$0xff] }
 0x1cc   : > { %v789_v38 = vadd.f32 %v771_v43, %v606_v23  ;;  %v2118_v63 = vsel %vm2117_vm2, %v2062_v7, -inf  ;;  %v6235_v57 = vrot.slane %v4993_v28, 2  ;;  %v2133_v15 = vrot.slane %v2132_v11, 4  ;;  %2029 = vrot.lane.b32.xlu2 %v2016_v55, %s3450_s18 }
 0x1cd   : > { %v2125_v22 = vsel %vm2117_vm2, %v2063_v59, -inf  ;;  %v2058_v45 = vadd.f32 %v4887_v5, %v1866_v61  ;;  %1791 = vrot.lane.b32.xlu1 %v1778_v29, %s3449_s13  ;;  %v1408_v0 = vrot.slane %v1385_v6, 2  ;;  %v2017_v25 = vrot.slane %v5004_v8, 2  ;;  %v6458_v8 = vld [vmem:[#allocation73_spill] sm:$0xff] }
 0x1ce   : > { %v1005_v1 = vadd.f32 %v6452_v37, %v789_v38  ;;  %2027 = vrot.lane.b32.xlu0 %v2014_v33, %s3450_s18  ;;  %v1779_v39 = vrot.slane %v1757_v36, 2  ;;  %v946_v23 = vadd.f32 %v6453_v46, %v4824_v47  ;;  %v2119_v7 = vrot.slane %v2118_v63, 4  ;;  %v5038_v38 = vpop.permute.xlu2 %1350  ;;  %v5040_v59 = vpop.permute.xlu1 %1661  ;;  %v6459_v37 = vld [vmem:[#allocation94_spill] sm:$0xff] }
 0x1cf   : > { %v6454_v61 = vrot.slane %v4983_v52, 2  ;;  %v6455_v55 = vrot.slane %v4979_v49, 2  ;;  %6456 = vst [vmem:[#allocation82_spill] sm:$0xff] %v5038_v38  ;;  %v1192_v33 = vadd.f32 %v6459_v37, %v948_v24  ;;  %v2126_v47 = vrot.slane %v2125_v22, 4 }
 0x1d0   : > { %6457 = vst [vmem:[#allocation18_spill] sm:$0xff] %v5040_v59  ;;  %v1249_v36 = vadd.f32 %v6458_v8, %v1005_v1  ;;  %v6460_v34 = vrot.slane %v4842_v44, 2  ;;  %v2134_v6 = vmax.f32 %v2132_v11, %v2133_v15  ;;  %v2065_v38 = vmax.f32 %v2058_v45, 0.0 }
 0x1d1   : > { %v1448_v29 = vsel %vm1394_vm1, %v6455_v55, %v6454_v61  ;;  %v1611_v61 = vpop.permute.xlu0 %1610  ;;  %v6461_v55 = vld [vmem:[#allocation84_spill] sm:$0xff]  ;;  %v6462_v59 = vrot.slane %v5016_v51, 2  ;;  %v6463_v1 = vrot.slane %v5008_v32, 2  ;;  %v1780_v8 = vsel %vm1394_vm1, %v1777_v19, %v1779_v39 }
 0x1d2   : > { %v1405_v46 = vsel %vm1394_vm1, %v6460_v34, %v6235_v57  ;;  %v1190_v43 = vadd.f32 %v6461_v55, %v946_v23  ;;  %v2000_v44 = vmul.f32 %v4184_v2, %v4835_v12  ;;  %v2001_v37 = vmul.f32 %v4513_v48, %v4835_v12  ;;  %v6464_v34 = vld [vmem:[#allocation93_spill] sm:$0xff]  ;;  %v6465_v23 = vld [vmem:[#allocation30_spill] sm:$0xff] }
 0x1d3   : > { %v1409_v60 = vsel %vm1394_vm1, %v6462_v59, %v1408_v0  ;;  %v2020_v24 = vsel %vm1394_vm1, %v2017_v25, %v6463_v1  ;;  %v565_v15 = vadd.f32 %v6465_v23, %v6464_v34  ;;  %v774_v11 = vrot.slane %v4955_v17, 1  ;;  %v6509_v17 = vld [vmem:[#allocation53_spill] sm:$0xff] }
 0x1d4   : > { %v2120_v45 = vmax.f32 %v2118_v63, %v2119_v7  ;;  %v6466_v0 = vrot.slane %v4856_v27, 2  ;;  %v6467_v59 = vrot.slane %v4875_v30, 2  ;;  %v790_v19 = vadd.f32 %v4733_v35, %v4967_v20  ;;  %2033 = vrot.lane.b32.xlu2 %v2020_v24, %s3450_s18 }
 0x1d5   : > { %v2127_v39 = vmax.f32 %v2125_v22, %v2126_v47  ;;  %v1466_v2 = vadd.f32 %v1448_v29, %v1249_v36  ;;  %v1423_v1 = vadd.f32 %v1409_v60, %v1192_v33  ;;  %v6238_v12 = vrot.slane %v4971_v13, 1  ;;  %1793 = vrot.lane.b32.xlu1 %v1780_v8, %s3449_s13 }
 0x1d6   : > { %v1774_v55 = vsel %vm1394_vm1, %v6467_v59, %v6466_v0  ;;  %v2135_v57 = vrot.slane %v2134_v6, 2  ;;  %v1421_v34 = vadd.f32 %v1405_v46, %v1190_v43  ;;  %v2139_v23 = vsel %vm2117_vm2, %v2065_v38, -inf  ;;  %v1855_v43 = vpop.permute.xlu2 %1854  ;;  %v1908_v29 = vpop.permute.xlu1 %1907  ;;  %v6470_v59 = vld [vmem:[#allocation100_spill] sm:$0xff] }
 0x1d7   : > { %v1682_v63 = vadd.f32 %v4754_v58, %v1466_v2  ;;  %v1625_v27 = vadd.f32 %v1611_v61, %v1423_v1  ;;  %1787 = vrot.lane.b32.xlu0 %v1774_v55, %s3449_s13  ;;  %v2021_v35 = vrot.slane %v2000_v44, 2  ;;  %v2023_v60 = vrot.slane %v2001_v37, 2  ;;  %v6471_v55 = vld [vmem:[#allocation42_spill] sm:$0xff] }
 0x1d8   : > { %v745_v30 = vadd.f32 %v4821_v62, %v565_v15  ;;  %v2121_v20 = vrot.slane %v2120_v45, 2  ;;  %v1623_v22 = vadd.f32 %v4764_v31, %v1421_v34  ;;  %v5084_v7 = vstv %s5042_s15  ;;  %s3395_s15 = scalar_lea.hbm %s6213_s7, 2 }
 0x1d9   : > { %v2128_v38 = vrot.slane %v2127_v39, 2  ;;  %v2140_v36 = vrot.slane %v2139_v23, 4  ;;  %v1869_v33 = vadd.f32 %v1855_v43, %v1625_v27  ;;  %v1926_v58 = vadd.f32 %v1908_v29, %v1682_v63  ;;  %v1851_v47 = vpop.permute.xlu0 %1850 }
 0x1da   : > { %v6468_v46 = vrot.slane %v4775_v54, 1  ;;  %v5093_v62 = vmul.f32 %v4179_v3, %v4959_v4  ;;  %v1867_v31 = vadd.f32 %v1851_v47, %v1623_v22  ;;  %v2136_v24 = vmax.f32 %v2134_v6, %v2135_v57  ;;  %v6475_v47 = vld [vmem:[#allocation87_spill] sm:$0xff] }
 0x1db   : > { %v2061_v8 = vadd.f32 %v4887_v5, %v1869_v33  ;;  %v2073_v44 = vadd.f32 %v5084_v7, %v1926_v58  ;;  %v2024_v37 = vsel %vm1394_vm1, %v2021_v35, %v2023_v60  ;;  %v6469_v15 = vrot.slane %v4927_v40, 2  ;;  %v6473_v60 = vld [vmem:[#allocation56_spill] sm:$0xff]  ;;  %v6474_v40 = vld [vmem:[#allocation63_spill] sm:$0xff] }
 0x1dc   : > { %v820_v61 = vsel %vm717_vm0, %v6468_v46, %v6238_v12  ;;  %v651_v2 = vadd.f32 %v6471_v55, %v6470_v59  ;;  %v2122_v1 = vmax.f32 %v2120_v45, %v2121_v20  ;;  %v2059_v34 = vadd.f32 %v4887_v5, %v1867_v31  ;;  %2037 = vrot.lane.b32.xlu2 %v2024_v37, %s3450_s18  ;;  %v6505_v12 = vld [vmem:[#allocation116_spill] sm:$0xff] }
 0x1dd   : > { %v2018_v0 = vsel %vm1394_vm1, %v6469_v15, %v2017_v25  ;;  %v6472_v63 = vrot.slane %v5008_v32, 2  ;;  %v2129_v6 = vmax.f32 %v2127_v39, %v2128_v38  ;;  %v2141_v27 = vmax.f32 %v2139_v23, %v2140_v36  ;;  %v6476_v15 = vld [vmem:[#allocation88_spill] sm:$0xff] }
 0x1de   : > { %v2068_v22 = vmax.f32 %v2061_v8, 0.0  ;;  %v2080_v43 = vmax.f32 %v2073_v44, 0.0  ;;  %v947_v29 = vadd.f32 %v6473_v60, %v745_v30  ;;  %v1006_v33 = vadd.f32 %v6474_v40, %v790_v19  ;;  %2031 = vrot.lane.b32.xlu1 %v2018_v0, %s3450_s18  ;;  %v5119_v20 = vpop.permute.xlu2 %1352  ;;  %v5121_v38 = vpop.permute.xlu1 %1669 }
 0x1df   : > { %v2022_v57 = vsel %vm1394_vm1, %v6472_v63, %v2021_v35  ;;  %v1449_v25 = vrot.slane %v5093_v62, 2  ;;  %v2066_v58 = vmax.f32 %v2059_v34, 0.0  ;;  %v5113_v45 = vstv %s5078_s16  ;;  %s296_s16 = sand.u32 1, %s3437_s25  }
 0x1e0   : > { %v2160_v32 = vsel %vm2117_vm2, %v2068_v22, -inf  ;;  %v2181_v39 = vsel %vm2117_vm2, %v2080_v43, -inf  ;;  %2035 = vrot.lane.b32.xlu0 %v2022_v57, %s3450_s18  ;;  %v2137_v23 = vrot.slane %v2136_v24, 1  ;;  %v2123_v36 = vrot.slane %v2122_v1, 1  ;;  %s297_s20 = scalar_lea.vmem [#allocation7], %s296_s16 }
 0x1e1   : > { %v2161_v35 = vrot.slane %v2160_v32, 4  ;;  %v2182_v30 = vrot.slane %v2181_v39, 4  ;;  %v2146_v19 = vsel %vm2117_vm2, %v2066_v58, -inf  ;;  %v1250_v46 = vadd.f32 %v6475_v47, %v1006_v33  ;;  %v5124_v44 = vpop.permute.xlu0 %1659  ;;  %s3101_s21 = sshll.u32 %s297_s20, 4  ;;  %s3102_s21 = int_to_ptr.vmem [resolvable:$true] %s3101_s21 }
 0x1e2   : > { %v2142_v31 = vrot.slane %v2141_v27, 2  ;;  %v2147_v8 = vrot.slane %v2146_v19, 4  ;;  %v2130_v37 = vrot.slane %v2129_v6, 1  ;;  %v1191_v0 = vadd.f32 %v6476_v15, %v947_v29 }
 0x1e3   : > { %v6477_v59 = vrot.slane %v4983_v52, 2  ;;  %v5134_v34 = vmul.f32 %v4172_v16, %v5113_v45  ;;  %v2183_v63 = vmax.f32 %v2181_v39, %v2182_v30  ;;  %v837_v57 = vadd.f32 %v820_v61, %v651_v2 }
 0x1e4   : > { %v6478_v22 = vrot.slane %v5016_v51, 2  ;;  %v6479_v43 = vrot.slane %v4993_v28, 2  ;;  %v5143_v29 = vmul.f32 %v4179_v3, %v5113_v45  ;;  %v2148_v40 = vmax.f32 %v2146_v19, %v2147_v8  ;;  %v6483_v51 = vld [vmem:[#allocation96_spill] sm:$0xff]  ;;  %v6484_v28 = vld [vmem:[#allocation33_spill] sm:$0xff] }
 0x1e5   : > { %v1450_v55 = vsel %vm1394_vm1, %v6477_v59, %v1449_v25  ;;  %v2162_v52 = vmax.f32 %v2160_v32, %v2161_v35  ;;  %v2184_v33 = vrot.slane %v2183_v63, 2  ;;  %v5145_v58 = vmax.f32 %v2136_v24, %v2137_v23  ;;  %v6485_v24 = vld [vmem:[#allocation97_spill] sm:$0xff] }
 0x1e6   : > { %v1407_v60 = vsel %vm1394_vm1, %v6479_v43, %v6478_v22  ;;  %v5147_v47 = vmax.f32 %v2122_v1, %v2123_v36  ;;  %v1467_v16 = vadd.f32 %v1450_v55, %v1250_v46  ;;  %v2143_v39 = vmax.f32 %v2141_v27, %v2142_v31  ;;  %v6486_v1 = vld [vmem:[#allocation36_spill] sm:$0xff]  ;;  %v5166_v31 = vpop.permute.xlu2 %1730  ;;  %v1910_v8 = vpop.permute.xlu1 %1909  ;;  %v6489_v43 = vld [vmem:[#allocation111_spill] sm:$0xff] }
 0x1e7   : > { %6480 = vst [vmem:[#allocation26_spill] sm:$0xff] %v5145_v58  ;;  %v2149_v61 = vrot.slane %v2148_v40, 2  ;;  %v5149_v2 = vmax.f32 %v2129_v6, %v2130_v37  ;;  %v605_v30 = vadd.f32 %v6484_v28, %v6483_v51  ;;  %v1422_v15 = vadd.f32 %v1407_v60, %v1191_v0  ;;  %2346 = vrot.lane.b32.xlu1 %v5145_v58, %s3449_s13  ;;  %v6487_v27 = vld [vmem:[#allocation68_spill] sm:$0xff]  ;;  %v6488_v0 = vld [vmem:[#allocation107_spill] sm:$0xff] }
 0x1e8   : > { %6481 = vst [vmem:[#allocation40_spill] sm:$0xff] %v5147_v47  ;;  %v6237_v59 = vrot.slane %v5134_v34, 2  ;;  %v2185_v3 = vmax.f32 %v2183_v63, %v2184_v33  ;;  %2342 = vrot.lane.b32.xlu2 %v5147_v47, %s3449_s13  ;;  %v608_v32 = vadd.f32 %v6486_v1, %v6485_v24  ;;  %v1067_v23 = vadd.f32 %v6487_v27, %v837_v57 }
 0x1e9   : > { %6482 = vst [vmem:[#allocation54_spill] sm:$0xff] %v5149_v2  ;;  %v1683_v6 = vadd.f32 %v4908_v10, %v1467_v16  ;;  %v2150_v35 = vmax.f32 %v2148_v40, %v2149_v61  ;;  %2344 = vrot.lane.b32.xlu0 %v5149_v2, %s3449_s13  ;;  %v1624_v19 = vadd.f32 %v4919_v56, %v1422_v15  ;;  %v6236_v36 = vrot.slane %v5143_v29, 2  ;;  %v1853_v10 = vpop.permute.xlu0 %1852  ;;  %v5177_v40 = vld [vmem:[%s3563_s9 + $0x28] sm:$0xff] }
 0x1ea   : > { %v2163_v46 = vrot.slane %v2162_v52, 2  ;;  %v2186_v37 = vrot.slane %v2185_v3, 1  ;;  %v1311_v55 = vadd.f32 %v6488_v0, %v1067_v23  ;;  %v2144_v57 = vrot.slane %v2143_v39, 1  ;;  %v6494_v0 = vld [vmem:[#allocation59_spill] sm:$0xff] }
 0x1eb   : > { %v1927_v63 = vadd.f32 %v1910_v8, %v1683_v6  ;;  %v2151_v22 = vrot.slane %v2150_v35, 1  ;;  %v6490_v60 = vrot.slane %v6489_v43, 1  ;;  %v5181_v33 = vmul.f32 %v5177_v40, %v4959_v4  ;;  %v5207_v43 = vld [vmem:[%s3563_s9 + $0x10] sm:$0xff] }
 0x1ec   : > { %v1497_v16 = vsel %vm1394_vm1, %v6237_v59, %v6236_v36  ;;  %v1868_v61 = vadd.f32 %v1853_v10, %v1624_v19  ;;  %v788_v51 = vadd.f32 %v4945_v18, %v605_v30  ;;  %v5191_v28 = vmul.f32 %v4257_v14, %v4948_v41 }
 0x1ed   : > { %v775_v56 = vsel %vm717_vm0, %v6490_v60, %v774_v11  ;;  %v5195_v15 = vmul.f32 %v4257_v14, %v4959_v4  ;;  %v2074_v24 = vadd.f32 %v5084_v7, %v1927_v63  ;;  %v2164_v1 = vmax.f32 %v2162_v52, %v2163_v46 }
 0x1ee   : > { %v2060_v27 = vadd.f32 %v4887_v5, %v1868_v61  ;;  %v5199_v23 = vmax.f32 %v2150_v35, %v2151_v22  ;;  %v5201_v6 = vmax.f32 %v2185_v3, %v2186_v37  ;;  %v791_v19 = vadd.f32 %v775_v56, %v608_v32  ;;  %v6495_v3 = vld [vmem:[#allocation62_spill] sm:$0xff]  ;;  %v5228_v22 = vpop.permute.xlu1 %1728 }
 0x1ef   : > { %v1514_v8 = vadd.f32 %v1497_v16, %v1311_v55  ;;  %v2081_v18 = vmax.f32 %v2074_v24, 0.0  ;;  %v5203_v30 = vmax.f32 %v2143_v39, %v2144_v57  ;;  %v1004_v10 = vadd.f32 %v6494_v0, %v788_v51  ;;  %v1971_v57 = vpop.permute.xlu2 %1970 }
 0x1f0   : > { %6491 = vst [vmem:[#allocation80_spill] sm:$0xff] %v5199_v23  ;;  %v5211_v14 = vmul.f32 %v5207_v43, %v4948_v41  ;;  %v6243_v5 = vrot.slane %v5181_v33, 2  ;;  %v2067_v52 = vmax.f32 %v2060_v27, 0.0  ;;  %2350 = vrot.lane.b32.xlu1 %v5199_v23, %s3449_s13  ;;  %2360 = vrot.lane.b32.xlu2 %v5201_v6, %s3449_s13  ;;  %v1007_v39 = vadd.f32 %v6495_v3, %v791_v19  ;;  %v6497_v19 = vld [vmem:[#allocation92_spill] sm:$0xff] }
 0x1f1   : > { %6492 = vst [vmem:[#allocation81_spill] sm:$0xff] %v5201_v6  ;;  %v1744_v32 = vadd.f32 %v4985_v9, %v1514_v8  ;;  %v6242_v35 = vrot.slane %v5195_v15, 2  ;;  %v2188_v46 = vsel %vm2117_vm2, %v2081_v18, -inf  ;;  %2348 = vrot.lane.b32.xlu0 %v5203_v30, %s3449_s13  ;;  %v5226_v63 = vstv %s5168_s17  ;;  %v6496_v9 = vld [vmem:[#allocation79_spill] sm:$0xff]  ;;  %v5232_v24 = vpop.permute.xlu0 %1671 }
 0x1f2   : > { %6493 = vst [vmem:[#allocation43_spill] sm:$0xff] %v5203_v30  ;;  %v2189_v37 = vrot.slane %v2188_v46, 4  ;;  %v2153_v55 = vsel %vm2117_vm2, %v2067_v52, -inf  ;;  %v2165_v60 = vrot.slane %v2164_v1, 1  ;;  %v6241_v56 = vrot.slane %v4903_v26, 1 }
 0x1f3   : > { %v1251_v16 = vadd.f32 %v6496_v9, %v1007_v39  ;;  %v2154_v61 = vrot.slane %v2153_v55, 4  ;;  %v1988_v51 = vadd.f32 %v1971_v57, %v1744_v32  ;;  %v6240_v27 = vrot.slane %v5191_v28, 1  ;;  %v5249_v9 = vld [vmem:[%s3563_s9 + $0x8] sm:$0xff] }
 0x1f4   : > { %v1248_v8 = vadd.f32 %v6497_v19, %v1004_v10  ;;  %v1452_v18 = vsel %vm1394_vm1, %v1449_v25, %v6243_v5  ;;  %v2190_v0 = vmax.f32 %v2188_v46, %v2189_v37  ;;  %v6239_v52 = vrot.slane %v5211_v14, 1  ;;  %v6504_v19 = vld [vmem:[#allocation114_spill] sm:$0xff]  ;;  %v6515_v5 = vld [vmem:[#allocation108_spill] sm:$0xff] }
 0x1f5   : > { %v6498_v3 = vrot.slane %v4979_v49, 2  ;;  %v2155_v32 = vmax.f32 %v2153_v55, %v2154_v61  ;;  %v2090_v57 = vadd.f32 %v5226_v63, %v1988_v51  ;;  %v5253_v10 = vmul.f32 %v5249_v9, %v4689_v53  ;;  %v6502_v55 = vld [vmem:[#allocation110_spill] sm:$0xff]  ;;  %v6503_v61 = vld [vmem:[#allocation20_spill] sm:$0xff] }
 0x1f6   : > { %v6499_v62 = vrot.slane %v4775_v54, 1  ;;  %v6500_v25 = vrot.slane %v4745_v21, 1  ;;  %v2191_v49 = vrot.slane %v2190_v0, 2  ;;  %v5262_v37 = vmax.f32 %v2164_v1, %v2165_v60 }
 0x1f7   : > { %v1446_v39 = vsel %vm1394_vm1, %v6242_v35, %v6498_v3  ;;  %v5266_v51 = vadd.f32 %v6503_v61, %v6502_v55  ;;  %v787_v3 = vadd.f32 %v6504_v19, %v4899_v42  ;;  %v1468_v36 = vadd.f32 %v1452_v18, %v1251_v16  ;;  %v5294_v61 = vld [vmem:[%s3563_s9 + $0x20] sm:$0xff]  ;;  %v1912_v19 = vpop.permute.xlu1 %1911 }
 0x1f8   : > { %v5260_v46 = vsel %vm717_vm0, %v6500_v25, %v6499_v62  ;;  %6501 = vst [vmem:[#allocation19_spill] sm:$0xff] %v5262_v37  ;;  %v2156_v59 = vrot.slane %v2155_v32, 2  ;;  %v6506_v54 = vrot.slane %v6505_v12, 1  ;;  %v6507_v1 = vrot.slane %v4879_v50, 1  ;;  %2354 = vrot.lane.b32.xlu2 %v5262_v37, %s3449_s13  ;;  %v6516_v37 = vld [vmem:[#allocation25_spill] sm:$0xff] }
 0x1f9   : > { %v1465_v25 = vadd.f32 %v1446_v39, %v1248_v8  ;;  %v2192_v55 = vmax.f32 %v2190_v0, %v2191_v49  ;;  %v5289_v42 = vsel %vm717_vm0, %v6240_v27, %v6239_v52  ;;  %v2097_v16 = vmax.f32 %v2090_v57, 0.0  ;;  %v6510_v0 = vld [vmem:[#allocation18_spill] sm:$0xff]  ;;  %v5301_v49 = vpop.permute.xlu2 %1732  ;;  %v6512_v52 = vld [vmem:[#allocation35_spill] sm:$0xff] }
 0x1fa   : > { %v777_v62 = vsel %vm717_vm0, %v774_v11, %v6506_v54  ;;  %v5280_v60 = vsel %vm717_vm0, %v6507_v1, %v6241_v56  ;;  %6508 = vst [vmem:[#allocation76_spill] sm:$0xff] %v5289_v42  ;;  %v1684_v11 = vadd.f32 %v6509_v17, %v1468_v36  ;;  %v2157_v12 = vmax.f32 %v2155_v32, %v2156_v59  ;;  %v6511_v1 = vld [vmem:[#allocation109_spill] sm:$0xff]  ;;  %v5306_v59 = vld [vmem:[%s3563_s9] sm:$0xff] }
 0x1fb   : > { %v813_v18 = vrot.slane %v5253_v10, 1  ;;  %v5298_v8 = vmul.f32 %v5294_v61, %v4948_v41  ;;  %v1681_v39 = vadd.f32 %v6510_v0, %v1465_v25  ;;  %v2193_v54 = vrot.slane %v2192_v55, 1  ;;  %v1906_v10 = vpop.permute.xlu0 %1905  ;;  %v5315_v25 = vld [vmem:[%s3563_s9 + $0x30] sm:$0xff] }
 0x1fc   : > { %v609_v36 = vadd.f32 %v6512_v52, %v6511_v1  ;;  %v796_v32 = vmul.f32 %v5306_v59, %v4689_v53  ;;  %v1928_v57 = vadd.f32 %v1912_v19, %v1684_v11  ;;  %v2158_v17 = vrot.slane %v2157_v12, 1 }
 0x1fd   : > { %v5312_v27 = vmul.f32 %v5177_v40, %v4948_v41  ;;  %v5319_v0 = vmul.f32 %v5315_v25, %v4959_v4  ;;  %v1925_v56 = vadd.f32 %v1906_v10, %v1681_v39  ;;  %v5321_v52 = vmax.f32 %v2192_v55, %v2193_v54  ;;  %v6518_v10 = vld [vmem:[#allocation112_spill] sm:$0xff] }
 0x1fe   : > { %v1426_v1 = vmul.f32 %v5306_v59, %v4959_v4  ;;  %v2237_v11 = vsel %vm2117_vm2, %v2097_v16, -inf  ;;  %v2075_v19 = vadd.f32 %v5084_v7, %v1928_v57  ;;  %v5327_v35 = vmax.f32 %v2157_v12, %v2158_v17  ;;  %v6520_v55 = vld [vmem:[#allocation52_spill] sm:$0xff] }
 0x1ff   : > { %6513 = vst [vmem:[#allocation85_spill] sm:$0xff] %v5321_v52  ;;  %v610_v30 = vadd.f32 %v6516_v37, %v6515_v5  ;;  %v6517_v23 = vrot.slane %v4745_v21, 1  ;;  %v2072_v39 = vadd.f32 %v5084_v7, %v1925_v56  ;;  %2362 = vrot.lane.b32.xlu1 %v5321_v52, %s3449_s13  ;;  %v792_v16 = vadd.f32 %v777_v62, %v609_v36  ;;  %v6519_v56 = vld [vmem:[#allocation28_spill] sm:$0xff] }
 0x200   : > { %6514 = vst [vmem:[#allocation29_spill] sm:$0xff] %v5327_v35  ;;  %v812_v54 = vrot.slane %v796_v32, 1  ;;  %v803_v12 = vmul.f32 %v4513_v48, %v4689_v53  ;;  %v2082_v57 = vmax.f32 %v2075_v19, 0.0  ;;  %2352 = vrot.lane.b32.xlu0 %v5327_v35, %s3449_s13  ;;  %v2238_v5 = vrot.slane %v2237_v11, 4  ;;  %v6521_v32 = vld [vmem:[#allocation60_spill] sm:$0xff] }
 0x201   : > { %v5334_v6 = vsel %vm717_vm0, %v813_v18, %v6517_v23  ;;  %v2079_v37 = vmax.f32 %v2072_v39, 0.0  ;;  %v650_v17 = vadd.f32 %v6519_v56, %v6518_v10  ;;  %v1008_v52 = vadd.f32 %v6520_v55, %v792_v16  ;;  %v5352_v35 = vpop.permute.xlu2 %1358  ;;  %v1725_v39 = vpop.permute.xlu1 %1724  ;;  %v6523_v23 = vld [vmem:[#allocation14_spill] sm:$0xff]  ;;  %v6524_v56 = vld [vmem:[#allocation83_spill] sm:$0xff] }
 0x202   : > { %v1442_v62 = vrot.slane %v1426_v1, 2  ;;  %v2195_v36 = vsel %vm2117_vm2, %v2082_v57, -inf  ;;  %v1003_v53 = vadd.f32 %v6521_v32, %v787_v3  ;;  %6522 = vst [vmem:[#allocation101_spill] sm:$0xff] %v5352_v35  ;;  %v5356_v21 = vmul.f32 %v5207_v43, %v5113_v45  ;;  %v6525_v57 = vld [vmem:[#allocation99_spill] sm:$0xff] }
 0x203   : > { %v2196_v48 = vrot.slane %v2195_v36, 4  ;;  %v2174_v19 = vsel %vm2117_vm2, %v2079_v37, -inf  ;;  %v793_v2 = vadd.f32 %v6523_v23, %v610_v30  ;;  %v825_v10 = vrot.slane %v803_v12, 1  ;;  %v5360_v16 = vpop.permute.xlu0 %1720 }
 0x204   : > { %v1252_v55 = vadd.f32 %v6524_v56, %v1008_v52  ;;  %v2175_v1 = vrot.slane %v2174_v19, 4  ;;  %v1247_v3 = vadd.f32 %v6525_v57, %v1003_v53  ;;  %v6526_v32 = vrot.slane %v5319_v0, 2 }
 0x205   : > { %v6527_v37 = vrot.slane %v5181_v33, 2  ;;  %v2239_v47 = vmax.f32 %v2237_v11, %v2238_v5  ;;  %v2197_v35 = vmax.f32 %v2195_v36, %v2196_v48  ;;  %v5369_v42 = vsel %vm717_vm0, %v812_v54, %v813_v18  ;;  %v6534_v5 = vld [vmem:[#allocation41_spill] sm:$0xff] }
 0x206   : > { %v836_v30 = vadd.f32 %v5260_v46, %v650_v17  ;;  %v6528_v52 = vrot.slane %v5195_v15, 2  ;;  %v2176_v23 = vmax.f32 %v2174_v19, %v2175_v1  ;;  %v6529_v53 = vrot.slane %v4879_v50, 1  ;;  %v6533_v15 = vld [vmem:[#allocation27_spill] sm:$0xff] }
 0x207   : > { %v1454_v58 = vsel %vm1394_vm1, %v6527_v37, %v6526_v32  ;;  %v6530_v56 = vrot.slane %v4971_v13, 1  ;;  %v6531_v57 = vrot.slane %v5312_v27, 1  ;;  %v6532_v11 = vrot.slane %v5298_v8, 1 }
 0x208   : > { %v1444_v12 = vsel %vm1394_vm1, %v1442_v62, %v6528_v52  ;;  %v2198_v54 = vrot.slane %v2197_v35, 2  ;;  %v652_v17 = vadd.f32 %v6534_v5, %v6533_v15  ;;  %v6535_v62 = vld [vmem:[#allocation69_spill] sm:$0xff]  ;;  %v1469_v50 = vadd.f32 %v1454_v58, %v1252_v55  ;;  %v6537_v52 = vld [vmem:[#allocation102_spill] sm:$0xff] }
 0x209   : > { %v822_v33 = vsel %vm717_vm0, %v6530_v56, %v6529_v53  ;;  %v5385_v18 = vsel %vm717_vm0, %v6532_v11, %v6531_v57  ;;  %v1066_v36 = vadd.f32 %v6535_v62, %v836_v30  ;;  %v2177_v48 = vrot.slane %v2176_v23, 2  ;;  %v6538_v53 = vld [vmem:[#allocation45_spill] sm:$0xff]  ;;  %v6539_v57 = vld [vmem:[#allocation90_spill] sm:$0xff]  ;;  %v1969_v55 = vpop.permute.xlu2 %1968 }
 0x20a   : > { %v6536_v13 = vrot.slane %v4903_v26, 1  ;;  %v1464_v1 = vadd.f32 %v1444_v12, %v1247_v3  ;;  %v2240_v32 = vrot.slane %v2239_v47, 2  ;;  %v2199_v37 = vmax.f32 %v2197_v35, %v2198_v54  ;;  %v1914_v3 = vpop.permute.xlu1 %1913  ;;  %v5409_v5 = vld [vmem:[%s3563_s9 + $0x38] sm:$0x3] }
 0x20b   : > { %v654_v56 = vadd.f32 %v6538_v53, %v6537_v52  ;;  %v1310_v11 = vadd.f32 %v6539_v57, %v1066_v36  ;;  %v1685_v46 = vadd.f32 %v5121_v38, %v1469_v50  ;;  %v2178_v15 = vmax.f32 %v2176_v23, %v2177_v48  ;;  %v1904_v23 = vpop.permute.xlu0 %1903  ;;  %v6543_v52 = vld [vmem:[#allocation98_spill] sm:$0xff] }
 0x20c   : > { %v826_v19 = vsel %vm717_vm0, %v6536_v13, %v825_v10  ;;  %v1680_v30 = vadd.f32 %v5124_v44, %v1464_v1  ;;  %v5401_v58 = vmul.f32 %v5177_v40, %v5113_v45  ;;  %v6540_v26 = vrot.slane %v5134_v34, 2 }
 0x20d   : > { %v6541_v10 = vrot.slane %v5356_v21, 2  ;;  %v2200_v12 = vrot.slane %v2199_v37, 1  ;;  %v838_v54 = vadd.f32 %v822_v33, %v652_v17  ;;  %v1480_v38 = vmul.f32 %v5409_v5, %v5113_v45 }
 0x20e   : > { %v1929_v44 = vadd.f32 %v1914_v3, %v1685_v46  ;;  %v2179_v62 = vrot.slane %v2178_v15, 1  ;;  %v5415_v36 = vmul.f32 %v5315_v25, %v5113_v45  ;;  %v2241_v34 = vmax.f32 %v2239_v47, %v2240_v32  ;;  %v6544_v46 = vld [vmem:[#allocation39_spill] sm:$0xff]  ;;  %v6545_v47 = vld [vmem:[#allocation58_spill] sm:$0xff] }
 0x20f   : > { %v1495_v35 = vsel %vm1394_vm1, %v6541_v10, %v6540_v26  ;;  %v1924_v50 = vadd.f32 %v1904_v23, %v1680_v30  ;;  %v5417_v48 = vmax.f32 %v2199_v37, %v2200_v12  ;;  %v1433_v13 = vmul.f32 %v5409_v5, %v4959_v4 }
 0x210   : > { %v1513_v33 = vadd.f32 %v1495_v35, %v1310_v11  ;;  %v2076_v17 = vadd.f32 %v5084_v7, %v1929_v44  ;;  %v5422_v1 = vmax.f32 %v2178_v15, %v2179_v62  ;;  %v648_v53 = vadd.f32 %v6544_v46, %v6543_v52  ;;  %v6546_v15 = vld [vmem:[#allocation66_spill] sm:$0xff]  ;;  %v6547_v35 = vld [vmem:[#allocation71_spill] sm:$0xff]  ;;  %v6550_v46 = vld [vmem:[#allocation89_spill] sm:$0xff] }
 0x211   : > { %v840_v57 = vadd.f32 %v826_v19, %v654_v56  ;;  %v6253_v26 = vrot.slane %v5401_v58, 2  ;;  %v2071_v10 = vadd.f32 %v5084_v7, %v1924_v50  ;;  %2364 = vrot.lane.b32.xlu1 %v5417_v48, %s3449_s13  ;;  %v1068_v32 = vadd.f32 %v6545_v47, %v838_v54  ;;  %v6548_v50 = vld [vmem:[#allocation91_spill] sm:$0xff] }
 0x212   : > { %6542 = vst [vmem:[#allocation103_spill] sm:$0xff] %v5422_v1  ;;  %v1502_v37 = vrot.slane %v1480_v38, 2  ;;  %v1743_v4 = vadd.f32 %v1725_v39, %v1513_v33  ;;  %v2083_v11 = vmax.f32 %v2076_v17, 0.0  ;;  %2358 = vrot.lane.b32.xlu0 %v5422_v1, %s3449_s13  ;;  %v1009_v30 = vadd.f32 %v6546_v15, %v793_v2  ;;  %v5444_v17 = vpop.permute.xlu2 %1360  ;;  %v5446_v52 = vpop.permute.xlu1 %1722  ;;  %v6551_v47 = vld [vmem:[#allocation115_spill] sm:$0xff] }
 0x213   : > { %v1070_v3 = vadd.f32 %v6547_v35, %v840_v57  ;;  %v2078_v19 = vmax.f32 %v2071_v10, 0.0  ;;  %v2242_v56 = vrot.slane %v2241_v34, 1  ;;  %v6254_v12 = vrot.slane %v5415_v36, 2  ;;  %v5454_v10 = vpop.permute.xlu0 %1356 }
 0x214   : > { %v1455_v44 = vrot.slane %v1433_v13, 2  ;;  %v1987_v23 = vadd.f32 %v1969_v55, %v1743_v4  ;;  %v2202_v62 = vsel %vm2117_vm2, %v2083_v11, -inf  ;;  %v1312_v54 = vadd.f32 %v6548_v50, %v1068_v32 }
 0x215   : > { %v6549_v39 = vrot.slane %v5143_v29, 2  ;;  %v2203_v33 = vrot.slane %v2202_v62, 4  ;;  %v2167_v2 = vsel %vm2117_vm2, %v2078_v19, -inf  ;;  %v1314_v55 = vadd.f32 %v6550_v46, %v1070_v3  ;;  %v6555_v46 = vld [vmem:[#allocation31_spill] sm:$0xff] }
 0x216   : > { %v1503_v13 = vsel %vm1394_vm1, %v6254_v12, %v1502_v37  ;;  %v1473_v57 = vmul.f32 %v5306_v59, %v5113_v45  ;;  %v2168_v29 = vrot.slane %v2167_v2, 4  ;;  %v1253_v32 = vadd.f32 %v6551_v47, %v1009_v30 }
 0x217   : > { %v1499_v38 = vsel %vm1394_vm1, %v6549_v39, %v6253_v26  ;;  %v5459_v4 = vmul.f32 %v5249_v9, %v5113_v45  ;;  %v2204_v11 = vmax.f32 %v2202_v62, %v2203_v33  ;;  %v5461_v15 = vmax.f32 %v2241_v34, %v2242_v56  ;;  %v6554_v39 = vld [vmem:[#allocation13_spill] sm:$0xff] }
 0x218   : > { %v834_v35 = vadd.f32 %v5369_v42, %v648_v53  ;;  %v6553_v3 = vrot.slane %v5319_v0, 2  ;;  %v2089_v19 = vadd.f32 %v5226_v63, %v1987_v23  ;;  %v2169_v50 = vmax.f32 %v2167_v2, %v2168_v29  ;;  %v5473_v45 = vld [vmem:[%s3563_s9 + $0x18] sm:$0xff]  ;;  %s5487_s9 = sld [smem:[#allocation2 + $0x21]] }
 0x219   : > { %6552 = vst [vmem:[#allocation22_spill] sm:$0xff] %v5461_v15  ;;  %v653_v26 = vadd.f32 %v6555_v46, %v6554_v39  ;;  %v843_v30 = vmul.f32 %v5306_v59, %v4948_v41  ;;  %v5477_v34 = vmul.f32 %v5473_v45, %v4948_v41  ;;  %v2205_v42 = vrot.slane %v2204_v11, 2  ;;  %2376 = vrot.lane.b32.xlu1 %v5461_v15, %s3449_s13  ;;  %v6556_v0 = vld [vmem:[#allocation65_spill] sm:$0xff] }
 0x21a   : > { %v1456_v37 = vsel %vm1394_vm1, %v6553_v3, %v1455_v44  ;;  %v1064_v53 = vadd.f32 %v6556_v0, %v834_v35  ;;  %v1515_v56 = vadd.f32 %v1499_v38, %v1312_v54  ;;  %v1517_v44 = vadd.f32 %v1503_v13, %v1314_v55  ;;  %v1977_v35 = vpop.permute.xlu2 %1976  ;;  %v1973_v54 = vpop.permute.xlu1 %1972  ;;  %v6557_v55 = vld [vmem:[#allocation16_spill] sm:$0xff] }
 0x21b   : > { %v2170_v23 = vrot.slane %v2169_v50, 2  ;;  %v1470_v62 = vadd.f32 %v1456_v37, %v1253_v32  ;;  %v1489_v33 = vrot.slane %v1473_v57, 2  ;;  %v1490_v2 = vrot.slane %v5459_v4, 2  ;;  %v6558_v37 = vld [vmem:[#allocation12_spill] sm:$0xff] }
 0x21c   : > { %v2206_v29 = vmax.f32 %v2204_v11, %v2205_v42  ;;  %v1745_v47 = vadd.f32 %v5228_v22, %v1515_v56  ;;  %v1747_v3 = vadd.f32 %v5301_v49, %v1517_v44  ;;  %v2096_v39 = vmax.f32 %v2089_v19, 0.0  ;;  %v1916_v11 = vpop.permute.xlu0 %1915  ;;  %v6559_v49 = vld [vmem:[#allocation38_spill] sm:$0xff]  ;;  %v6560_v42 = vld [vmem:[#allocation37_spill] sm:$0xff] }
 0x21d   : > { %v2171_v46 = vmax.f32 %v2169_v50, %v2170_v23  ;;  %v859_v12 = vrot.slane %v843_v30, 1  ;;  %v864_v1 = vrot.slane %v5477_v34, 1  ;;  %v1686_v15 = vadd.f32 %v5232_v24, %v1470_v62 }
 0x21e   : > { %v2207_v38 = vrot.slane %v2206_v29, 1  ;;  %v1308_v13 = vadd.f32 %v6557_v55, %v1064_v53  ;;  %v1991_v57 = vadd.f32 %v1977_v35, %v1747_v3  ;;  %v1989_v32 = vadd.f32 %v1973_v54, %v1745_v47  ;;  %v6567_v55 = vld [vmem:[#allocation72_spill] sm:$0xff] }
 0x21f   : > { %v2172_v22 = vrot.slane %v2171_v46, 1  ;;  %v649_v19 = vadd.f32 %v6559_v49, %v6558_v37  ;;  %v1491_v50 = vsel %vm1394_vm1, %v1489_v33, %v1490_v2  ;;  %v1930_v30 = vadd.f32 %v1916_v11, %v1686_v15 }
 0x220   : > { %v5495_v24 = vmax.f32 %v2206_v29, %v2207_v38  ;;  %v696_v0 = vadd.f32 %v6560_v42, %v5266_v51  ;;  %v2230_v56 = vsel %vm2117_vm2, %v2096_v39, -inf  ;;  %v2091_v53 = vadd.f32 %v5226_v63, %v1989_v32  ;;  %v6562_v51 = vld [vmem:[#allocation15_spill] sm:$0xff]  ;;  %v6563_v29 = vld [vmem:[#allocation34_spill] sm:$0xff] }
 0x221   : > { %v5501_v44 = vmax.f32 %v2171_v46, %v2172_v22  ;;  %v6561_v23 = vrot.slane %v5191_v28, 1  ;;  %v839_v47 = vadd.f32 %v5280_v60, %v653_v26  ;;  %v2093_v33 = vadd.f32 %v5226_v63, %v1991_v57  ;;  %v6564_v39 = vld [vmem:[#allocation23_spill] sm:$0xff]  ;;  %v6565_v46 = vld [vmem:[#allocation44_spill] sm:$0xff] }
 0x222   : > { %v2077_v15 = vadd.f32 %v5084_v7, %v1930_v30  ;;  %2366 = vrot.lane.b32.xlu0 %v5495_v24, %s3449_s13  ;;  %v5513_v3 = vadd.f32 %v6563_v29, %v6562_v51  ;;  %v692_v35 = vadd.f32 %v6565_v46, %v6564_v39  ;;  %v1511_v28 = vadd.f32 %v1491_v50, %v1308_v13 }
 0x223   : > { %v861_v62 = vsel %vm717_vm0, %v859_v12, %v6561_v23  ;;  %v2098_v54 = vmax.f32 %v2091_v53, 0.0  ;;  %2356 = vrot.lane.b32.xlu2 %v5501_v44, %s3449_s13  ;;  %v835_v60 = vadd.f32 %v5334_v6, %v649_v19  ;;  %v6566_v7 = vrot.slane %v5211_v14, 1  ;;  %v5533_v19 = vpop.permute.xlu2 %1789  ;;  %v1965_v14 = vpop.permute.xlu1 %1964  ;;  %v6569_v53 = vld [vmem:[#allocation48_spill] sm:$0xff] }
 0x224   : > { %v2231_v12 = vrot.slane %v2230_v56, 4  ;;  %v2084_v38 = vmax.f32 %v2077_v15, 0.0  ;;  %v1069_v57 = vadd.f32 %v6567_v55, %v839_v47  ;;  %v885_v32 = vadd.f32 %v5385_v18, %v696_v0  ;;  %v5539_v0 = vpop.permute.xlu0 %1781  ;;  %v6570_v47 = vld [vmem:[#allocation105_spill] sm:$0xff] }
 0x225   : > { %v865_v26 = vsel %vm717_vm0, %v6566_v7, %v864_v1  ;;  %v1741_v13 = vadd.f32 %v5360_v16, %v1511_v28  ;;  %v2244_v11 = vsel %vm2117_vm2, %v2098_v54, -inf  ;;  %v2100_v22 = vmax.f32 %v2093_v33, 0.0  ;;  %v6568_v16 = vld [vmem:[#allocation106_spill] sm:$0xff]  ;;  %v6573_v28 = vld [vmem:[#allocation55_spill] sm:$0xff] }
 0x226   : > { %v2245_v37 = vrot.slane %v2244_v11, 4  ;;  %v2209_v6 = vsel %vm2117_vm2, %v2084_v38, -inf  ;;  %v5531_v49 = vstv %s5487_s9  ;;  %v881_v50 = vadd.f32 %v861_v62, %v692_v35  ;;  %v6574_v7 = vld [vmem:[#allocation78_spill] sm:$0xff] }
 0x227   : > { %v2210_v30 = vrot.slane %v2209_v6, 4  ;;  %v5537_v42 = vmul.f32 %v5294_v61, %v5531_v49  ;;  %v1985_v18 = vadd.f32 %v1965_v14, %v1741_v13  ;;  %v694_v23 = vadd.f32 %v6569_v53, %v6568_v16 }
 0x228   : > { %v1313_v33 = vadd.f32 %v6570_v47, %v1069_v57  ;;  %v2232_v15 = vmax.f32 %v2230_v56, %v2231_v12  ;;  %v2246_v51 = vmax.f32 %v2244_v11, %v2245_v37  ;;  %v6571_v29 = vrot.slane %v5415_v36, 2 }
 0x229   : > { %v6572_v39 = vrot.slane %v5401_v58, 2  ;;  %v2211_v46 = vmax.f32 %v2209_v6, %v2210_v30  ;;  %v5551_v61 = vmul.f32 %v5177_v40, %v5531_v49  ;;  %v2087_v35 = vadd.f32 %v5226_v63, %v1985_v18 }
 0x22a   : > { %v1065_v54 = vadd.f32 %v6573_v28, %v835_v60  ;;  %v1129_v38 = vadd.f32 %v6574_v7, %v885_v32  ;;  %v2258_v56 = vsel %vm2117_vm2, %v2100_v22, -inf  ;;  %v2247_v12 = vrot.slane %v2246_v51, 2  ;;  %v6577_v7 = vld [vmem:[#allocation61_spill] sm:$0xff] }
 0x22b   : > { %v1501_v62 = vsel %vm1394_vm1, %v6572_v39, %v6571_v29  ;;  %v2212_v55 = vrot.slane %v2211_v46, 2  ;;  %v1543_v36 = vrot.slane %v5537_v42, 2  ;;  %v2094_v58 = vmax.f32 %v2087_v35, 0.0  ;;  %v5572_v53 = vpop.permute.xlu2 %2029  ;;  %v5574_v47 = vpop.permute.xlu1 %1354 }
 0x22c   : > { %v1520_v57 = vmul.f32 %v5306_v59, %v5531_v49  ;;  %v1516_v13 = vadd.f32 %v1501_v62, %v1313_v33  ;;  %v2233_v11 = vrot.slane %v2232_v15, 2  ;;  %v2248_v37 = vmax.f32 %v2246_v51, %v2247_v12  ;;  %v6576_v33 = vld [vmem:[#allocation70_spill] sm:$0xff] }
 0x22d   : > { %v5562_v6 = vmul.f32 %v5249_v9, %v5531_v49  ;;  %v2259_v60 = vrot.slane %v2258_v56, 4  ;;  %v2213_v14 = vmax.f32 %v2211_v46, %v2212_v55  ;;  %v1545_v32 = vrot.slane %v5551_v61, 2 }
 0x22e   : > { %v2216_v22 = vsel %vm2117_vm2, %v2094_v58, -inf  ;;  %v1746_v30 = vadd.f32 %v5166_v31, %v1516_v13  ;;  %v6575_v18 = vrot.slane %v5356_v21, 2  ;;  %v2249_v9 = vrot.slane %v2248_v37, 1  ;;  %v1975_v21 = vpop.permute.xlu0 %1974 }
 0x22f   : > { %v2217_v16 = vrot.slane %v2216_v22, 4  ;;  %v1309_v51 = vadd.f32 %v6576_v33, %v1065_v54  ;;  %v1373_v29 = vadd.f32 %v5454_v10, %v1129_v38  ;;  %v1546_v31 = vsel %vm1394_vm1, %v1543_v36, %v1545_v32 }
 0x230   : > { %v1493_v59 = vsel %vm1394_vm1, %v1490_v2, %v6575_v18  ;;  %v2214_v4 = vrot.slane %v2213_v14, 1  ;;  %v2234_v2 = vmax.f32 %v2232_v15, %v2233_v11  ;;  %v1990_v62 = vadd.f32 %v1975_v21, %v1746_v30  ;;  %v6579_v30 = vld [vmem:[#allocation17_spill] sm:$0xff] }
 0x231   : > { %v2218_v39 = vmax.f32 %v2216_v22, %v2217_v16  ;;  %v5585_v46 = vmax.f32 %v2248_v37, %v2249_v9  ;;  %v5589_v35 = vmul.f32 %v5315_v25, %v4948_v41  ;;  %v883_v28 = vadd.f32 %v865_v26, %v694_v23  ;;  %v6578_v37 = vld [vmem:[#allocation74_spill] sm:$0xff] }
 0x232   : > { %v2260_v54 = vmax.f32 %v2258_v56, %v2259_v60  ;;  %v5591_v10 = vmax.f32 %v2213_v14, %v2214_v4  ;;  %v1125_v38 = vadd.f32 %v6577_v7, %v881_v50  ;;  %v1536_v55 = vrot.slane %v1520_v57, 2 }
 0x233   : > { %v2219_v12 = vrot.slane %v2218_v39, 2  ;;  %v2092_v58 = vadd.f32 %v5226_v63, %v1990_v62  ;;  %2378 = vrot.lane.b32.xlu0 %v5585_v46, %s3449_s13  ;;  %v1512_v15 = vadd.f32 %v1493_v59, %v1309_v51  ;;  %v1562_v13 = vadd.f32 %v1546_v31, %v1373_v29  ;;  %v2034_v9 = vpop.permute.xlu2 %2033  ;;  %v1967_v33 = vpop.permute.xlu1 %1966 }
 0x234   : > { %v1537_v11 = vrot.slane %v5562_v6, 2  ;;  %2368 = vrot.lane.b32.xlu2 %v5591_v10, %s3449_s13  ;;  %v5602_v26 = vmul.f32 %v5473_v45, %v5531_v49  ;;  %v1522_v56 = vmul.f32 %v5207_v43, %v5531_v49  ;;  %v2235_v57 = vrot.slane %v2234_v2, 1 }
 0x235   : > { %v2220_v50 = vmax.f32 %v2218_v39, %v2219_v12  ;;  %v2099_v23 = vmax.f32 %v2092_v58, 0.0  ;;  %v1127_v60 = vadd.f32 %v6578_v37, %v883_v28  ;;  %v1742_v14 = vadd.f32 %v5446_v52, %v1512_v15  ;;  %v6580_v58 = vld [vmem:[#allocation95_spill] sm:$0xff] }
 0x236   : > { %v2261_v22 = vrot.slane %v2260_v54, 2  ;;  %v1806_v6 = vadd.f32 %v5533_v19, %v1562_v13  ;;  %v1369_v18 = vadd.f32 %v6579_v30, %v1125_v38  ;;  %v5612_v16 = vstv %s5576_s19  ;;  %v5614_v21 = vpop.permute.xlu0 %1783  ;;  %s3099_s19 = scalar_lea.hbm %s6213_s7, %s3514_s28 }
 0x237   : > { %v2251_v59 = vsel %vm2117_vm2, %v2099_v23, -inf  ;;  %v2221_v51 = vrot.slane %v2220_v50, 1  ;;  %v1986_v43 = vadd.f32 %v1967_v33, %v1742_v14  ;;  %v1541_v4 = vrot.slane %v5602_v26, 2  ;;  %s3103_s22 = sshll.u32 %s3099_s19, 4  ;;  %s3104_s22 = int_to_ptr.hbm [resolvable:$true] %s3103_s22 }
 0x238   : > { %v2252_v29 = vrot.slane %v2251_v59, 4  ;;  %v2050_v31 = vadd.f32 %v2034_v9, %v1806_v6  ;;  %v1538_v52 = vsel %vm1394_vm1, %v1536_v55, %v1537_v11  ;;  %v1539_v39 = vrot.slane %v1522_v56, 2  ;;  %s3389_s29 = sshra.s32 %s3104_s22, 4  ;;  %s3390_s29 = int_to_ptr.hbm [resolvable:$true] %s3389_s29 }
 0x239   : > { %v5618_v19 = vmax.f32 %v2220_v50, %v2221_v51  ;;  %v5620_v62 = vmax.f32 %v2234_v2, %v2235_v57  ;;  %v2262_v28 = vmax.f32 %v2260_v54, %v2261_v22  ;;  %v2088_v12 = vadd.f32 %v5226_v63, %v1986_v43  ;;  %v6581_v63 = vld [vmem:[#allocation113_spill] sm:$0xff]  ;;  %s3391_s8 = scalar_lea.hbm %s3390_s29, 1  ;;  %p3396_p3 = scmp.lt.s32.totalorder %s3390_s29, %s6213_s7 }
 0x23a   : > { %v2253_v7 = vmax.f32 %v2251_v59, %v2252_v29  ;;  %v2107_v38 = vadd.f32 %v5612_v16, %v2050_v31  ;;  %v345_v15 = vmul.f32 %v5177_v40, %v6580_v58  ;;  %v343_v13 = vmul.f32 %v5473_v45, %v6580_v58  ;;  %v6582_v45 = vld [vmem:[#allocation24_spill] sm:$0xff]  ;;  %v6585_v29 = vld [vmem:[#allocation50_spill] sm:$0xff]  ;;  %p3392_p0 = scmp.ne.s32.totalorder %s3390_s29, %s3391_s8  ;;  %p3397_p4 = scmp.lt.s32.totalorder %s3395_s15, %s3391_s8 }
 0x23b   : > { %v850_v55 = vmul.f32 %v5409_v5, %v4948_v41  ;;  %v1371_v50 = vadd.f32 %v5119_v20, %v1127_v60  ;;  %2370 = vrot.lane.b32.xlu1 %v5618_v19, %s3449_s13  ;;  %v1558_v2 = vadd.f32 %v1538_v52, %v1369_v18  ;;  %v2095_v23 = vmax.f32 %v2088_v12, 0.0  ;;  %v6583_v20 = vld [vmem:[#allocation76_spill] sm:$0xff]  ;;  %v6584_v18 = vld [vmem:[#allocation75_spill] sm:$0xff]  ;;  %v2026_v33 = vpop.permute.xlu1 %2025 }
 0x23c   : > { %v2254_v54 = vrot.slane %v2253_v7, 2  ;;  %2374 = vrot.lane.b32.xlu2 %v5620_v62, %s3449_s13  ;;  %v1542_v40 = vsel %vm1394_vm1, %v1539_v39, %v1541_v4  ;;  %v522_v56 = vadd.f32 %v6582_v45, %v6581_v63  ;;  %v870_v41 = vrot.slane %v5589_v35, 1  ;;  %v6588_v45 = vld [vmem:[#allocation21_spill] sm:$0xff]  ;;  %p3393_p1 = pnand %p3392_p0, %p3531_p5  ;;  %p3398_p7 = por %p3397_p4, %p3396_p3 }
 0x23d   : > { %v882_v57 = vadd.f32 %v6583_v20, %v5513_v3  ;;  %v2114_v37 = vmax.f32 %v2107_v38, 0.0  ;;  %v1802_v60 = vadd.f32 %v5539_v0, %v1558_v2  ;;  %v2223_v22 = vsel %vm2117_vm2, %v2095_v23, -inf  ;;  %v6586_v38 = vld [vmem:[#allocation82_spill] sm:$0xff]  ;;  %v6587_v23 = vld [vmem:[#allocation11_spill] sm:$0xff] }
 0x23e   : > { %v2255_v14 = vmax.f32 %v2253_v7, %v2254_v54  ;;  %v2263_v6 = vrot.slane %v2262_v28, 1  ;;  %v872_v30 = vrot.slane %v850_v55, 1  ;;  %v2224_v9 = vrot.slane %v2223_v22, 4  ;;  %v1786_v52 = vpop.permute.xlu0 %1785  ;;  %p3394_p2 = pneg %p3393_p1 }
 0x23f   : > { %v1126_v59 = vadd.f32 %v6584_v18, %v882_v57  ;;  %v1560_v51 = vadd.f32 %v1542_v40, %v1371_v50  ;;  %v698_v31 = vadd.f32 %v6585_v29, %v522_v56  ;;  %v1540_v35 = vsel %vm1394_vm1, %v1537_v11, %v1539_v39 }
 0x240   : > { %v2046_v43 = vadd.f32 %v2026_v33, %v1802_v60  ;;  %v2256_v3 = vrot.slane %v2255_v14, 1  ;;  %v2293_v0 = vsel %vm2117_vm2, %v2114_v37, -inf  ;;  %v2225_v7 = vmax.f32 %v2223_v22, %v2224_v9  ;;  %v6590_v60 = vld [vmem:[#allocation47_spill] sm:$0xff]  ;;  %p3399_p8 = pnand %p3398_p7, %p3394_p2 }
 0x241   : > { %v1370_v12 = vadd.f32 %v6586_v38, %v1126_v59  ;;  %v1804_v58 = vadd.f32 %v1786_v52, %v1560_v51  ;;  %v5653_v54 = vmax.f32 %v2262_v28, %v2263_v6  ;;  %v1527_v50 = vmul.f32 %v5409_v5, %v5531_v49  ;;  %v6591_v9 = vld [vmem:[#allocation51_spill] sm:$0xff] }
 0x242   : > { %v2103_v55 = vadd.f32 %v5612_v16, %v2046_v43  ;;  %v5651_v2 = vmax.f32 %v2255_v14, %v2256_v3  ;;  %v521_v11 = vadd.f32 %v6587_v23, %v345_v15  ;;  %v873_v39 = vsel %vm717_vm0, %v870_v41, %v872_v30  ;;  %v6592_v33 = vld [vmem:[#allocation67_spill] sm:$0xff] }
 0x243   : > { %v2226_v40 = vrot.slane %v2225_v7, 2  ;;  %v2048_v63 = vadd.f32 %v5572_v53, %v1804_v58  ;;  %v519_v56 = vadd.f32 %v6588_v45, %v343_v13  ;;  %v2294_v20 = vrot.slane %v2293_v0, 4 }
 0x244   : > { %v2110_v57 = vmax.f32 %v2103_v55, 0.0  ;;  %2380 = vrot.lane.b32.xlu0 %v5651_v2, %s3449_s13  ;;  %2382 = vrot.lane.b32.xlu2 %v5653_v54, %s3449_s13  ;;  %v1526_v5 = vmul.f32 %v5315_v25, %v5531_v49  ;;  %v6589_v28 = vrot.slane %v5298_v8, 1  ;;  %v1559_v37 = vadd.f32 %v1540_v35, %v1370_v12  ;;  %v1792_v49 = vpop.permute.xlu1 %1791 }
 0x245   : > { %v2227_v53 = vmax.f32 %v2225_v7, %v2226_v40  ;;  %v2105_v13 = vadd.f32 %v5612_v16, %v2048_v63  ;;  %v695_v14 = vadd.f32 %v6590_v60, %v519_v56  ;;  %v887_v22 = vadd.f32 %v873_v39, %v698_v31 }
 0x246   : > { %v867_v15 = vsel %vm717_vm0, %v864_v1, %v6589_v28  ;;  %v2265_v6 = vsel %vm2117_vm2, %v2110_v57, -inf  ;;  %v1549_v30 = vrot.slane %v1527_v50, 2  ;;  %v1803_v18 = vadd.f32 %v5614_v21, %v1559_v37  ;;  %v2028_v35 = vpop.permute.xlu0 %2027 }
 0x247   : > { %v2266_v59 = vrot.slane %v2265_v6, 4  ;;  %v2112_v25 = vmax.f32 %v2105_v13, 0.0  ;;  %v2228_v8 = vrot.slane %v2227_v53, 1  ;;  %v697_v34 = vadd.f32 %v6591_v9, %v521_v11 }
 0x248   : > { %v1131_v1 = vadd.f32 %v6592_v33, %v887_v22  ;;  %v2295_v51 = vmax.f32 %v2293_v0, %v2294_v20  ;;  %v1547_v29 = vrot.slane %v1526_v5, 2  ;;  %v2047_v31 = vadd.f32 %v2028_v35, %v1803_v18 }
 0x249   : > { %v2267_v43 = vmax.f32 %v2265_v6, %v2266_v59  ;;  %v2279_v52 = vsel %vm2117_vm2, %v2112_v25, -inf  ;;  %v5679_v3 = vmax.f32 %v2227_v53, %v2228_v8  ;;  %v6593_v38 = vrot.slane %v5312_v27, 1  ;;  %v6594_v27 = vld [vmem:[#allocation64_spill] sm:$0xff] }
 0x24a   : > { %v1375_v12 = vadd.f32 %v5444_v17, %v1131_v1  ;;  %v2280_v7 = vrot.slane %v2279_v52, 4  ;;  %v2104_v55 = vadd.f32 %v5612_v16, %v2047_v31  ;;  %v1550_v0 = vsel %vm1394_vm1, %v1547_v29, %v1549_v30  ;;  %v6595_v17 = vld [vmem:[#allocation77_spill] sm:$0xff]  ;;  %v2038_v30 = vpop.permute.xlu2 %2037 }
 0x24b   : > { %v871_v21 = vsel %vm717_vm0, %v6593_v38, %v870_v41  ;;  %v2268_v58 = vrot.slane %v2267_v43, 2  ;;  %2372 = vrot.lane.b32.xlu1 %v5679_v3, %s3449_s13  ;;  %v884_v50 = vadd.f32 %v867_v15, %v695_v14  ;;  %v2296_v39 = vrot.slane %v2295_v51, 2  ;;  %v6596_v14 = vld [vmem:[#allocation101_spill] sm:$0xff] }
 0x24c   : > { %v2281_v23 = vmax.f32 %v2279_v52, %v2280_v7  ;;  %v886_v11 = vadd.f32 %v871_v21, %v697_v34  ;;  %v2111_v63 = vmax.f32 %v2104_v55, 0.0  ;;  %v1564_v56 = vadd.f32 %v1550_v0, %v1375_v12  ;;  %v1794_v5 = vpop.permute.xlu1 %1793 }
 0x24d   : > { %v2269_v40 = vmax.f32 %v2267_v43, %v2268_v58  ;;  %v1128_v45 = vadd.f32 %v6594_v27, %v884_v50  ;;  %v2297_v6 = vmax.f32 %v2295_v51, %v2296_v39  ;;  %v1544_v18 = vsel %vm1394_vm1, %v1541_v4, %v1543_v36 }
 0x24e   : > { %v2282_v41 = vrot.slane %v2281_v23, 2  ;;  %v1130_v20 = vadd.f32 %v6595_v17, %v886_v11  ;;  %v2272_v57 = vsel %vm2117_vm2, %v2111_v63, -inf  ;;  %v1808_v13 = vadd.f32 %v1794_v5, %v1564_v56  ;;  %v1788_v15 = vpop.permute.xlu0 %1787 }
 0x24f   : > { %v2270_v28 = vrot.slane %v2269_v40, 1  ;;  %v1372_v53 = vadd.f32 %v5574_v47, %v1128_v45  ;;  %v2273_v37 = vrot.slane %v2272_v57, 4  ;;  %v1548_v47 = vsel %vm1394_vm1, %v1545_v32, %v1547_v29 }
 0x250   : > { %v2283_v60 = vmax.f32 %v2281_v23, %v2282_v41  ;;  %v1374_v22 = vadd.f32 %v6596_v14, %v1130_v20  ;;  %v2052_v8 = vadd.f32 %v2038_v30, %v1808_v13  ;;  %v2298_v36 = vrot.slane %v2297_v6, 1 }
 0x251   : > { %v5699_v59 = vmax.f32 %v2269_v40, %v2270_v28  ;;  %v2274_v25 = vmax.f32 %v2272_v57, %v2273_v37  ;;  %v1561_v42 = vadd.f32 %v1544_v18, %v1372_v53  ;;  %v6598_v18 = vld [vmem:[#allocation26_spill] sm:$0xff] }
 0x252   : > { %v2284_v9 = vrot.slane %v2283_v60, 1  ;;  %v2109_v33 = vadd.f32 %v5612_v16, %v2052_v8  ;;  %v1563_v26 = vadd.f32 %v1548_v47, %v1374_v22  ;;  %v5712_v12 = vmax.f32 %v2297_v6, %v2298_v36  ;;  %v2343_v20 = vpop.permute.xlu2 %2342  ;;  %v6601_v36 = vld [vmem:[#allocation80_spill] sm:$0xff] }
 0x253   : > { %2384 = vrot.lane.b32.xlu0 %v5699_v59, %s3449_s13  ;;  %v2275_v34 = vrot.slane %v2274_v25, 2  ;;  %v1805_v35 = vadd.f32 %v1788_v15, %v1561_v42 }
 0x254   : > { %v5707_v1 = vmax.f32 %v2283_v60, %v2284_v9  ;;  %v2116_v51 = vmax.f32 %v2109_v33, 0.0  ;;  %v1807_v61 = vadd.f32 %v1792_v49, %v1563_v26  ;;  %v2032_v32 = vpop.permute.xlu1 %2031  ;;  %v6597_v60 = vld [vmem:[#allocation40_spill] sm:$0xff]  ;;  %v6600_v9 = vld [vmem:[#allocation81_spill] sm:$0xff] }
 0x255   : > { %v2276_v4 = vmax.f32 %v2274_v25, %v2275_v34  ;;  %v2049_v43 = vadd.f32 %v2032_v32, %v1805_v35  ;;  %v5733_v14 = vmax.f32 %v6597_v60, %v2343_v20  ;;  %v6599_v25 = vld [vmem:[#allocation54_spill] sm:$0xff] }
 0x256   : > { %2388 = vrot.lane.b32.xlu2 %v5707_v1, %s3449_s13  ;;  %v2307_v29 = vsel %vm2117_vm2, %v2116_v51, -inf  ;;  %v2036_v52 = vpop.permute.xlu0 %2035  ;;  %v6602_v51 = vld [vmem:[#allocation43_spill] sm:$0xff] }
 0x257   : > { %v2277_v31 = vrot.slane %v2276_v4, 1  ;;  %v2308_v38 = vrot.slane %v2307_v29, 4  ;;  %v2051_v21 = vadd.f32 %v2036_v52, %v1807_v61  ;;  %v2106_v7 = vadd.f32 %v5612_v16, %v2049_v43  ;;  %v6603_v61 = vld [vmem:[#allocation19_spill] sm:$0xff] }
 0x259   : > { %v5715_v58 = vmax.f32 %v2276_v4, %v2277_v31  ;;  %v2309_v55 = vmax.f32 %v2307_v29, %v2308_v38  ;;  %v2108_v0 = vadd.f32 %v5612_v16, %v2051_v21  ;;  %v2113_v49 = vmax.f32 %v2106_v7, 0.0  ;;  %v6604_v31 = vld [vmem:[#allocation85_spill] sm:$0xff] }
 0x25a   : > { %v2361_v30 = vpop.permute.xlu2 %2360  ;;  %v6605_v21 = vld [vmem:[#allocation29_spill] sm:$0xff] }
 0x25b   : > { %2392 = vrot.lane.b32.xlu0 %v5712_v12, %s3449_s13  ;;  %2386 = vrot.lane.b32.xlu1 %v5715_v58, %s3449_s13  ;;  %v2310_v50 = vrot.slane %v2309_v55, 2  ;;  %v2115_v23 = vmax.f32 %v2108_v0, 0.0  ;;  %v2286_v11 = vsel %vm2117_vm2, %v2113_v49, -inf  ;;  %v5748_v34 = vmax.f32 %v6600_v9, %v2361_v30 }
 0x25c   : > { %v2287_v39 = vrot.slane %v2286_v11, 4  ;;  %v2347_v22 = vpop.permute.xlu1 %2346 }
 0x25d   : > { %v2300_v40 = vsel %vm2117_vm2, %v2115_v23, -inf  ;;  %v2311_v63 = vmax.f32 %v2309_v55, %v2310_v50  ;;  %v5742_v47 = vmax.f32 %v6598_v18, %v2347_v22  ;;  %v6606_v23 = vld [vmem:[#allocation103_spill] sm:$0xff] }
 0x25e   : > { %v2301_v27 = vrot.slane %v2300_v40, 4  ;;  %v2288_v45 = vmax.f32 %v2286_v11, %v2287_v39  ;;  %v2345_v6 = vpop.permute.xlu0 %2344 }
 0x25f   : > { %v2312_v41 = vrot.slane %v2311_v63, 1  ;;  %v5745_v8 = vmax.f32 %v6599_v25, %v2345_v6 }
 0x260   : > { %v2302_v56 = vmax.f32 %v2300_v40, %v2301_v27  ;;  %v2289_v16 = vrot.slane %v2288_v45, 2 }
 0x261   : > { %v5724_v17 = vmax.f32 %v2311_v63, %v2312_v41  ;;  %v6607_v63 = vld [vmem:[#allocation22_spill] sm:$0xff] }
 0x262   : > { %v2303_v57 = vrot.slane %v2302_v56, 2  ;;  %v2290_v5 = vmax.f32 %v2288_v45, %v2289_v16  ;;  %v2355_v26 = vpop.permute.xlu2 %2354 }
 0x263   : > { %2396 = vrot.lane.b32.xlu0 %v5724_v17, %s3449_s13  ;;  %v5763_v32 = vmax.f32 %v6603_v61, %v2355_v26 }
 0x264   : > { %v2304_v28 = vmax.f32 %v2302_v56, %v2303_v57  ;;  %v2291_v53 = vrot.slane %v2290_v5, 1  ;;  %v2351_v33 = vpop.permute.xlu1 %2350 }
 0x265   : > { %v5757_v4 = vmax.f32 %v6601_v36, %v2351_v33 }
 0x266   : > { %v2305_v37 = vrot.slane %v2304_v28, 1  ;;  %v5728_v13 = vmax.f32 %v2290_v5, %v2291_v53  ;;  %v2349_v42 = vpop.permute.xlu0 %2348 }
 0x267   : > { %v5760_v35 = vmax.f32 %v6602_v51, %v2349_v42 }
 0x268   : > { %v5730_v15 = vmax.f32 %v2304_v28, %v2305_v37  ;;  %2390 = vrot.lane.b32.xlu2 %v5728_v13, %s3449_s13 }
 0x26a   : > { %2394 = vrot.lane.b32.xlu1 %v5730_v15, %s3449_s13  ;;  %s3451_s13 = smov 124  }
 0x26b   : > { %2482 = vrot.lane.b32.xlu0 %v5733_v14, %s3450_s18 }
 0x270   : > { %2486 = vrot.lane.b32.xlu2 %v5742_v47, %s3450_s18 }
 0x271   : > { %v2363_v29 = vpop.permute.xlu1 %2362 }
 0x272   : > { %2484 = vrot.lane.b32.xlu1 %v5745_v8, %s3450_s18  ;;  %v2353_v43 = vpop.permute.xlu0 %2352  ;;  %v5772_v38 = vmax.f32 %v6604_v31, %v2363_v29 }
 0x273   : > { %2500 = vrot.lane.b32.xlu0 %v5748_v34, %s3450_s18  ;;  %v5775_v7 = vmax.f32 %v6605_v21, %v2353_v43 }
 0x278   : > { %2490 = vrot.lane.b32.xlu2 %v5757_v4, %s3450_s18 }
 0x27a   : > { %2488 = vrot.lane.b32.xlu1 %v5760_v35, %s3450_s18 }
 0x27b   : > { %2494 = vrot.lane.b32.xlu0 %v5763_v32, %s3450_s18 }
 0x27d   : > { %v2357_v52 = vpop.permute.xlu2 %2356 }
 0x27e   : > { %v5778_v55 = vmax.f32 %v5501_v44, %v2357_v52 }
 0x280   : > { %2502 = vrot.lane.b32.xlu2 %v5772_v38, %s3450_s18 }
 0x282   : > { %2492 = vrot.lane.b32.xlu1 %v5775_v7, %s3450_s18 }
 0x283   : > { %v2365_v0 = vpop.permute.xlu1 %2364  ;;  %2496 = vrot.lane.b32.xlu0 %v5778_v55, %s3450_s18 }
 0x284   : > { %v2359_v49 = vpop.permute.xlu0 %2358  ;;  %v5787_v50 = vmax.f32 %v5417_v48, %v2365_v0 }
 0x285   : > { %v5790_v11 = vmax.f32 %v6606_v23, %v2359_v49 }
 0x288   : > { %2504 = vrot.lane.b32.xlu2 %v5787_v50, %s3450_s18 }
 0x28a   : > { %2498 = vrot.lane.b32.xlu1 %v5790_v11, %s3450_s18 }
 0x28b   : > { %v2377_v44 = vpop.permute.xlu1 %2376 }
 0x28c   : > { %v5800_v27 = vmax.f32 %v6607_v63, %v2377_v44 }
 0x28e   : > { %v2369_v39 = vpop.permute.xlu2 %2368 }
 0x28f   : > { %v5797_v40 = vmax.f32 %v5591_v10, %v2369_v39 }
 0x290   : > { %2516 = vrot.lane.b32.xlu2 %v5800_v27, %s3450_s18 }
 0x291   : > { %2508 = vrot.lane.b32.xlu0 %v5797_v40, %s3450_s18 }
 0x294   : > { %v2367_v48 = vpop.permute.xlu0 %2366 }
 0x295   : > { %v5807_v45 = vmax.f32 %v5495_v24, %v2367_v48 }
 0x296   : > { %v2375_v41 = vpop.permute.xlu2 %2374 }
 0x297   : > { %v5810_v56 = vmax.f32 %v5620_v62, %v2375_v41  ;;  %2506 = vrot.lane.b32.xlu1 %v5807_v45, %s3450_s18 }
 0x299   : > { %2514 = vrot.lane.b32.xlu0 %v5810_v56, %s3450_s18 }
 0x29e   : > { %v2383_v10 = vpop.permute.xlu2 %2382 }
 0x29f   : > { %v5817_v16 = vmax.f32 %v5653_v54, %v2383_v10 }
 0x2a1   : > { %2522 = vrot.lane.b32.xlu0 %v5817_v16, %s3450_s18 }
 0x2a5   : > { %v2379_v20 = vpop.permute.xlu0 %2378 }
 0x2a6   : > { %v5822_v24 = vmax.f32 %v5585_v46, %v2379_v20 }
 0x2a8   : > { %2518 = vrot.lane.b32.xlu1 %v5822_v24, %s3450_s18 }
 0x2ad   : > { %v2371_v62 = vpop.permute.xlu1 %2370 }
 0x2ae   : > { %v5827_v57 = vmax.f32 %v5618_v19, %v2371_v62 }
 0x2b0   : > { %v2389_v5 = vpop.permute.xlu2 %2388  ;;  %2510 = vrot.lane.b32.xlu2 %v5827_v57, %s3450_s18 }
 0x2b1   : > { %v5832_v54 = vmax.f32 %v5707_v1, %v2389_v5 }
 0x2b3   : > { %2528 = vrot.lane.b32.xlu0 %v5832_v54, %s3450_s18 }
 0x2b6   : > { %v2381_v28 = vpop.permute.xlu0 %2380 }
 0x2b7   : > { %v5837_v46 = vmax.f32 %v5651_v2, %v2381_v28 }
 0x2b9   : > { %2520 = vrot.lane.b32.xlu1 %v5837_v46, %s3450_s18 }
 0x2bd   : > { %v2373_v53 = vpop.permute.xlu1 %2372 }
 0x2be   : > { %v5842_v19 = vmax.f32 %v5679_v3, %v2373_v53 }
 0x2c0   : > { %2512 = vrot.lane.b32.xlu2 %v5842_v19, %s3450_s18 }
 0x2c2   : > { %v2391_v1 = vpop.permute.xlu2 %2390 }
 0x2c3   : > { %v5850_v22 = vmax.f32 %v5728_v13, %v2391_v1 }
 0x2c5   : > { %v2385_v37 = vpop.permute.xlu0 %2384  ;;  %2530 = vrot.lane.b32.xlu0 %v5850_v22, %s3450_s18 }
 0x2c6   : > { %v5847_v60 = vmax.f32 %v5699_v59, %v2385_v37 }
 0x2c8   : > { %2524 = vrot.lane.b32.xlu1 %v5847_v60, %s3450_s18 }
 0x2ca   : > { %v2487_v3 = vpop.permute.xlu2 %2486 }
 0x2cb   : > { %v5860_v18 = vmax.f32 %v5742_v47, %v2487_v3 }
 0x2cd   : > { %v2393_v2 = vpop.permute.xlu0 %2392  ;;  %v2387_v30 = vpop.permute.xlu1 %2386  ;;  %2626 = vrot.lane.b32.xlu0 %v5860_v18, %s3451_s13 }
 0x2ce   : > { %v5857_v6 = vmax.f32 %v5712_v12, %v2393_v2  ;;  %v5863_v59 = vmax.f32 %v5715_v58, %v2387_v30 }
 0x2d0   : > { %2532 = vrot.lane.b32.xlu1 %v5857_v6, %s3450_s18  ;;  %2526 = vrot.lane.b32.xlu2 %v5863_v59, %s3450_s18 }
 0x2d2   : > { %v2491_v13 = vpop.permute.xlu2 %2490 }
 0x2d3   : > { %v5872_v12 = vmax.f32 %v5757_v4, %v2491_v13 }
 0x2d5   : > { %v2397_v25 = vpop.permute.xlu0 %2396  ;;  %2630 = vrot.lane.b32.xlu0 %v5872_v12, %s3451_s13 }
 0x2d6   : > { %v5875_v47 = vmax.f32 %v5724_v17, %v2397_v25 }
 0x2d8   : > { %2536 = vrot.lane.b32.xlu1 %v5875_v47, %s3450_s18 }
 0x2da   : > { %v2503_v58 = vpop.permute.xlu2 %2502 }
 0x2db   : > { %v5882_v33 = vmax.f32 %v5772_v38, %v2503_v58 }
 0x2dc   : > { %v2395_v9 = vpop.permute.xlu1 %2394 }
 0x2dd   : > { %v5885_v42 = vmax.f32 %v5730_v15, %v2395_v9  ;;  %v2483_v26 = vpop.permute.xlu0 %2482  ;;  %2642 = vrot.lane.b32.xlu0 %v5882_v33, %s3451_s13 }
 0x2de   : > { %v5888_v36 = vmax.f32 %v5733_v14, %v2483_v26 }
 0x2df   : > { %2534 = vrot.lane.b32.xlu2 %v5885_v42, %s3450_s18 }
 0x2e0   : > { %2622 = vrot.lane.b32.xlu1 %v5888_v36, %s3451_s13 }
 0x2e2   : > { %v2505_v17 = vpop.permute.xlu2 %2504 }
 0x2e3   : > { %v5897_v51 = vmax.f32 %v5787_v50, %v2505_v17 }
 0x2e4   : > { %v2485_v4 = vpop.permute.xlu1 %2484 }
 0x2e5   : > { %v5900_v15 = vmax.f32 %v5745_v8, %v2485_v4  ;;  %v2501_v61 = vpop.permute.xlu0 %2500  ;;  %2644 = vrot.lane.b32.xlu0 %v5897_v51, %s3451_s13 }
 0x2e6   : > { %v5903_v14 = vmax.f32 %v5748_v34, %v2501_v61 }
 0x2e7   : > { %2624 = vrot.lane.b32.xlu2 %v5900_v15, %s3451_s13 }
 0x2e8   : > { %2640 = vrot.lane.b32.xlu1 %v5903_v14, %s3451_s13 }
 0x2ea   : > { %v2517_v29 = vpop.permute.xlu2 %2516 }
 0x2eb   : > { %v5912_v52 = vmax.f32 %v5800_v27, %v2517_v29 }
 0x2ec   : > { %v2489_v43 = vpop.permute.xlu1 %2488 }
 0x2ed   : > { %v5915_v8 = vmax.f32 %v5760_v35, %v2489_v43  ;;  %v2495_v31 = vpop.permute.xlu0 %2494  ;;  %2656 = vrot.lane.b32.xlu0 %v5912_v52, %s3451_s13 }
 0x2ee   : > { %v5918_v34 = vmax.f32 %v5763_v32, %v2495_v31 }
 0x2ef   : > { %2628 = vrot.lane.b32.xlu2 %v5915_v8, %s3451_s13 }
 0x2f0   : > { %2634 = vrot.lane.b32.xlu1 %v5918_v34, %s3451_s13 }
 0x2f4   : > { %v2493_v38 = vpop.permute.xlu1 %2492 }
 0x2f5   : > { %v5927_v21 = vmax.f32 %v5775_v7, %v2493_v38  ;;  %v2497_v0 = vpop.permute.xlu0 %2496 }
 0x2f6   : > { %v5930_v35 = vmax.f32 %v5778_v55, %v2497_v0 }
 0x2f7   : > { %2632 = vrot.lane.b32.xlu2 %v5927_v21, %s3451_s13 }
 0x2f8   : > { %2636 = vrot.lane.b32.xlu1 %v5930_v35, %s3451_s13 }
 0x2fc   : > { %v2499_v32 = vpop.permute.xlu1 %2498 }
 0x2fd   : > { %v5937_v49 = vmax.f32 %v5790_v11, %v2499_v32 }
 0x2ff   : > { %2638 = vrot.lane.b32.xlu2 %v5937_v49, %s3451_s13 }
 0x303   : > { %v2509_v50 = vpop.permute.xlu0 %2508 }
 0x304   : > { %v5942_v7 = vmax.f32 %v5797_v40, %v2509_v50 }
 0x306   : > { %2648 = vrot.lane.b32.xlu1 %v5942_v7, %s3451_s13 }
 0x309   : > { %v2507_v55 = vpop.permute.xlu1 %2506 }
 0x30a   : > { %v2511_v23 = vpop.permute.xlu2 %2510  ;;  %v5947_v44 = vmax.f32 %v5807_v45, %v2507_v55 }
 0x30b   : > { %v2515_v39 = vpop.permute.xlu0 %2514  ;;  %v5950_v63 = vmax.f32 %v5827_v57, %v2511_v23 }
 0x30c   : > { %v5953_v11 = vmax.f32 %v5810_v56, %v2515_v39  ;;  %2646 = vrot.lane.b32.xlu2 %v5947_v44, %s3451_s13 }
 0x30d   : > { %2650 = vrot.lane.b32.xlu0 %v5950_v63, %s3451_s13 }
 0x30e   : > { %2654 = vrot.lane.b32.xlu1 %v5953_v11, %s3451_s13 }
 0x313   : > { %v2523_v40 = vpop.permute.xlu0 %2522 }
 0x314   : > { %v5962_v27 = vmax.f32 %v5817_v16, %v2523_v40 }
 0x316   : > { %2662 = vrot.lane.b32.xlu1 %v5962_v27, %s3451_s13 }
 0x31a   : > { %v2519_v48 = vpop.permute.xlu1 %2518  ;;  %v2513_v45 = vpop.permute.xlu2 %2512 }
 0x31b   : > { %v5967_v41 = vmax.f32 %v5822_v24, %v2519_v48  ;;  %v5970_v56 = vmax.f32 %v5842_v19, %v2513_v45 }
 0x31d   : > { %2658 = vrot.lane.b32.xlu2 %v5967_v41, %s3451_s13  ;;  %2652 = vrot.lane.b32.xlu0 %v5970_v56, %s3451_s13 }
 0x325   : > { %v2529_v10 = vpop.permute.xlu0 %2528 }
 0x326   : > { %v5977_v16 = vmax.f32 %v5832_v54, %v2529_v10 }
 0x328   : > { %2668 = vrot.lane.b32.xlu1 %v5977_v16, %s3451_s13 }
 0x32a   : > { %v2527_v62 = vpop.permute.xlu2 %2526 }
 0x32b   : > { %v2521_v20 = vpop.permute.xlu1 %2520  ;;  %v5985_v57 = vmax.f32 %v5863_v59, %v2527_v62 }
 0x32c   : > { %v5982_v24 = vmax.f32 %v5837_v46, %v2521_v20 }
 0x32d   : > { %2666 = vrot.lane.b32.xlu0 %v5985_v57, %s3451_s13 }
 0x32e   : > { %2660 = vrot.lane.b32.xlu2 %v5982_v24, %s3451_s13 }
 0x337   : > { %v2531_v54 = vpop.permute.xlu0 %2530 }
 0x338   : > { %v5995_v53 = vmax.f32 %v5850_v22, %v2531_v54 }
 0x339   : > { %v2535_v19 = vpop.permute.xlu2 %2534 }
 0x33a   : > { %v2525_v5 = vpop.permute.xlu1 %2524  ;;  %v5998_v46 = vmax.f32 %v5885_v42, %v2535_v19  ;;  %2670 = vrot.lane.b32.xlu1 %v5995_v53, %s3451_s13 }
 0x33b   : > { %v5992_v28 = vmax.f32 %v5847_v60, %v2525_v5 }
 0x33c   : > { %2674 = vrot.lane.b32.xlu0 %v5998_v46, %s3451_s13 }
 0x33d   : > { %2664 = vrot.lane.b32.xlu2 %v5992_v28, %s3451_s13 }
 0x33f   : > { %v2627_v30 = vpop.permute.xlu0 %2626 }
 0x340   : > { %v2708_v58 = vmax.f32 %v5860_v18, %v2627_v30 }
 0x341   : > { %v2625_v2 = vpop.permute.xlu2 %2624 }
 0x342   : > { %v2533_v37 = vpop.permute.xlu1 %2532  ;;  %v2707_v25 = vmax.f32 %v5900_v15, %v2625_v2  ;;  %v2781_v17 = vrot.slane %v2708_v58, 6 }
 0x343   : > { %v6007_v1 = vmax.f32 %v5857_v6, %v2533_v37 }
 0x344   : > { %v2778_v9 = vrot.slane %v2707_v25, 7 }
 0x345   : > { %2672 = vrot.lane.b32.xlu2 %v6007_v1, %s3451_s13 }
 0x347   : > { %v2631_v42 = vpop.permute.xlu0 %2630 }
 0x348   : > { %v2710_v61 = vmax.f32 %v5872_v12, %v2631_v42 }
 0x349   : > { %v2629_v59 = vpop.permute.xlu2 %2628 }
 0x34a   : > { %v2537_v60 = vpop.permute.xlu1 %2536 }
 0x34b   : > { %v6012_v22 = vmax.f32 %v5875_v47, %v2537_v60  ;;  %v2709_v47 = vmax.f32 %v5915_v8, %v2629_v59  ;;  %v2787_v8 = vrot.slane %v2710_v61, 4 }
 0x34d   : > { %2676 = vrot.lane.b32.xlu2 %v6012_v22, %s3451_s13  ;;  %v2784_v43 = vrot.slane %v2709_v47, 5 }
 0x34f   : > { %v2643_v38 = vpop.permute.xlu0 %2642 }
 0x351   : > { %v2633_v29 = vpop.permute.xlu2 %2632 }
 0x352   : > { %v2623_v3 = vpop.permute.xlu1 %2622  ;;  %v2711_v18 = vmax.f32 %v5927_v21, %v2633_v29  ;;  %v2746_v29 = vld [vmem:[%s6209_s3 + $0x60] sm:$0xf] }
 0x353   : > { %v2706_v6 = vmax.f32 %v5888_v36, %v2623_v3  ;;  %3228 = vmatpush.msk.msra.mxu0 %vm2891_vm10, %v2746_v29 }
 0x354   : > { %v2790_v12 = vrot.slane %v2711_v18, 3  ;;  %v2749_v18 = vld [vmem:[%s6209_s3 + $0x78] sm:$0xf] }
 0x355   : > { %v2780_v26 = vsel %vm2779_vm3, %v2778_v9, %v2706_v6  ;;  %3252 = vmatpush.msk.msra.mxu3 %vm2891_vm10, %v2749_v18 }
 0x356   : > { %v2783_v15 = vsel %vm2782_vm4, %v2781_v17, %v2780_v26 }
 0x357   : > { %v2786_v31 = vsel %vm2785_vm5, %v2784_v43, %v2783_v15  ;;  %v2645_v40 = vpop.permute.xlu0 %2644  ;;  %v2742_v15 = vld [vmem:[%s6209_s3 + $0x40] sm:$0xff] }
 0x358   : > { %v2789_v50 = vsel %vm2788_vm6, %v2787_v8, %v2786_v31  ;;  %v2717_v2 = vmax.f32 %v5897_v51, %v2645_v40  ;;  %v2743_v31 = vld [vmem:[%s6209_s3 + $0x48] sm:$0xff]  ;;  %2917 = vmatpush.msra.mxu0 %v2742_v15 }
 0x359   : > { %v2639_v48 = vpop.permute.xlu2 %2638 }
 0x35a   : > { %v2641_v13 = vpop.permute.xlu1 %2640  ;;  %v2714_v19 = vmax.f32 %v5937_v49, %v2639_v48  ;;  %v2737_v48 = vld [vmem:[%s6209_s3 + $0x18] sm:$0xff] }
 0x35b   : > { %v2715_v62 = vmax.f32 %v5903_v14, %v2641_v13 }
 0x35d   : > { %v2799_v5 = vrot.slane %v2715_v62, 7 }
 0x35f   : > { %v2657_v45 = vpop.permute.xlu0 %2656  ;;  %v2800_v3 = vsel %vm2779_vm3, %v2799_v5, %v2714_v19 }
 0x360   : > { %v2723_v61 = vmax.f32 %v5912_v52, %v2657_v45  ;;  %v2748_v52 = vld [vmem:[%s6209_s3 + $0x70] sm:$0xf] }
 0x361   : > { %3244 = vmatpush.msk.msra.mxu2 %vm2891_vm10, %v2748_v52 }
 0x362   : > { %v2635_v4 = vpop.permute.xlu1 %2634 }
 0x363   : > { %v2712_v36 = vmax.f32 %v5918_v34, %v2635_v4  ;;  %v2792_v34 = vsel %vm2791_vm7, %v2790_v12, %v2789_v50  ;;  %v2740_v50 = vld [vmem:[%s6209_s3 + $0x30] sm:$0xff]  ;;  %v2741_v12 = vld [vmem:[%s6209_s3 + $0x38] sm:$0xff] }
 0x365   : > { %v2793_v0 = vrot.slane %v2712_v36, 2 }
 0x366   : > { %v2647_v10 = vpop.permute.xlu2 %2646 }
 0x367   : > { %v2795_v21 = vsel %vm2794_vm8, %v2793_v0, %v2792_v34  ;;  %v2718_v37 = vmax.f32 %v5947_v44, %v2647_v10  ;;  %v2738_v0 = vld [vmem:[%s6209_s3 + $0x20] sm:$0xff]  ;;  %v2735_v34 = vld [vmem:[%s6209_s3 + $0x8] sm:$0xff] }
 0x368   : > { %2918 = vmatpush.msra.mxu0 %v2738_v0 }
 0x369   : > { %v2805_v13 = vrot.slane %v2718_v37, 4 }
 0x36a   : > { %v2637_v32 = vpop.permute.xlu1 %2636 }
 0x36b   : > { %v2713_v55 = vmax.f32 %v5930_v35, %v2637_v32  ;;  %v2716_v35 = vmax.f32 %v5882_v33, %v2643_v38  ;;  %v2803_v33 = vrot.slane %v2717_v2, 5  ;;  %v2813_v32 = vrot.slane %v2723_v61, 7 }
 0x36d   : > { %v2796_v23 = vrot.slane %v2713_v55, 1  ;;  %v2801_v59 = vrot.slane %v2716_v35, 6 }
 0x36f   : > { %v2798_v39 = vsel %vm2797_vm9, %v2796_v23, %v2795_v21  ;;  %v2802_v14 = vsel %vm2782_vm4, %v2801_v59, %v2800_v3  ;;  %v2734_v23 = vld [vmem:[%s6209_s3] sm:$0xff] }
 0x370   : > { %2837 = vxpose.xlu0.b32.start [1/4] (short) (narrow) %v2798_v39, 56  ;;  %v2804_v44 = vsel %vm2785_vm5, %v2803_v33, %v2802_v14  ;;  %2919 = vmatpush.msra.mxu0 %v2734_v23 }
 0x371   : > { %v2806_v51 = vsel %vm2788_vm6, %v2805_v13, %v2804_v44 }
 0x377   : > { %v2659_v60 = vpop.permute.xlu2 %2658 }
 0x378   : > { %v2649_v20 = vpop.permute.xlu1 %2648  ;;  %v2724_v8 = vmax.f32 %v5967_v41, %v2659_v60  ;;  %v2739_v41 = vld [vmem:[%s6209_s3 + $0x28] sm:$0xff] }
 0x379   : > { %v2719_v30 = vmax.f32 %v5942_v7, %v2649_v20 }
 0x37a   : > { %v2815_v45 = vrot.slane %v2724_v8, 6 }
 0x37b   : > { %v2807_v58 = vrot.slane %v2719_v30, 3 }
 0x37d   : > { %v2808_v7 = vsel %vm2791_vm7, %v2807_v58, %v2806_v51 }
 0x37f   : > { %v2651_v54 = vpop.permute.xlu0 %2650 }
 0x380   : > { %v2655_v25 = vpop.permute.xlu1 %2654  ;;  %v2720_v6 = vmax.f32 %v5950_v63, %v2651_v54 }
 0x381   : > { %v2722_v43 = vmax.f32 %v5953_v11, %v2655_v25  ;;  %v2744_v11 = vld [vmem:[%s6209_s3 + $0x50] sm:$0xff] }
 0x382   : > { %v2809_v9 = vrot.slane %v2720_v6, 2  ;;  %2983 = vmatpush.msra.mxu2 %v2744_v11 }
 0x383   : > { %v2814_v21 = vsel %vm2779_vm3, %v2813_v32, %v2722_v43 }
 0x384   : > { %v2810_v17 = vsel %vm2794_vm8, %v2809_v9, %v2808_v7  ;;  %2984 = vmatpush.msra.mxu2 %v2740_v50  ;;  %v2816_v20 = vsel %vm2782_vm4, %v2815_v45, %v2814_v21  ;;  %v3059_v45 = vld [vmem:[%s6211_s5 + $0x18] sm:$0xff] }
 0x388   : > { %v2661_v47 = vpop.permute.xlu2 %2660  ;;  %v2663_v4 = vpop.permute.xlu1 %2662 }
 0x389   : > { %v2725_v36 = vmax.f32 %v5982_v24, %v2661_v47  ;;  %v2745_v24 = vld [vmem:[%s6209_s3 + $0x58] sm:$0xff]  ;;  %v2726_v55 = vmax.f32 %v5962_v27, %v2663_v4  ;;  %v2736_v27 = vld [vmem:[%s6209_s3 + $0x10] sm:$0xff] }
 0x38a   : > { %3016 = vmatpush.msra.mxu3 %v2745_v24  ;;  %2985 = vmatpush.msra.mxu2 %v2736_v27  ;;  %v3061_v27 = vld [vmem:[%s6211_s5 + $0x28] sm:$0xff] }
 0x38b   : > { %v2817_v39 = vrot.slane %v2725_v36, 5  ;;  %v2819_v62 = vrot.slane %v2726_v55, 4 }
 0x38c   : > { %3017 = vmatpush.msra.mxu3 %v2741_v12 }
 0x38e   : > { %3018 = vmatpush.msra.mxu3 %v2737_v48  ;;  %v3060_v48 = vld [vmem:[%s6211_s5 + $0x20] sm:$0xff] }
 0x38f   : > { %v2653_v49 = vpop.permute.xlu0 %2652 }
 0x390   : > { %v2721_v42 = vmax.f32 %v5970_v56, %v2653_v49  ;;  %v2747_v56 = vld [vmem:[%s6209_s3 + $0x68] sm:$0xf] }
 0x391   : > { %3236 = vmatpush.msk.msra.mxu1 %vm2891_vm10, %v2747_v56 }
 0x392   : > { %v2811_v26 = vrot.slane %v2721_v42, 1 }
 0x393   : > { %2950 = vmatpush.msra.mxu1 %v2743_v31  ;;  %v3063_v31 = vld [vmem:[%s6211_s5 + $0x38] sm:$0xff] }
 0x394   : > { %v2812_v63 = vsel %vm2797_vm9, %v2811_v26, %v2810_v17  ;;  %3077 = vmatpush.msrb.mxu0 %v3063_v31 }
 0x395   : > { %2838 = vxpose.xlu0.b32.cont [2/4] (short) (narrow) %v2812_v63, 56  ;;  %2951 = vmatpush.msra.mxu1 %v2739_v41 }
 0x397   : > { %v2665_v38 = vpop.permute.xlu2 %2664  ;;  %2952 = vmatpush.msra.mxu1 %v2735_v34 }
 0x398   : > { %v2727_v40 = vmax.f32 %v5992_v28, %v2665_v38  ;;  %v2818_v28 = vsel %vm2785_vm5, %v2817_v39, %v2816_v20  ;;  %v3057_v20 = vld [vmem:[%s6211_s5 + $0x8] sm:$0xff] }
 0x399   : > { %v2820_v37 = vsel %vm2788_vm6, %v2819_v62, %v2818_v28  ;;  %v3056_v62 = vld [vmem:[%s6211_s5] sm:$0xff] }
 0x39a   : > { %v2669_v10 = vpop.permute.xlu1 %2668  ;;  %v2821_v5 = vrot.slane %v2727_v40, 3  ;;  %v3062_v40 = vld [vmem:[%s6211_s5 + $0x30] sm:$0xff] }
 0x39b   : > { %v2729_v35 = vmax.f32 %v5977_v16, %v2669_v10  ;;  %3078 = vmatpush.msrb.mxu0 %v3062_v40  ;;  %v3058_v10 = vld [vmem:[%s6211_s5 + $0x10] sm:$0xff] }
 0x39c   : > { %v2822_v2 = vsel %vm2791_vm7, %v2821_v5, %v2820_v37 }
 0x39d   : > { %v2825_v3 = vrot.slane %v2729_v35, 1  ;;  %3079 = vmatpush.msrb.mxu0 %v3061_v27 }
 0x39f   : > { %v2667_v54 = vpop.permute.xlu0 %2666  ;;  %v2673_v30 = vpop.permute.xlu2 %2672  ;;  %3080 = vmatpush.msrb.mxu0 %v3060_v48 }
 0x3a0   : > { %v2728_v19 = vmax.f32 %v5985_v57, %v2667_v54  ;;  %v2731_v6 = vmax.f32 %v6007_v1, %v2673_v30  ;;  %v3035_v54 = vld [vmem:[%s6210_s4] sm:$0x1] }
 0x3a1   : > { %3081 = vmatpush.msrb.mxu0 %v3059_v45 }
 0x3a2   : > { %v2823_v60 = vrot.slane %v2728_v19, 2  ;;  %v2827_v16 = vrot.slane %v2731_v6, 7 }
 0x3a3   : > { %3082 = vmatpush.msrb.mxu0 %v3058_v10 }
 0x3a4   : > { %v2824_v59 = vsel %vm2794_vm8, %v2823_v60, %v2822_v2 }
 0x3a5   : > { %v2826_v25 = vsel %vm2797_vm9, %v2825_v3, %v2824_v59  ;;  %3083 = vmatpush.msrb.mxu0 %v3057_v20 }
 0x3a6   : > { %2839 = vxpose.xlu0.b32.cont [3/4] (short) (narrow) %v2826_v25, 56 }
 0x3a7   : > { %v2677_v14 = vpop.permute.xlu2 %2676  ;;  %3084 = vmatpush.msrb.mxu0 %v3056_v62 }
 0x3a8   : > { %v2733_v33 = vmax.f32 %v6012_v22, %v2677_v14 }
 0x3aa   : > { %v2831_v42 = vrot.slane %v2733_v33, 5  ;;  %v3064_v33 = vld [vmem:[%s6212_s6] sm:$0x1] }
 0x3ac   : > { %v2671_v13 = vpop.permute.xlu1 %2670 }
 0x3ad   : > { %v2730_v57 = vmax.f32 %v5995_v53, %v2671_v13 }
 0x3ae   : > { %v2675_v58 = vpop.permute.xlu0 %2674 }
 0x3af   : > { %v2732_v9 = vmax.f32 %v5998_v46, %v2675_v58  ;;  %v2828_v49 = vsel %vm2779_vm3, %v2827_v16, %v2730_v57 }
 0x3b1   : > { %v2829_v44 = vrot.slane %v2732_v9, 6 }
 0x3b3   : > { %v2830_v51 = vsel %vm2782_vm4, %v2829_v44, %v2828_v49 }
 0x3b4   : > { %v2832_v47 = vsel %vm2785_vm5, %v2831_v42, %v2830_v51 }
 0x3b5   : > { %2840 = vxpose.xlu0.b32.end [4/4] (short) (narrow) %v2832_v47, 56 }
 0x441   : > { %v2853_v1 = vpop.trf.xlu0 }
 0x442   : > { %3229 = vmatmul.msk.f32.vlgmr.msra.gmra.mxu0 %vm2869_vm11, %v2853_v1  ;;  %3237 = vmatmul.msk.f32.vlgmr.msra.gmra.mxu1 %vm2869_vm11, %v2853_v1 }
 0x443   : > { %3245 = vmatmul.msk.f32.vlgmr.msra.gmra.mxu2 %vm2869_vm11, %v2853_v1  ;;  %3253 = vmatmul.msk.f32.vlgmr.msra.gmra.mxu3 %vm2869_vm11, %v2853_v1 }
 0x449   : > { %v2854_v53 = vpop.trf.xlu0 }
 0x44a   : > { %3230 = vmatmul.msk.f32.gmra.mxu0 %vm2869_vm11, %v2854_v53  ;;  %3238 = vmatmul.msk.f32.gmra.mxu1 %vm2869_vm11, %v2854_v53 }
 0x44b   : > { %3246 = vmatmul.msk.f32.gmra.mxu2 %vm2869_vm11, %v2854_v53  ;;  %3254 = vmatmul.msk.f32.gmra.mxu3 %vm2869_vm11, %v2854_v53 }
 0x451   : > { %v2855_v46 = vpop.trf.xlu0 }
 0x452   : > { %3231 = vmatmul.msk.f32.gmra.mxu0 %vm2869_vm11, %v2855_v46  ;;  %3239 = vmatmul.msk.f32.gmra.mxu1 %vm2869_vm11, %v2855_v46 }
 0x453   : > { %3247 = vmatmul.msk.f32.gmra.mxu2 %vm2869_vm11, %v2855_v46  ;;  %3255 = vmatmul.msk.f32.gmra.mxu3 %vm2869_vm11, %v2855_v46 }
 0x459   : > { %v2856_v22 = vpop.trf.xlu0 }
 0x45a   : > { %3232 = vmatmul.msk.f32.gmra.mxu0 %vm2869_vm11, %v2856_v22  ;;  %3240 = vmatmul.msk.f32.gmra.mxu1 %vm2869_vm11, %v2856_v22 }
 0x45b   : > { %3248 = vmatmul.msk.f32.gmra.mxu2 %vm2869_vm11, %v2856_v22  ;;  %3256 = vmatmul.msk.f32.gmra.mxu3 %vm2869_vm11, %v2856_v22 }
 0x461   : > { %v2857_v7 = vpop.trf.xlu0 }
 0x462   : > { %3233 = vmatmul.msk.f32.gmra.mxu0 %vm2869_vm11, %v2857_v7  ;;  %3241 = vmatmul.msk.f32.gmra.mxu1 %vm2869_vm11, %v2857_v7 }
 0x463   : > { %3249 = vmatmul.msk.f32.gmra.mxu2 %vm2869_vm11, %v2857_v7  ;;  %3257 = vmatmul.msk.f32.gmra.mxu3 %vm2869_vm11, %v2857_v7 }
 0x469   : > { %v2858_v26 = vpop.trf.xlu0 }
 0x46a   : > { %3234 = vmatmul.msk.f32.gmra.mxu0 %vm2869_vm11, %v2858_v26  ;;  %3242 = vmatmul.msk.f32.gmra.mxu1 %vm2869_vm11, %v2858_v26 }
 0x46b   : > { %3250 = vmatmul.msk.f32.gmra.mxu2 %vm2869_vm11, %v2858_v26  ;;  %3258 = vmatmul.msk.f32.gmra.mxu3 %vm2869_vm11, %v2858_v26 }
 0x471   : > { %v2859_v17 = vpop.trf.xlu0 }
 0x472   : > { %3235 = vmatmul.msk.f32.gmra.mxu0 %vm2869_vm11, %v2859_v17  ;;  %3243 = vmatmul.msk.f32.gmra.mxu1 %vm2869_vm11, %v2859_v17 }
 0x473   : > { %3251 = vmatmul.msk.f32.gmra.mxu2 %vm2869_vm11, %v2859_v17  ;;  %3259 = vmatmul.msk.f32.gmra.mxu3 %vm2869_vm11, %v2859_v17 }
 0x4bf   : > { %v2921_v63 = vpop.f32.mrf.mxu0  ;;  %v2954_v4 = vpop.f32.mrf.mxu1 }
 0x4c0   : > { %v3036_v37 = vadd.f32 %v3035_v54, %v2921_v63 }
 0x4c6   : > { %v2987_v61 = vpop.f32.mrf.mxu2  ;;  %v3020_v29 = vpop.f32.mrf.mxu3 }
 0x4c7   : > { %v2924_v56 = vpop.f32.mrf.mxu0  ;;  %v2956_v15 = vpop.f32.mrf.mxu1 }
 0x4c8   : > { %3038 = vrot.lane.b32.xlu1 %v2924_v56, %s3452_s23 }
 0x4ce   : > { %v2989_v43 = vpop.f32.mrf.mxu2  ;;  %v3022_v36 = vpop.f32.mrf.mxu3 }
 0x4cf   : > { %v2927_v52 = vpop.f32.mrf.mxu0  ;;  %v2958_v18 = vpop.f32.mrf.mxu1 }
 0x4d6   : > { %v2991_v8 = vpop.f32.mrf.mxu2  ;;  %v3024_v38 = vpop.f32.mrf.mxu3 }
 0x4d7   : > { %v2929_v11 = vpop.f32.mrf.mxu0  ;;  %v2961_v24 = vpop.f32.mrf.mxu1 }
 0x4d8   : > { %3044 = vrot.lane.b32.xlu2 %v2961_v24, %s3452_s23 }
 0x4de   : > { %v2993_v0 = vpop.f32.mrf.mxu2  ;;  %v3026_v32 = vpop.f32.mrf.mxu3 }
 0x4df   : > { %v2931_v41 = vpop.f32.mrf.mxu0  ;;  %v2964_v50 = vpop.f32.mrf.mxu1 }
 0x4e6   : > { %v2995_v12 = vpop.f32.mrf.mxu2  ;;  %v3028_v55 = vpop.f32.mrf.mxu3 }
 0x4e7   : > { %v2933_v23 = vpop.f32.mrf.mxu0  ;;  %v2966_v34 = vpop.f32.mrf.mxu1 }
 0x4ee   : > { %v2998_v21 = vpop.f32.mrf.mxu2  ;;  %v3030_v39 = vpop.f32.mrf.mxu3 }
 0x4ef   : > { %3050 = vrot.lane.b32.xlu1 %v2998_v21, %s3452_s23  ;;  %v2935_v28 = vpop.f32.mrf.mxu0  ;;  %v2968_v5 = vpop.f32.mrf.mxu1  ;;  %s3091_s23 = scalar_lea.sflag [#allocation3], %s296_s16 }
 0x4f6   : > { %v3001_v35 = vpop.f32.mrf.mxu2  ;;  %v3032_v6 = vpop.f32.mrf.mxu3 }
 0x532   : > { %v3045_v3 = vpop.permute.xlu2 %3044 }
 0x53a   : > { %v3039_v19 = vpop.permute.xlu1 %3038 }
 0x53b   : > { %v3041_v60 = vadd.f32 %v3039_v19, %v3036_v37 }
 0x53d   : > { %v3042_v2 = vadd.f32 %v3041_v60, %v2958_v18 }
 0x53f   : > { %v3047_v30 = vadd.f32 %v3045_v3, %v3042_v2 }
 0x541   : > { %v3048_v59 = vadd.f32 %v3047_v30, %v2995_v12 }
 0x561   : > { %v3051_v25 = vpop.permute.xlu1 %3050 }
 0x562   : > { %v3053_v14 = vadd.f32 %v3051_v25, %v3048_v59 }
 0x564   : > { %v3054_v13 = vadd.f32 %v3053_v14, %v3032_v6 }
 0x566   : > { %v3055_v16 = vmax.f32 %v3054_v13, 0.0 }
 0x568   : > { %3260 = vmatmul.msk.f32.vlgmr.msrb.gmra.mxu0 %vm3065_vm12, %v3055_v16 }
 0x5e5   : > { %v3086_v57 = vpop.f32.mrf.mxu0 }
 0x5e6   : > { %v3087_v58 = vadd.f32 %v3086_v57, %v3064_v33 }
 0x5e8   : > { %3089 = vst [vmem:[%s297_s20] sm:$0x1] %v3087_v58 }
 0x5e9   : > { %3402 = shalt.err (!%p3399_p8)
}
 0x5ea   : > { %3272 = dma.vmem_to_hbm [thread:$0]  (%p3531_p5), %s3102_s21, 16, %s3104_s22, %s3091_s23  }
 0x5eb PF: > { %p3289_p9 = scmp.ge.s32.totalorder %s3445_s27, 2  ;;  %s3115_s16 = sand.u32 1, %s3433_s24  }
 0x5ec   : > { %s3116_s19 = scalar_lea.sflag [#allocation3], %s3115_s16 }
 0x5ed   : > { %p3282_p10 = pnand %p3289_p9, %p3535_p6 }
 0x5ef   : > { %p3283_p11 = pneg %p3282_p10 }
 0x5f1   : > { %3428 = dma.done.wait (%p3283_p11), %s3116_s19, 16  }
 0x5f2   : > { %3430 = vsyncadd (%p3283_p11), %s3116_s19, 4294967280  ;;  %p19_p12 = scmp.ge.s32.totalorder %s3518_s30, 4   ;;  %s6608_s24 = smov %s3437_s25 }
 0x5f3   : > { %s6609_s25 = smov %s3441_s26  ;;  %s6610_s26 = smov %s3529_s10 }
 0x5f4   : > { %s6611_s27 = smov %s3518_s30  ;;  %21 = sbr.rel (!%p19_p12) target bundleno = 5 (0x5), region = 92 }
 0x5f9   :  { %3121 = vsyncpa [#allocation3], 1 }
 0x5fa   :  { %3123 = vsyncpa [#allocation3 + $0x1], 1 }
 0x5fb   :  { %3124 = vsyncpa [#allocation4], 1 }
 0x5fc   :  { %3126 = vsyncpa [#allocation4 + $0x1], 1 }
 0x5fd   :  { %3127 = vsyncpa [#allocation6], 1 }

</bundles_post_ra>
